<compile_context>
chip_gen: v6e
topology: v6e:2x2x1
jax: 0.10.0
libtpu: 0.0.40
codegen_flags: <defaults>
</compile_context>

<pallas_src>
import functools

import jax
import jax.numpy as jnp
from jax.experimental import pallas as pl
from jax.experimental.pallas import tpu as pltpu


_VMEM_LIMIT = 32 * 1024 * 1024       # explicit scoped-VMEM budget (v5e default is 16 MiB)
_FUSED_BUDGET = 16 * 1024 * 1024     # max per-step VMEM footprint for the fused conv kernel


def _round_up(x, m):
    return (x + m - 1) // m * m


# ----------------------------------------------------------------------------
# Pallas kernel 1: tiled matmul + bias + optional per-channel PReLU
# (used for the stride-2 stem convs and as a large-image fallback)
# ----------------------------------------------------------------------------
def _mm_bias_act_kernel(x_ref, w_ref, b_ref, a_ref, o_ref, *, apply_prelu):
    acc = jnp.dot(x_ref[...], w_ref[...], preferred_element_type=jnp.float32)
    acc = acc + b_ref[...]                        # (tm, N) + (1, N)
    if apply_prelu:
        acc = jnp.where(acc >= 0.0, acc, acc * a_ref[...])
    o_ref[...] = acc.astype(o_ref.dtype)


def pallas_matmul_bias_act(x2d, w2d, b2, a2, apply_prelu=True, tm_max=512):
    """x2d: (M, K) bf16, w2d: (K, N) bf16, b2/a2: (1, N) f32 -> (M, N) bf16."""
    M, K = x2d.shape
    N = w2d.shape[1]
    if M <= tm_max:
        tm = max(_round_up(M, 8), 8)
        Mp = tm
    else:
        tm = tm_max
        Mp = _round_up(M, tm)
    xp = x2d if Mp == M else jnp.pad(x2d, ((0, Mp - M), (0, 0)))

    kernel = functools.partial(_mm_bias_act_kernel, apply_prelu=apply_prelu)
    out = pl.pallas_call(
        kernel,
        out_shape=jax.ShapeDtypeStruct((Mp, N), jnp.bfloat16),
        grid_spec=pltpu.PrefetchScalarGridSpec(
            num_scalar_prefetch=0,
            grid=(Mp // tm,),
            in_specs=[
                pl.BlockSpec((tm, K), lambda i: (i, 0)),
                pl.BlockSpec((K, N), lambda i: (0, 0)),
                pl.BlockSpec((1, N), lambda i: (0, 0)),
                pl.BlockSpec((1, N), lambda i: (0, 0)),
            ],
            out_specs=pl.BlockSpec((tm, N), lambda i: (i, 0)),
        ),
        compiler_params=pltpu.CompilerParams(
            dimension_semantics=("parallel",),
            vmem_limit_bytes=_VMEM_LIMIT),
    )(xp, w2d, b2, a2)
    return out[:M] if Mp != M else out


def conv2d_im2col(x, w9, b2, a2, stride=1, padding=1, apply_prelu=True):
    """3x3 conv via im2col + Pallas matmul. x: (N,H,W,Cin) bf16; w9: (9,Cin,Cout)."""
    n, h, wdt, cin = x.shape
    cout = w9.shape[-1]
    kh = kw = 3
    xp = jnp.pad(x, ((0, 0), (padding, padding), (padding, padding), (0, 0)))
    oh = (h + 2 * padding - kh) // stride + 1
    ow = (wdt + 2 * padding - kw) // stride + 1
    cols = []
    for dy in range(kh):
        for dx in range(kw):
            cols.append(xp[:, dy:dy + stride * oh:stride,
                           dx:dx + stride * ow:stride, :])
    x2d = jnp.concatenate(cols, axis=-1).reshape(n * oh * ow, kh * kw * cin)
    w2d = w9.reshape(kh * kw * cin, cout)
    out2d = pallas_matmul_bias_act(x2d, w2d, b2, a2, apply_prelu=apply_prelu)
    return out2d.reshape(n, oh, ow, cout)


# ----------------------------------------------------------------------------
# Pallas kernel 2: fused 3x3 stride-1 conv on the padded-flat layout
#   input/output layout: (n, (H+4)*(W+2), C) with a zero ring; valid pixel
#   (r, j) lives at flat index (r+2)*(W+2) + (j+1).  Each of the 9 taps is a
#   pure row-offset slice of the flat image, so the conv is 9 accumulating
#   2-D bf16 matmuls fully inside VMEM.  Bias / PReLU / residual fused.
# ----------------------------------------------------------------------------
def _conv3x3_pl_kernel(x_ref, w_ref, b_ref, a_ref, m_ref, *rest,
                       wp, apply_prelu, has_residual):
    if has_residual:
        r_ref, o_ref = rest
    else:
        (o_ref,) = rest
    L = x_ref.shape[1]
    cout = o_ref.shape[2]
    m0 = wp + 1
    mc = L - 2 * (wp + 1)

    acc = jnp.zeros((mc, cout), jnp.float32)
    for dy in range(3):
        for dx in range(3):
            off = m0 + (dy - 1) * wp + (dx - 1)            # static, >= 0
            win = x_ref[0, off:off + mc, :]                # (mc, cin) bf16
            acc = acc + jnp.dot(win, w_ref[dy * 3 + dx],
                                preferred_element_type=jnp.float32)
    acc = acc + b_ref[...]                                 # (1, cout)
    if apply_prelu:
        acc = jnp.where(acc >= 0.0, acc, acc * a_ref[...])
    if has_residual:
        acc = acc + r_ref[0, m0:m0 + mc, :].astype(jnp.float32)
    acc = acc * m_ref[...]                                 # zero the ring positions

    o_ref[...] = jnp.zeros(o_ref.shape, o_ref.dtype)       # zero ring rows
    o_ref[0, m0:m0 + mc, :] = acc.astype(o_ref.dtype)


def conv3x3_pl(x_pl, w9, b2, a2, mask_mid, wp, apply_prelu=True, residual_pl=None):
    n, L, cin = x_pl.shape
    cout = w9.shape[-1]
    mc = L - 2 * (wp + 1)
    has_res = residual_pl is not None

    kernel = functools.partial(_conv3x3_pl_kernel, wp=wp,
                               apply_prelu=apply_prelu, has_residual=has_res)
    in_specs = [
        pl.BlockSpec((1, L, cin), lambda b: (b, 0, 0)),
        pl.BlockSpec((9, cin, cout), lambda b: (0, 0, 0)),
        pl.BlockSpec((1, cout), lambda b: (0, 0)),
        pl.BlockSpec((1, cout), lambda b: (0, 0)),
        pl.BlockSpec((mc, 1), lambda b: (0, 0)),
    ]
    args = [x_pl, w9, b2, a2, mask_mid]
    if has_res:
        in_specs.append(pl.BlockSpec((1, L, cout), lambda b: (b, 0, 0)))
        args.append(residual_pl)

    return pl.pallas_call(
        kernel,
        out_shape=jax.ShapeDtypeStruct((n, L, cout), jnp.bfloat16),
        grid_spec=pltpu.PrefetchScalarGridSpec(
            num_scalar_prefetch=0,
            grid=(n,),
            in_specs=in_specs,
            out_specs=pl.BlockSpec((1, L, cout), lambda b: (b, 0, 0)),
        ),
        compiler_params=pltpu.CompilerParams(
            dimension_semantics=("parallel",),
            vmem_limit_bytes=_VMEM_LIMIT),
    )(*args)


def to_pl(x):
    """(n, H, W, C) -> zero-ringed padded-flat (n, (H+4)*(W+2), C)."""
    n, H, W, C = x.shape
    xp = jnp.pad(x, ((0, 0), (2, 2), (1, 1), (0, 0)))
    return xp.reshape(n, (H + 4) * (W + 2), C)


def from_pl(x_flat, H, W):
    n, L, C = x_flat.shape
    xq = x_flat.reshape(n, H + 4, W + 2, C)
    return xq[:, 2:H + 2, 1:W + 1, :]


def pl_mask_mid(H, W):
    """f32 validity mask for the computed middle slice of the padded-flat layout."""
    Wp, Hq = W + 2, H + 4
    idx = jnp.arange(Hq * Wp, dtype=jnp.int32)
    row = idx // Wp
    col = idx % Wp
    valid = (row >= 2) & (row < H + 2) & (col >= 1) & (col < W + 1)
    m0 = Wp + 1
    mc = Hq * Wp - 2 * (Wp + 1)
    return valid[m0:m0 + mc].astype(jnp.float32).reshape(mc, 1)


def _pl_fits(H, W, cin, cout):
    L = (H + 4) * (W + 2)
    need = (2 * L * cin * 2 + 2 * L * cout * 2 + 2 * L * cout * 2
            + L * cout * 4 + 2 * L * cin * 2 + 2 * 9 * cin * cout * 2 + L * 4)
    return need < _FUSED_BUDGET


def pixel_shuffle2(y):
    n, h, w, c4 = y.shape
    c = c4 // 4
    y = y.reshape(n, h, w, 2, 2, c)
    y = jnp.transpose(y, (0, 1, 3, 2, 4, 5))
    return y.reshape(n, 2 * h, 2 * w, c)


# ----------------------------------------------------------------------------
# Bilinear resize (align_corners=False); no-op when scale == 1 (test case)
# ----------------------------------------------------------------------------
def bilinear_resize(x, scale):
    if scale == 1 or scale == 1.0:
        return x
    n, h, w, c = x.shape
    oh, ow = int(h * scale), int(w * scale)
    ys = jnp.maximum((jnp.arange(oh, dtype=jnp.float32) + 0.5) / scale - 0.5, 0.0)
    xs = jnp.maximum((jnp.arange(ow, dtype=jnp.float32) + 0.5) / scale - 0.5, 0.0)
    y0 = jnp.floor(ys).astype(jnp.int32)
    x0 = jnp.floor(xs).astype(jnp.int32)
    y1 = jnp.minimum(y0 + 1, h - 1)
    x1 = jnp.minimum(x0 + 1, w - 1)
    wy = (ys - y0.astype(jnp.float32)).reshape(1, oh, 1, 1)
    wx = (xs - x0.astype(jnp.float32)).reshape(1, 1, ow, 1)
    r0 = jnp.take(x, y0, axis=1)
    r1 = jnp.take(x, y1, axis=1)
    rows = r0 * (1.0 - wy) + r1 * wy
    c0 = jnp.take(rows, x0, axis=2)
    c1 = jnp.take(rows, x1, axis=2)
    return c0 * (1.0 - wx) + c1 * wx


# ----------------------------------------------------------------------------
# Parameter init (deterministic, PyTorch layouts) + layout preparation
# ----------------------------------------------------------------------------
def _conv_p(key, cin, cout, k):
    k1, k2 = jax.random.split(key)
    return dict(w=jax.random.normal(k1, (cout, cin, k, k), jnp.float32) * 0.1,
                b=jax.random.normal(k2, (cout,), jnp.float32) * 0.01,
                a=jnp.full((cout,), 0.25, jnp.float32))


def _convT_p(key, cin, cout, k):
    k1, k2 = jax.random.split(key)
    return dict(w=jax.random.normal(k1, (cin, cout, k, k), jnp.float32) * 0.1,
                b=jax.random.normal(k2, (cout,), jnp.float32) * 0.01,
                a=jnp.full((cout,), 0.25, jnp.float32))


def init_ifblock_params(key, in_planes, c=64):
    keys = jax.random.split(key, 14)
    p = {}
    p['conv0_0'] = _conv_p(keys[0], in_planes, c // 2, 3)
    p['conv0_1'] = _conv_p(keys[1], c // 2, c, 3)
    for i, name in enumerate(['cb0', 'cb1', 'cb2', 'cb3']):
        p[name + '_0'] = _conv_p(keys[2 + 2 * i], c, c, 3)
        p[name + '_1'] = _conv_p(keys[3 + 2 * i], c, c, 3)
    p['conv1_0'] = _convT_p(keys[10], c, c // 2, 4)
    p['conv1_1'] = _convT_p(keys[11], c // 2, 4, 4)
    p['conv2_0'] = _convT_p(keys[12], c, c // 2, 4)
    p['conv2_1'] = _convT_p(keys[13], c // 2, 1, 4)
    return p


def _prep_conv(p):
    w = p['w']                                  # (cout, cin, 3, 3)
    cout, cin = w.shape[0], w.shape[1]
    w9 = jnp.transpose(w, (2, 3, 1, 0)).reshape(9, cin, cout).astype(jnp.bfloat16)
    b2 = p['b'].reshape(1, cout).astype(jnp.float32)
    a2 = p['a'].reshape(1, cout).astype(jnp.float32)
    return dict(w9=w9, b2=b2, a2=a2)


def _deconv_to_subpixel(w, b, a=None):
    """ConvTranspose2d(k=4,s=2,p=1) -> equivalent sub-pixel 3x3 conv weights.

    Returns w9 (9, cin, 4*cout), b2/a2 (1, 4*cout); output channel order is
    (r, s, cout) so a depth-to-space(2) pixel shuffle reproduces the deconv.
    """
    cin, cout = w.shape[0], w.shape[1]
    wf = jnp.transpose(w[:, :, ::-1, ::-1], (1, 0, 2, 3))      # (cout, cin, 4, 4) flipped
    W3 = jnp.zeros((2, 2, cout, cin, 3, 3), jnp.float32)
    for r in (0, 1):
        for s in (0, 1):
            for ai in (0, 1):
                for bi in (0, 1):
                    W3 = W3.at[r, s, :, :, r + ai, s + bi].set(
                        wf[:, :, r + 2 * ai, s + 2 * bi])
    w9 = jnp.transpose(W3, (4, 5, 3, 0, 1, 2)).reshape(9, cin, 4 * cout)
    w9 = w9.astype(jnp.bfloat16)
    b2 = jnp.tile(b.astype(jnp.float32), 4).reshape(1, 4 * cout)
    if a is None:
        a2 = jnp.ones((1, 4 * cout), jnp.float32)
    else:
        a2 = jnp.tile(a.astype(jnp.float32), 4).reshape(1, 4 * cout)
    return dict(w9=w9, b2=b2, a2=a2)


def prepare_params(p, c):
    prep = {'conv0_0': _prep_conv(p['conv0_0']),
            'conv0_1': _prep_conv(p['conv0_1'])}
    for name in ('cb0', 'cb1', 'cb2', 'cb3'):
        prep[name + '_0'] = _prep_conv(p[name + '_0'])
        prep[name + '_1'] = _prep_conv(p[name + '_1'])
    # Stage-1 upsample head: fuse conv1_0 and conv2_0 along cout (lane-dense N=4c).
    w_up1 = jnp.concatenate([p['conv1_0']['w'], p['conv2_0']['w']], axis=1)
    b_up1 = jnp.concatenate([p['conv1_0']['b'], p['conv2_0']['b']])
    a_up1 = jnp.concatenate([p['conv1_0']['a'], p['conv2_0']['a']])
    prep['up1'] = _deconv_to_subpixel(w_up1, b_up1, a_up1)
    # Stage-2: conv1_1 / conv2_1 fused block-diagonally (channels [flow(4); mask(1)]).
    half = c // 2
    w_up2 = jnp.zeros((c, 5, 4, 4), jnp.float32)
    w_up2 = w_up2.at[:half, 0:4].set(p['conv1_1']['w'])
    w_up2 = w_up2.at[half:, 4:5].set(p['conv2_1']['w'])
    b_up2 = jnp.concatenate([p['conv1_1']['b'], p['conv2_1']['b']])
    prep['up2'] = _deconv_to_subpixel(w_up2, b_up2, None)
    return prep


# ----------------------------------------------------------------------------
# Forward pass (NCHW in / out, matching the PyTorch module)
# ----------------------------------------------------------------------------
def ifblock_forward(prep, x, flow, scale=1):
    x = jnp.transpose(x, (0, 2, 3, 1)).astype(jnp.float32)
    flow = jnp.transpose(flow, (0, 2, 3, 1)).astype(jnp.float32)
    x = bilinear_resize(x, 1.0 / scale)
    flow = bilinear_resize(flow, 1.0 / scale) * (1.0 / scale)
    feat = jnp.concatenate([x, flow], axis=-1).astype(jnp.bfloat16)

    # Stem: two stride-2 convs via im2col + tiled matmul kernel.
    feat = conv2d_im2col(feat, stride=2, padding=1, apply_prelu=True, **prep['conv0_0'])
    feat = conv2d_im2col(feat, stride=2, padding=1, apply_prelu=True, **prep['conv0_1'])

    n, h4, w4, c = feat.shape
    use_fused = _pl_fits(h4, w4, c, 4 * c) and _pl_fits(2 * h4, 2 * w4, c, c)

    if use_fused:
        wp1 = w4 + 2
        mask1 = pl_mask_mid(h4, w4)
        feat_pl = to_pl(feat)
        for name in ('cb0', 'cb1', 'cb2', 'cb3'):
            t_pl = conv3x3_pl(feat_pl, mask_mid=mask1, wp=wp1, apply_prelu=True,
                              **prep[name + '_0'])
            feat_pl = conv3x3_pl(t_pl, mask_mid=mask1, wp=wp1, apply_prelu=True,
                                 residual_pl=feat_pl, **prep[name + '_1'])
        h1_pl = conv3x3_pl(feat_pl, mask_mid=mask1, wp=wp1, apply_prelu=True,
                           **prep['up1'])
        h1 = pixel_shuffle2(from_pl(h1_pl, h4, w4))          # (n, 2h4, 2w4, c)
        H2, W2 = 2 * h4, 2 * w4
        mask2 = pl_mask_mid(H2, W2)
        h2_pl = conv3x3_pl(to_pl(h1), mask_mid=mask2, wp=W2 + 2, apply_prelu=False,
                           **prep['up2'])
        h2 = pixel_shuffle2(from_pl(h2_pl, H2, W2))          # (n, 4h4, 4w4, 5)
    else:
        # TODO(synk): halo-tiled pipeline for feature maps too large for one VMEM block;
        # until then fall back to the im2col + matmul path.
        for name in ('cb0', 'cb1', 'cb2', 'cb3'):
            t = conv2d_im2col(feat, stride=1, padding=1, apply_prelu=True,
                              **prep[name + '_0'])
            t = conv2d_im2col(t, stride=1, padding=1, apply_prelu=True,
                              **prep[name + '_1'])
            feat = (t.astype(jnp.float32) + feat.astype(jnp.float32)).astype(jnp.bfloat16)
        h1 = pixel_shuffle2(conv2d_im2col(feat, stride=1, padding=1,
                                          apply_prelu=True, **prep['up1']))
        h2 = pixel_shuffle2(conv2d_im2col(h1, stride=1, padding=1,
                                          apply_prelu=False, **prep['up2']))

    h2 = h2.astype(jnp.float32)
    fl = h2[..., 0:4]
    mk = h2[..., 4:5]
    fl = bilinear_resize(fl, float(scale)) * float(scale)
    mk = bilinear_resize(mk, float(scale))
    return jnp.transpose(fl, (0, 3, 1, 2)), jnp.transpose(mk, (0, 3, 1, 2))


if __name__ == "__main__":
    key = jax.random.PRNGKey(0)
    kx, kf, kp = jax.random.split(key, 3)

    # x: two 2-channel "images" concatenated (4 ch), flow: 4 ch -> in_planes = 8
    x = jax.random.normal(kx, (2, 4, 16, 16), jnp.float32)
    flow = jax.random.normal(kf, (2, 4, 16, 16), jnp.float32)

    raw_params = init_ifblock_params(kp, in_planes=8, c=32)
    prep = prepare_params(raw_params, c=32)

    fwd = jax.jit(ifblock_forward, static_argnames=("scale",))
    out_flow, out_mask = fwd(prep, x, flow, scale=1)
    jax.block_until_ready((out_flow, out_mask))

    assert out_flow.shape == (2, 4, 16, 16), out_flow.shape
    assert out_mask.shape == (2, 1, 16, 16), out_mask.shape
    print("KERNEL_OK")
</pallas_src>

<mosaic_0001>
module attributes {stable_mosaic.version = 11 : i64} {
  func.func @_mm_bias_act_kernel(%arg0: i32, %arg1: memref<128x72xbf16, #tpu.memory_space<vmem>>, %arg2: memref<72x16xbf16, #tpu.memory_space<vmem>>, %arg3: memref<1x16xf32, #tpu.memory_space<vmem>>, %arg4: memref<1x16xf32, #tpu.memory_space<vmem>>, %arg5: memref<128x16xbf16, #tpu.memory_space<vmem>>) attributes {dimension_semantics = [#tpu.dimension_semantics<parallel>], iteration_bounds = array<i64: 1>, scalar_prefetch = 0 : i64, scratch_operands = 0 : i64, tpu.core_type = #tpu.core_type<tc>, window_params = [{transform_indices = @transform_0, window_bounds = array<i64: 128, 72>}, {pipeline_mode = #tpu.pipeline_mode<synchronous>, transform_indices = @transform_1, window_bounds = array<i64: 72, 16>}, {pipeline_mode = #tpu.pipeline_mode<synchronous>, transform_indices = @transform_2, window_bounds = array<i64: 1, 16>}, {pipeline_mode = #tpu.pipeline_mode<synchronous>, transform_indices = @transform_3, window_bounds = array<i64: 1, 16>}, {transform_indices = @transform_4, window_bounds = array<i64: 128, 16>}]} {
    %c0 = arith.constant 0 : index
    %c0_0 = arith.constant 0 : index
    %0 = vector.load %arg1[%c0, %c0_0] : memref<128x72xbf16, #tpu.memory_space<vmem>>, vector<128x72xbf16>
    %c0_1 = arith.constant 0 : index
    %c0_2 = arith.constant 0 : index
    %1 = vector.load %arg2[%c0_1, %c0_2] : memref<72x16xbf16, #tpu.memory_space<vmem>>, vector<72x16xbf16>
    %cst = arith.constant dense<0.000000e+00> : vector<128x16xf32>
    %2 = tpu.matmul %0, %1, %cst {dimension_numbers = #tpu.dot_dimension_numbers<[1], [0], [0], [1], [0, 0, 1, 1], [], []>} : vector<128x72xbf16>, vector<72x16xbf16>, vector<128x16xf32> -> vector<128x16xf32>
    %c0_3 = arith.constant 0 : index
    %c0_4 = arith.constant 0 : index
    %3 = vector.load %arg3[%c0_3, %c0_4] : memref<1x16xf32, #tpu.memory_space<vmem>>, vector<1x16xf32>
    %4 = vector.broadcast %3 : vector<1x16xf32> to vector<128x16xf32>
    %5 = arith.addf %2, %4 : vector<128x16xf32>
    %cst_5 = arith.constant 0.000000e+00 : f32
    %6 = vector.broadcast %cst_5 : f32 to vector<128x16xf32>
    %7 = arith.cmpf oge, %5, %6 : vector<128x16xf32>
    %c0_6 = arith.constant 0 : index
    %c0_7 = arith.constant 0 : index
    %8 = vector.load %arg4[%c0_6, %c0_7] : memref<1x16xf32, #tpu.memory_space<vmem>>, vector<1x16xf32>
    %9 = vector.broadcast %8 : vector<1x16xf32> to vector<128x16xf32>
    %10 = arith.mulf %5, %9 : vector<128x16xf32>
    %11 = arith.select %7, %5, %10 : vector<128x16xi1>, vector<128x16xf32>
    %12 = arith.truncf %11 : vector<128x16xf32> to vector<128x16xbf16>
    %c0_8 = arith.constant 0 : index
    %c0_9 = arith.constant 0 : index
    %13 = vector.load %arg5[%c0_8, %c0_9] : memref<128x16xbf16, #tpu.memory_space<vmem>>, vector<128x16xbf16>
    tpu.vector_store %arg5[%c0_8, %c0_9], %12 {strides = array<i32>} : memref<128x16xbf16, #tpu.memory_space<vmem>>, vector<128x16xbf16>,
    return
  }
  func.func @transform_0(%arg0: i32) -> (i32, i32) {
    %c0_i32 = arith.constant 0 : i32
    %c0_i32_0 = arith.constant 0 : i32
    return %arg0, %c0_i32 : i32, i32
  }
  func.func @transform_1(%arg0: i32) -> (i32, i32) {
    %c0_i32 = arith.constant 0 : i32
    %c0_i32_0 = arith.constant 0 : i32
    %c0_i32_1 = arith.constant 0 : i32
    return %c0_i32, %c0_i32_0 : i32, i32
  }
  func.func @transform_2(%arg0: i32) -> (i32, i32) {
    %c0_i32 = arith.constant 0 : i32
    %c0_i32_0 = arith.constant 0 : i32
    %c0_i32_1 = arith.constant 0 : i32
    return %c0_i32, %c0_i32_0 : i32, i32
  }
  func.func @transform_3(%arg0: i32) -> (i32, i32) {
    %c0_i32 = arith.constant 0 : i32
    %c0_i32_0 = arith.constant 0 : i32
    %c0_i32_1 = arith.constant 0 : i32
    return %c0_i32, %c0_i32_0 : i32, i32
  }
  func.func @transform_4(%arg0: i32) -> (i32, i32) {
    %c0_i32 = arith.constant 0 : i32
    %c0_i32_0 = arith.constant 0 : i32
    return %arg0, %c0_i32 : i32, i32
  }
}

module attributes {stable_mosaic.version = 11 : i64} {
  func.func @_mm_bias_act_kernel(%arg0: i32, %arg1: memref<32x144xbf16, #tpu.memory_space<vmem>>, %arg2: memref<144x32xbf16, #tpu.memory_space<vmem>>, %arg3: memref<1x32xf32, #tpu.memory_space<vmem>>, %arg4: memref<1x32xf32, #tpu.memory_space<vmem>>, %arg5: memref<32x32xbf16, #tpu.memory_space<vmem>>) attributes {dimension_semantics = [#tpu.dimension_semantics<parallel>], iteration_bounds = array<i64: 1>, scalar_prefetch = 0 : i64, scratch_operands = 0 : i64, tpu.core_type = #tpu.core_type<tc>, window_params = [{transform_indices = @transform_0, window_bounds = array<i64: 32, 144>}, {pipeline_mode = #tpu.pipeline_mode<synchronous>, transform_indices = @transform_1, window_bounds = array<i64: 144, 32>}, {pipeline_mode = #tpu.pipeline_mode<synchronous>, transform_indices = @transform_2, window_bounds = array<i64: 1, 32>}, {pipeline_mode = #tpu.pipeline_mode<synchronous>, transform_indices = @transform_3, window_bounds = array<i64: 1, 32>}, {transform_indices = @transform_4, window_bounds = array<i64: 32, 32>}]} {
    %c0 = arith.constant 0 : index
    %c0_0 = arith.constant 0 : index
    %0 = vector.load %arg1[%c0, %c0_0] : memref<32x144xbf16, #tpu.memory_space<vmem>>, vector<32x144xbf16>
    %c0_1 = arith.constant 0 : index
    %c0_2 = arith.constant 0 : index
    %1 = vector.load %arg2[%c0_1, %c0_2] : memref<144x32xbf16, #tpu.memory_space<vmem>>, vector<144x32xbf16>
    %cst = arith.constant dense<0.000000e+00> : vector<32x32xf32>
    %2 = tpu.matmul %0, %1, %cst {dimension_numbers = #tpu.dot_dimension_numbers<[1], [0], [0], [1], [0, 0, 1, 1], [], []>} : vector<32x144xbf16>, vector<144x32xbf16>, vector<32x32xf32> -> vector<32x32xf32>
    %c0_3 = arith.constant 0 : index
    %c0_4 = arith.constant 0 : index
    %3 = vector.load %arg3[%c0_3, %c0_4] : memref<1x32xf32, #tpu.memory_space<vmem>>, vector<1x32xf32>
    %4 = vector.broadcast %3 : vector<1x32xf32> to vector<32x32xf32>
    %5 = arith.addf %2, %4 : vector<32x32xf32>
    %cst_5 = arith.constant 0.000000e+00 : f32
    %6 = vector.broadcast %cst_5 : f32 to vector<32x32xf32>
    %7 = arith.cmpf oge, %5, %6 : vector<32x32xf32>
    %c0_6 = arith.constant 0 : index
    %c0_7 = arith.constant 0 : index
    %8 = vector.load %arg4[%c0_6, %c0_7] : memref<1x32xf32, #tpu.memory_space<vmem>>, vector<1x32xf32>
    %9 = vector.broadcast %8 : vector<1x32xf32> to vector<32x32xf32>
    %10 = arith.mulf %5, %9 : vector<32x32xf32>
    %11 = arith.select %7, %5, %10 : vector<32x32xi1>, vector<32x32xf32>
    %12 = arith.truncf %11 : vector<32x32xf32> to vector<32x32xbf16>
    %c0_8 = arith.constant 0 : index
    %c0_9 = arith.constant 0 : index
    %13 = vector.load %arg5[%c0_8, %c0_9] : memref<32x32xbf16, #tpu.memory_space<vmem>>, vector<32x32xbf16>
    tpu.vector_store %arg5[%c0_8, %c0_9], %12 {strides = array<i32>} : memref<32x32xbf16, #tpu.memory_space<vmem>>, vector<32x32xbf16>,
    return
  }
  func.func @transform_0(%arg0: i32) -> (i32, i32) {
    %c0_i32 = arith.constant 0 : i32
    %c0_i32_0 = arith.constant 0 : i32
    return %arg0, %c0_i32 : i32, i32
  }
  func.func @transform_1(%arg0: i32) -> (i32, i32) {
    %c0_i32 = arith.constant 0 : i32
    %c0_i32_0 = arith.constant 0 : i32
    %c0_i32_1 = arith.constant 0 : i32
    return %c0_i32, %c0_i32_0 : i32, i32
  }
  func.func @transform_2(%arg0: i32) -> (i32, i32) {
    %c0_i32 = arith.constant 0 : i32
    %c0_i32_0 = arith.constant 0 : i32
    %c0_i32_1 = arith.constant 0 : i32
    return %c0_i32, %c0_i32_0 : i32, i32
  }
  func.func @transform_3(%arg0: i32) -> (i32, i32) {
    %c0_i32 = arith.constant 0 : i32
    %c0_i32_0 = arith.constant 0 : i32
    %c0_i32_1 = arith.constant 0 : i32
    return %c0_i32, %c0_i32_0 : i32, i32
  }
  func.func @transform_4(%arg0: i32) -> (i32, i32) {
    %c0_i32 = arith.constant 0 : i32
    %c0_i32_0 = arith.constant 0 : i32
    return %arg0, %c0_i32 : i32, i32
  }
}

module attributes {stable_mosaic.version = 11 : i64} {
  func.func @_conv3x3_pl_kernel(%arg0: i32, %arg1: memref<1x48x32xbf16, #tpu.memory_space<vmem>>, %arg2: memref<9x32x32xbf16, #tpu.memory_space<vmem>>, %arg3: memref<1x32xf32, #tpu.memory_space<vmem>>, %arg4: memref<1x32xf32, #tpu.memory_space<vmem>>, %arg5: memref<34x1xf32, #tpu.memory_space<vmem>>, %arg6: memref<1x48x32xbf16, #tpu.memory_space<vmem>>) attributes {dimension_semantics = [#tpu.dimension_semantics<parallel>], iteration_bounds = array<i64: 2>, scalar_prefetch = 0 : i64, scratch_operands = 0 : i64, tpu.core_type = #tpu.core_type<tc>, window_params = [{transform_indices = @transform_0, window_bounds = array<i64: 1, 48, 32>}, {pipeline_mode = #tpu.pipeline_mode<synchronous>, transform_indices = @transform_1, window_bounds = array<i64: 9, 32, 32>}, {pipeline_mode = #tpu.pipeline_mode<synchronous>, transform_indices = @transform_2, window_bounds = array<i64: 1, 32>}, {pipeline_mode = #tpu.pipeline_mode<synchronous>, transform_indices = @transform_3, window_bounds = array<i64: 1, 32>}, {pipeline_mode = #tpu.pipeline_mode<synchronous>, transform_indices = @transform_4, window_bounds = array<i64: 34, 1>}, {transform_indices = @transform_5, window_bounds = array<i64: 1, 48, 32>}]} {
    %cst = arith.constant 0.000000e+00 : f32
    %0 = vector.broadcast %cst : f32 to vector<34x32xf32>
    %c0 = arith.constant 0 : index
    %c0_0 = arith.constant 0 : index
    %c0_1 = arith.constant 0 : index
    %1 = vector.load %arg1[%c0, %c0_0, %c0_1] : memref<1x48x32xbf16, #tpu.memory_space<vmem>>, vector<1x34x32xbf16>
    %2 = vector.shape_cast %1 : vector<1x34x32xbf16> to vector<34x32xbf16>
    %c0_2 = arith.constant 0 : index
    %c0_3 = arith.constant 0 : index
    %c0_4 = arith.constant 0 : index
    %3 = vector.load %arg2[%c0_2, %c0_3, %c0_4] : memref<9x32x32xbf16, #tpu.memory_space<vmem>>, vector<1x32x32xbf16>
    %4 = vector.shape_cast %3 : vector<1x32x32xbf16> to vector<32x32xbf16>
    %cst_5 = arith.constant dense<0.000000e+00> : vector<34x32xf32>
    %5 = tpu.matmul %2, %4, %cst_5 {dimension_numbers = #tpu.dot_dimension_numbers<[1], [0], [0], [1], [0, 0, 1, 1], [], []>} : vector<34x32xbf16>, vector<32x32xbf16>, vector<34x32xf32> -> vector<34x32xf32>
    %6 = arith.addf %0, %5 : vector<34x32xf32>
    %c0_6 = arith.constant 0 : index
    %c1 = arith.constant 1 : index
    %c0_7 = arith.constant 0 : index
    %7 = vector.load %arg1[%c0_6, %c1, %c0_7] : memref<1x48x32xbf16, #tpu.memory_space<vmem>>, vector<1x34x32xbf16>
    %8 = vector.shape_cast %7 : vector<1x34x32xbf16> to vector<34x32xbf16>
    %c1_8 = arith.constant 1 : index
    %c0_9 = arith.constant 0 : index
    %c0_10 = arith.constant 0 : index
    %9 = vector.load %arg2[%c1_8, %c0_9, %c0_10] : memref<9x32x32xbf16, #tpu.memory_space<vmem>>, vector<1x32x32xbf16>
    %10 = vector.shape_cast %9 : vector<1x32x32xbf16> to vector<32x32xbf16>
    %cst_11 = arith.constant dense<0.000000e+00> : vector<34x32xf32>
    %11 = tpu.matmul %8, %10, %cst_11 {dimension_numbers = #tpu.dot_dimension_numbers<[1], [0], [0], [1], [0, 0, 1, 1], [], []>} : vector<34x32xbf16>, vector<32x32xbf16>, vector<34x32xf32> -> vector<34x32xf32>
    %12 = arith.addf %6, %11 : vector<34x32xf32>
    %c0_12 = arith.constant 0 : index
    %c2 = arith.constant 2 : index
    %c0_13 = arith.constant 0 : index
    %13 = vector.load %arg1[%c0_12, %c2, %c0_13] : memref<1x48x32xbf16, #tpu.memory_space<vmem>>, vector<1x34x32xbf16>
    %14 = vector.shape_cast %13 : vector<1x34x32xbf16> to vector<34x32xbf16>
    %c2_14 = arith.constant 2 : index
    %c0_15 = arith.constant 0 : index
    %c0_16 = arith.constant 0 : index
    %15 = vector.load %arg2[%c2_14, %c0_15, %c0_16] : memref<9x32x32xbf16, #tpu.memory_space<vmem>>, vector<1x32x32xbf16>
    %16 = vector.shape_cast %15 : vector<1x32x32xbf16> to vector<32x32xbf16>
    %cst_17 = arith.constant dense<0.000000e+00> : vector<34x32xf32>
    %17 = tpu.matmul %14, %16, %cst_17 {dimension_numbers = #tpu.dot_dimension_numbers<[1], [0], [0], [1], [0, 0, 1, 1], [], []>} : vector<34x32xbf16>, vector<32x32xbf16>, vector<34x32xf32> -> vector<34x32xf32>
    %18 = arith.addf %12, %17 : vector<34x32xf32>
    %c0_18 = arith.constant 0 : index
    %c6 = arith.constant 6 : index
    %c0_19 = arith.constant 0 : index
    %19 = vector.load %arg1[%c0_18, %c6, %c0_19] : memref<1x48x32xbf16, #tpu.memory_space<vmem>>, vector<1x34x32xbf16>
    %20 = vector.shape_cast %19 : vector<1x34x32xbf16> to vector<34x32xbf16>
    %c3 = arith.constant 3 : index
    %c0_20 = arith.constant 0 : index
    %c0_21 = arith.constant 0 : index
    %21 = vector.load %arg2[%c3, %c0_20, %c0_21] : memref<9x32x32xbf16, #tpu.memory_space<vmem>>, vector<1x32x32xbf16>
    %22 = vector.shape_cast %21 : vector<1x32x32xbf16> to vector<32x32xbf16>
    %cst_22 = arith.constant dense<0.000000e+00> : vector<34x32xf32>
    %23 = tpu.matmul %20, %22, %cst_22 {dimension_numbers = #tpu.dot_dimension_numbers<[1], [0], [0], [1], [0, 0, 1, 1], [], []>} : vector<34x32xbf16>, vector<32x32xbf16>, vector<34x32xf32> -> vector<34x32xf32>
    %24 = arith.addf %18, %23 : vector<34x32xf32>
    %c0_23 = arith.constant 0 : index
    %c7 = arith.constant 7 : index
    %c0_24 = arith.constant 0 : index
    %25 = vector.load %arg1[%c0_23, %c7, %c0_24] : memref<1x48x32xbf16, #tpu.memory_space<vmem>>, vector<1x34x32xbf16>
    %26 = vector.shape_cast %25 : vector<1x34x32xbf16> to vector<34x32xbf16>
    %c4 = arith.constant 4 : index
    %c0_25 = arith.constant 0 : index
    %c0_26 = arith.constant 0 : index
    %27 = vector.load %arg2[%c4, %c0_25, %c0_26] : memref<9x32x32xbf16, #tpu.memory_space<vmem>>, vector<1x32x32xbf16>
    %28 = vector.shape_cast %27 : vector<1x32x32xbf16> to vector<32x32xbf16>
    %cst_27 = arith.constant dense<0.000000e+00> : vector<34x32xf32>
    %29 = tpu.matmul %26, %28, %cst_27 {dimension_numbers = #tpu.dot_dimension_numbers<[1], [0], [0], [1], [0, 0, 1, 1], [], []>} : vector<34x32xbf16>, vector<32x32xbf16>, vector<34x32xf32> -> vector<34x32xf32>
    %30 = arith.addf %24, %29 : vector<34x32xf32>
    %c0_28 = arith.constant 0 : index
    %c8 = arith.constant 8 : index
    %c0_29 = arith.constant 0 : index
    %31 = vector.load %arg1[%c0_28, %c8, %c0_29] : memref<1x48x32xbf16, #tpu.memory_space<vmem>>, vector<1x34x32xbf16>
    %32 = vector.shape_cast %31 : vector<1x34x32xbf16> to vector<34x32xbf16>
    %c5 = arith.constant 5 : index
    %c0_30 = arith.constant 0 : index
    %c0_31 = arith.constant 0 : index
    %33 = vector.load %arg2[%c5, %c0_30, %c0_31] : memref<9x32x32xbf16, #tpu.memory_space<vmem>>, vector<1x32x32xbf16>
    %34 = vector.shape_cast %33 : vector<1x32x32xbf16> to vector<32x32xbf16>
    %cst_32 = arith.constant dense<0.000000e+00> : vector<34x32xf32>
    %35 = tpu.matmul %32, %34, %cst_32 {dimension_numbers = #tpu.dot_dimension_numbers<[1], [0], [0], [1], [0, 0, 1, 1], [], []>} : vector<34x32xbf16>, vector<32x32xbf16>, vector<34x32xf32> -> vector<34x32xf32>
    %36 = arith.addf %30, %35 : vector<34x32xf32>
    %c0_33 = arith.constant 0 : index
    %c12 = arith.constant 12 : index
    %c0_34 = arith.constant 0 : index
    %37 = vector.load %arg1[%c0_33, %c12, %c0_34] : memref<1x48x32xbf16, #tpu.memory_space<vmem>>, vector<1x34x32xbf16>
    %38 = vector.shape_cast %37 : vector<1x34x32xbf16> to vector<34x32xbf16>
    %c6_35 = arith.constant 6 : index
    %c0_36 = arith.constant 0 : index
    %c0_37 = arith.constant 0 : index
    %39 = vector.load %arg2[%c6_35, %c0_36, %c0_37] : memref<9x32x32xbf16, #tpu.memory_space<vmem>>, vector<1x32x32xbf16>
    %40 = vector.shape_cast %39 : vector<1x32x32xbf16> to vector<32x32xbf16>
    %cst_38 = arith.constant dense<0.000000e+00> : vector<34x32xf32>
    %41 = tpu.matmul %38, %40, %cst_38 {dimension_numbers = #tpu.dot_dimension_numbers<[1], [0], [0], [1], [0, 0, 1, 1], [], []>} : vector<34x32xbf16>, vector<32x32xbf16>, vector<34x32xf32> -> vector<34x32xf32>
    %42 = arith.addf %36, %41 : vector<34x32xf32>
    %c0_39 = arith.constant 0 : index
    %c13 = arith.constant 13 : index
    %c0_40 = arith.constant 0 : index
    %43 = vector.load %arg1[%c0_39, %c13, %c0_40] : memref<1x48x32xbf16, #tpu.memory_space<vmem>>, vector<1x34x32xbf16>
    %44 = vector.shape_cast %43 : vector<1x34x32xbf16> to vector<34x32xbf16>
    %c7_41 = arith.constant 7 : index
    %c0_42 = arith.constant 0 : index
    %c0_43 = arith.constant 0 : index
    %45 = vector.load %arg2[%c7_41, %c0_42, %c0_43] : memref<9x32x32xbf16, #tpu.memory_space<vmem>>, vector<1x32x32xbf16>
    %46 = vector.shape_cast %45 : vector<1x32x32xbf16> to vector<32x32xbf16>
    %cst_44 = arith.constant dense<0.000000e+00> : vector<34x32xf32>
    %47 = tpu.matmul %44, %46, %cst_44 {dimension_numbers = #tpu.dot_dimension_numbers<[1], [0], [0], [1], [0, 0, 1, 1], [], []>} : vector<34x32xbf16>, vector<32x32xbf16>, vector<34x32xf32> -> vector<34x32xf32>
    %48 = arith.addf %42, %47 : vector<34x32xf32>
    %c0_45 = arith.constant 0 : index
    %c14 = arith.constant 14 : index
    %c0_46 = arith.constant 0 : index
    %49 = vector.load %arg1[%c0_45, %c14, %c0_46] : memref<1x48x32xbf16, #tpu.memory_space<vmem>>, vector<1x34x32xbf16>
    %50 = vector.shape_cast %49 : vector<1x34x32xbf16> to vector<34x32xbf16>
    %c8_47 = arith.constant 8 : index
    %c0_48 = arith.constant 0 : index
    %c0_49 = arith.constant 0 : index
    %51 = vector.load %arg2[%c8_47, %c0_48, %c0_49] : memref<9x32x32xbf16, #tpu.memory_space<vmem>>, vector<1x32x32xbf16>
    %52 = vector.shape_cast %51 : vector<1x32x32xbf16> to vector<32x32xbf16>
    %cst_50 = arith.constant dense<0.000000e+00> : vector<34x32xf32>
    %53 = tpu.matmul %50, %52, %cst_50 {dimension_numbers = #tpu.dot_dimension_numbers<[1], [0], [0], [1], [0, 0, 1, 1], [], []>} : vector<34x32xbf16>, vector<32x32xbf16>, vector<34x32xf32> -> vector<34x32xf32>
    %54 = arith.addf %48, %53 : vector<34x32xf32>
    %c0_51 = arith.constant 0 : index
    %c0_52 = arith.constant 0 : index
    %55 = vector.load %arg3[%c0_51, %c0_52] : memref<1x32xf32, #tpu.memory_space<vmem>>, vector<1x32xf32>
    %56 = vector.broadcast %55 : vector<1x32xf32> to vector<34x32xf32>
    %57 = arith.addf %54, %56 : vector<34x32xf32>
    %cst_53 = arith.constant 0.000000e+00 : f32
    %58 = vector.broadcast %cst_53 : f32 to vector<34x32xf32>
    %59 = arith.cmpf oge, %57, %58 : vector<34x32xf32>
    %c0_54 = arith.constant 0 : index
    %c0_55 = arith.constant 0 : index
    %60 = vector.load %arg4[%c0_54, %c0_55] : memref<1x32xf32, #tpu.memory_space<vmem>>, vector<1x32xf32>
    %61 = vector.broadcast %60 : vector<1x32xf32> to vector<34x32xf32>
    %62 = arith.mulf %57, %61 : vector<34x32xf32>
    %63 = arith.select %59, %57, %62 : vector<34x32xi1>, vector<34x32xf32>
    %c0_56 = arith.constant 0 : index
    %c0_57 = arith.constant 0 : index
    %64 = vector.load %arg5[%c0_56, %c0_57] : memref<34x1xf32, #tpu.memory_space<vmem>>, vector<34x1xf32>
    %65 = vector.broadcast %64 : vector<34x1xf32> to vector<34x32xf32>
    %66 = arith.mulf %63, %65 : vector<34x32xf32>
    %cst_58 = arith.constant 0.000000e+00 : bf16
    %67 = vector.broadcast %cst_58 : bf16 to vector<1x48x32xbf16>
    %c0_59 = arith.constant 0 : index
    %c0_60 = arith.constant 0 : index
    %c0_61 = arith.constant 0 : index
    %68 = vector.load %arg6[%c0_59, %c0_60, %c0_61] : memref<1x48x32xbf16, #tpu.memory_space<vmem>>, vector<1x48x32xbf16>
    tpu.vector_store %arg6[%c0_59, %c0_60, %c0_61], %67 {strides = array<i32>} : memref<1x48x32xbf16, #tpu.memory_space<vmem>>, vector<1x48x32xbf16>,
    %69 = arith.truncf %66 : vector<34x32xf32> to vector<34x32xbf16>
    %c0_62 = arith.constant 0 : index
    %c7_63 = arith.constant 7 : index
    %c0_64 = arith.constant 0 : index
    %70 = vector.load %arg6[%c0_62, %c7_63, %c0_64] : memref<1x48x32xbf16, #tpu.memory_space<vmem>>, vector<1x34x32xbf16>
    %71 = vector.shape_cast %70 : vector<1x34x32xbf16> to vector<34x32xbf16>
    %72 = vector.shape_cast %69 : vector<34x32xbf16> to vector<1x34x32xbf16>
    tpu.vector_store %arg6[%c0_62, %c7_63, %c0_64], %72 {strides = array<i32>} : memref<1x48x32xbf16, #tpu.memory_space<vmem>>, vector<1x34x32xbf16>,
    return
  }
  func.func @transform_0(%arg0: i32) -> (i32, i32, i32) {
    %c0_i32 = arith.constant 0 : i32
    %c0_i32_0 = arith.constant 0 : i32
    %c0_i32_1 = arith.constant 0 : i32
    return %arg0, %c0_i32, %c0_i32_0 : i32, i32, i32
  }
  func.func @transform_1(%arg0: i32) -> (i32, i32, i32) {
    %c0_i32 = arith.constant 0 : i32
    %c0_i32_0 = arith.constant 0 : i32
    %c0_i32_1 = arith.constant 0 : i32
    %c0_i32_2 = arith.constant 0 : i32
    return %c0_i32, %c0_i32_0, %c0_i32_1 : i32, i32, i32
  }
  func.func @transform_2(%arg0: i32) -> (i32, i32) {
    %c0_i32 = arith.constant 0 : i32
    %c0_i32_0 = arith.constant 0 : i32
    %c0_i32_1 = arith.constant 0 : i32
    return %c0_i32, %c0_i32_0 : i32, i32
  }
  func.func @transform_3(%arg0: i32) -> (i32, i32) {
    %c0_i32 = arith.constant 0 : i32
    %c0_i32_0 = arith.constant 0 : i32
    %c0_i32_1 = arith.constant 0 : i32
    return %c0_i32, %c0_i32_0 : i32, i32
  }
  func.func @transform_4(%arg0: i32) -> (i32, i32) {
    %c0_i32 = arith.constant 0 : i32
    %c0_i32_0 = arith.constant 0 : i32
    %c0_i32_1 = arith.constant 0 : i32
    return %c0_i32, %c0_i32_0 : i32, i32
  }
  func.func @transform_5(%arg0: i32) -> (i32, i32, i32) {
    %c0_i32 = arith.constant 0 : i32
    %c0_i32_0 = arith.constant 0 : i32
    %c0_i32_1 = arith.constant 0 : i32
    return %arg0, %c0_i32, %c0_i32_0 : i32, i32, i32
  }
}

module attributes {stable_mosaic.version = 11 : i64} {
  func.func @_conv3x3_pl_kernel(%arg0: i32, %arg1: memref<1x48x32xbf16, #tpu.memory_space<vmem>>, %arg2: memref<9x32x128xbf16, #tpu.memory_space<vmem>>, %arg3: memref<1x128xf32, #tpu.memory_space<vmem>>, %arg4: memref<1x128xf32, #tpu.memory_space<vmem>>, %arg5: memref<34x1xf32, #tpu.memory_space<vmem>>, %arg6: memref<1x48x128xbf16, #tpu.memory_space<vmem>>) attributes {dimension_semantics = [#tpu.dimension_semantics<parallel>], iteration_bounds = array<i64: 2>, scalar_prefetch = 0 : i64, scratch_operands = 0 : i64, tpu.core_type = #tpu.core_type<tc>, window_params = [{transform_indices = @transform_0, window_bounds = array<i64: 1, 48, 32>}, {pipeline_mode = #tpu.pipeline_mode<synchronous>, transform_indices = @transform_1, window_bounds = array<i64: 9, 32, 128>}, {pipeline_mode = #tpu.pipeline_mode<synchronous>, transform_indices = @transform_2, window_bounds = array<i64: 1, 128>}, {pipeline_mode = #tpu.pipeline_mode<synchronous>, transform_indices = @transform_3, window_bounds = array<i64: 1, 128>}, {pipeline_mode = #tpu.pipeline_mode<synchronous>, transform_indices = @transform_4, window_bounds = array<i64: 34, 1>}, {transform_indices = @transform_5, window_bounds = array<i64: 1, 48, 128>}]} {
    %cst = arith.constant 0.000000e+00 : f32
    %0 = vector.broadcast %cst : f32 to vector<34x128xf32>
    %c0 = arith.constant 0 : index
    %c0_0 = arith.constant 0 : index
    %c0_1 = arith.constant 0 : index
    %1 = vector.load %arg1[%c0, %c0_0, %c0_1] : memref<1x48x32xbf16, #tpu.memory_space<vmem>>, vector<1x34x32xbf16>
    %2 = vector.shape_cast %1 : vector<1x34x32xbf16> to vector<34x32xbf16>
    %c0_2 = arith.constant 0 : index
    %c0_3 = arith.constant 0 : index
    %c0_4 = arith.constant 0 : index
    %3 = vector.load %arg2[%c0_2, %c0_3, %c0_4] : memref<9x32x128xbf16, #tpu.memory_space<vmem>>, vector<1x32x128xbf16>
    %4 = vector.shape_cast %3 : vector<1x32x128xbf16> to vector<32x128xbf16>
    %cst_5 = arith.constant dense<0.000000e+00> : vector<34x128xf32>
    %5 = tpu.matmul %2, %4, %cst_5 {dimension_numbers = #tpu.dot_dimension_numbers<[1], [0], [0], [1], [0, 0, 1, 1], [], []>} : vector<34x32xbf16>, vector<32x128xbf16>, vector<34x128xf32> -> vector<34x128xf32>
    %6 = arith.addf %0, %5 : vector<34x128xf32>
    %c0_6 = arith.constant 0 : index
    %c1 = arith.constant 1 : index
    %c0_7 = arith.constant 0 : index
    %7 = vector.load %arg1[%c0_6, %c1, %c0_7] : memref<1x48x32xbf16, #tpu.memory_space<vmem>>, vector<1x34x32xbf16>
    %8 = vector.shape_cast %7 : vector<1x34x32xbf16> to vector<34x32xbf16>
    %c1_8 = arith.constant 1 : index
    %c0_9 = arith.constant 0 : index
    %c0_10 = arith.constant 0 : index
    %9 = vector.load %arg2[%c1_8, %c0_9, %c0_10] : memref<9x32x128xbf16, #tpu.memory_space<vmem>>, vector<1x32x128xbf16>
    %10 = vector.shape_cast %9 : vector<1x32x128xbf16> to vector<32x128xbf16>
    %cst_11 = arith.constant dense<0.000000e+00> : vector<34x128xf32>
    %11 = tpu.matmul %8, %10, %cst_11 {dimension_numbers = #tpu.dot_dimension_numbers<[1], [0], [0], [1], [0, 0, 1, 1], [], []>} : vector<34x32xbf16>, vector<32x128xbf16>, vector<34x128xf32> -> vector<34x128xf32>
    %12 = arith.addf %6, %11 : vector<34x128xf32>
    %c0_12 = arith.constant 0 : index
    %c2 = arith.constant 2 : index
    %c0_13 = arith.constant 0 : index
    %13 = vector.load %arg1[%c0_12, %c2, %c0_13] : memref<1x48x32xbf16, #tpu.memory_space<vmem>>, vector<1x34x32xbf16>
    %14 = vector.shape_cast %13 : vector<1x34x32xbf16> to vector<34x32xbf16>
    %c2_14 = arith.constant 2 : index
    %c0_15 = arith.constant 0 : index
    %c0_16 = arith.constant 0 : index
    %15 = vector.load %arg2[%c2_14, %c0_15, %c0_16] : memref<9x32x128xbf16, #tpu.memory_space<vmem>>, vector<1x32x128xbf16>
    %16 = vector.shape_cast %15 : vector<1x32x128xbf16> to vector<32x128xbf16>
    %cst_17 = arith.constant dense<0.000000e+00> : vector<34x128xf32>
    %17 = tpu.matmul %14, %16, %cst_17 {dimension_numbers = #tpu.dot_dimension_numbers<[1], [0], [0], [1], [0, 0, 1, 1], [], []>} : vector<34x32xbf16>, vector<32x128xbf16>, vector<34x128xf32> -> vector<34x128xf32>
    %18 = arith.addf %12, %17 : vector<34x128xf32>
    %c0_18 = arith.constant 0 : index
    %c6 = arith.constant 6 : index
    %c0_19 = arith.constant 0 : index
    %19 = vector.load %arg1[%c0_18, %c6, %c0_19] : memref<1x48x32xbf16, #tpu.memory_space<vmem>>, vector<1x34x32xbf16>
    %20 = vector.shape_cast %19 : vector<1x34x32xbf16> to vector<34x32xbf16>
    %c3 = arith.constant 3 : index
    %c0_20 = arith.constant 0 : index
    %c0_21 = arith.constant 0 : index
    %21 = vector.load %arg2[%c3, %c0_20, %c0_21] : memref<9x32x128xbf16, #tpu.memory_space<vmem>>, vector<1x32x128xbf16>
    %22 = vector.shape_cast %21 : vector<1x32x128xbf16> to vector<32x128xbf16>
    %cst_22 = arith.constant dense<0.000000e+00> : vector<34x128xf32>
    %23 = tpu.matmul %20, %22, %cst_22 {dimension_numbers = #tpu.dot_dimension_numbers<[1], [0], [0], [1], [0, 0, 1, 1], [], []>} : vector<34x32xbf16>, vector<32x128xbf16>, vector<34x128xf32> -> vector<34x128xf32>
    %24 = arith.addf %18, %23 : vector<34x128xf32>
    %c0_23 = arith.constant 0 : index
    %c7 = arith.constant 7 : index
    %c0_24 = arith.constant 0 : index
    %25 = vector.load %arg1[%c0_23, %c7, %c0_24] : memref<1x48x32xbf16, #tpu.memory_space<vmem>>, vector<1x34x32xbf16>
    %26 = vector.shape_cast %25 : vector<1x34x32xbf16> to vector<34x32xbf16>
    %c4 = arith.constant 4 : index
    %c0_25 = arith.constant 0 : index
    %c0_26 = arith.constant 0 : index
    %27 = vector.load %arg2[%c4, %c0_25, %c0_26] : memref<9x32x128xbf16, #tpu.memory_space<vmem>>, vector<1x32x128xbf16>
    %28 = vector.shape_cast %27 : vector<1x32x128xbf16> to vector<32x128xbf16>
    %cst_27 = arith.constant dense<0.000000e+00> : vector<34x128xf32>
    %29 = tpu.matmul %26, %28, %cst_27 {dimension_numbers = #tpu.dot_dimension_numbers<[1], [0], [0], [1], [0, 0, 1, 1], [], []>} : vector<34x32xbf16>, vector<32x128xbf16>, vector<34x128xf32> -> vector<34x128xf32>
    %30 = arith.addf %24, %29 : vector<34x128xf32>
    %c0_28 = arith.constant 0 : index
    %c8 = arith.constant 8 : index
    %c0_29 = arith.constant 0 : index
    %31 = vector.load %arg1[%c0_28, %c8, %c0_29] : memref<1x48x32xbf16, #tpu.memory_space<vmem>>, vector<1x34x32xbf16>
    %32 = vector.shape_cast %31 : vector<1x34x32xbf16> to vector<34x32xbf16>
    %c5 = arith.constant 5 : index
    %c0_30 = arith.constant 0 : index
    %c0_31 = arith.constant 0 : index
    %33 = vector.load %arg2[%c5, %c0_30, %c0_31] : memref<9x32x128xbf16, #tpu.memory_space<vmem>>, vector<1x32x128xbf16>
    %34 = vector.shape_cast %33 : vector<1x32x128xbf16> to vector<32x128xbf16>
    %cst_32 = arith.constant dense<0.000000e+00> : vector<34x128xf32>
    %35 = tpu.matmul %32, %34, %cst_32 {dimension_numbers = #tpu.dot_dimension_numbers<[1], [0], [0], [1], [0, 0, 1, 1], [], []>} : vector<34x32xbf16>, vector<32x128xbf16>, vector<34x128xf32> -> vector<34x128xf32>
    %36 = arith.addf %30, %35 : vector<34x128xf32>
    %c0_33 = arith.constant 0 : index
    %c12 = arith.constant 12 : index
    %c0_34 = arith.constant 0 : index
    %37 = vector.load %arg1[%c0_33, %c12, %c0_34] : memref<1x48x32xbf16, #tpu.memory_space<vmem>>, vector<1x34x32xbf16>
    %38 = vector.shape_cast %37 : vector<1x34x32xbf16> to vector<34x32xbf16>
    %c6_35 = arith.constant 6 : index
    %c0_36 = arith.constant 0 : index
    %c0_37 = arith.constant 0 : index
    %39 = vector.load %arg2[%c6_35, %c0_36, %c0_37] : memref<9x32x128xbf16, #tpu.memory_space<vmem>>, vector<1x32x128xbf16>
    %40 = vector.shape_cast %39 : vector<1x32x128xbf16> to vector<32x128xbf16>
    %cst_38 = arith.constant dense<0.000000e+00> : vector<34x128xf32>
    %41 = tpu.matmul %38, %40, %cst_38 {dimension_numbers = #tpu.dot_dimension_numbers<[1], [0], [0], [1], [0, 0, 1, 1], [], []>} : vector<34x32xbf16>, vector<32x128xbf16>, vector<34x128xf32> -> vector<34x128xf32>
    %42 = arith.addf %36, %41 : vector<34x128xf32>
    %c0_39 = arith.constant 0 : index
    %c13 = arith.constant 13 : index
    %c0_40 = arith.constant 0 : index
    %43 = vector.load %arg1[%c0_39, %c13, %c0_40] : memref<1x48x32xbf16, #tpu.memory_space<vmem>>, vector<1x34x32xbf16>
    %44 = vector.shape_cast %43 : vector<1x34x32xbf16> to vector<34x32xbf16>
    %c7_41 = arith.constant 7 : index
    %c0_42 = arith.constant 0 : index
    %c0_43 = arith.constant 0 : index
    %45 = vector.load %arg2[%c7_41, %c0_42, %c0_43] : memref<9x32x128xbf16, #tpu.memory_space<vmem>>, vector<1x32x128xbf16>
    %46 = vector.shape_cast %45 : vector<1x32x128xbf16> to vector<32x128xbf16>
    %cst_44 = arith.constant dense<0.000000e+00> : vector<34x128xf32>
    %47 = tpu.matmul %44, %46, %cst_44 {dimension_numbers = #tpu.dot_dimension_numbers<[1], [0], [0], [1], [0, 0, 1, 1], [], []>} : vector<34x32xbf16>, vector<32x128xbf16>, vector<34x128xf32> -> vector<34x128xf32>
    %48 = arith.addf %42, %47 : vector<34x128xf32>
    %c0_45 = arith.constant 0 : index
    %c14 = arith.constant 14 : index
    %c0_46 = arith.constant 0 : index
    %49 = vector.load %arg1[%c0_45, %c14, %c0_46] : memref<1x48x32xbf16, #tpu.memory_space<vmem>>, vector<1x34x32xbf16>
    %50 = vector.shape_cast %49 : vector<1x34x32xbf16> to vector<34x32xbf16>
    %c8_47 = arith.constant 8 : index
    %c0_48 = arith.constant 0 : index
    %c0_49 = arith.constant 0 : index
    %51 = vector.load %arg2[%c8_47, %c0_48, %c0_49] : memref<9x32x128xbf16, #tpu.memory_space<vmem>>, vector<1x32x128xbf16>
    %52 = vector.shape_cast %51 : vector<1x32x128xbf16> to vector<32x128xbf16>
    %cst_50 = arith.constant dense<0.000000e+00> : vector<34x128xf32>
    %53 = tpu.matmul %50, %52, %cst_50 {dimension_numbers = #tpu.dot_dimension_numbers<[1], [0], [0], [1], [0, 0, 1, 1], [], []>} : vector<34x32xbf16>, vector<32x128xbf16>, vector<34x128xf32> -> vector<34x128xf32>
    %54 = arith.addf %48, %53 : vector<34x128xf32>
    %c0_51 = arith.constant 0 : index
    %c0_52 = arith.constant 0 : index
    %55 = vector.load %arg3[%c0_51, %c0_52] : memref<1x128xf32, #tpu.memory_space<vmem>>, vector<1x128xf32>
    %56 = vector.broadcast %55 : vector<1x128xf32> to vector<34x128xf32>
    %57 = arith.addf %54, %56 : vector<34x128xf32>
    %cst_53 = arith.constant 0.000000e+00 : f32
    %58 = vector.broadcast %cst_53 : f32 to vector<34x128xf32>
    %59 = arith.cmpf oge, %57, %58 : vector<34x128xf32>
    %c0_54 = arith.constant 0 : index
    %c0_55 = arith.constant 0 : index
    %60 = vector.load %arg4[%c0_54, %c0_55] : memref<1x128xf32, #tpu.memory_space<vmem>>, vector<1x128xf32>
    %61 = vector.broadcast %60 : vector<1x128xf32> to vector<34x128xf32>
    %62 = arith.mulf %57, %61 : vector<34x128xf32>
    %63 = arith.select %59, %57, %62 : vector<34x128xi1>, vector<34x128xf32>
    %c0_56 = arith.constant 0 : index
    %c0_57 = arith.constant 0 : index
    %64 = vector.load %arg5[%c0_56, %c0_57] : memref<34x1xf32, #tpu.memory_space<vmem>>, vector<34x1xf32>
    %65 = vector.broadcast %64 : vector<34x1xf32> to vector<34x128xf32>
    %66 = arith.mulf %63, %65 : vector<34x128xf32>
    %cst_58 = arith.constant 0.000000e+00 : bf16
    %67 = vector.broadcast %cst_58 : bf16 to vector<1x48x128xbf16>
    %c0_59 = arith.constant 0 : index
    %c0_60 = arith.constant 0 : index
    %c0_61 = arith.constant 0 : index
    %68 = vector.load %arg6[%c0_59, %c0_60, %c0_61] : memref<1x48x128xbf16, #tpu.memory_space<vmem>>, vector<1x48x128xbf16>
    tpu.vector_store %arg6[%c0_59, %c0_60, %c0_61], %67 {strides = array<i32>} : memref<1x48x128xbf16, #tpu.memory_space<vmem>>, vector<1x48x128xbf16>,
    %69 = arith.truncf %66 : vector<34x128xf32> to vector<34x128xbf16>
    %c0_62 = arith.constant 0 : index
    %c7_63 = arith.constant 7 : index
    %c0_64 = arith.constant 0 : index
    %70 = vector.load %arg6[%c0_62, %c7_63, %c0_64] : memref<1x48x128xbf16, #tpu.memory_space<vmem>>, vector<1x34x128xbf16>
    %71 = vector.shape_cast %70 : vector<1x34x128xbf16> to vector<34x128xbf16>
    %72 = vector.shape_cast %69 : vector<34x128xbf16> to vector<1x34x128xbf16>
    tpu.vector_store %arg6[%c0_62, %c7_63, %c0_64], %72 {strides = array<i32>} : memref<1x48x128xbf16, #tpu.memory_space<vmem>>, vector<1x34x128xbf16>,
    return
  }
  func.func @transform_0(%arg0: i32) -> (i32, i32, i32) {
    %c0_i32 = arith.constant 0 : i32
    %c0_i32_0 = arith.constant 0 : i32
    %c0_i32_1 = arith.constant 0 : i32
    return %arg0, %c0_i32, %c0_i32_0 : i32, i32, i32
  }
  func.func @transform_1(%arg0: i32) -> (i32, i32, i32) {
    %c0_i32 = arith.constant 0 : i32
    %c0_i32_0 = arith.constant 0 : i32
    %c0_i32_1 = arith.constant 0 : i32
    %c0_i32_2 = arith.constant 0 : i32
    return %c0_i32, %c0_i32_0, %c0_i32_1 : i32, i32, i32
  }
  func.func @transform_2(%arg0: i32) -> (i32, i32) {
    %c0_i32 = arith.constant 0 : i32
    %c0_i32_0 = arith.constant 0 : i32
    %c0_i32_1 = arith.constant 0 : i32
    return %c0_i32, %c0_i32_0 : i32, i32
  }
  func.func @transform_3(%arg0: i32) -> (i32, i32) {
    %c0_i32 = arith.constant 0 : i32
    %c0_i32_0 = arith.constant 0 : i32
    %c0_i32_1 = arith.constant 0 : i32
    return %c0_i32, %c0_i32_0 : i32, i32
  }
  func.func @transform_4(%arg0: i32) -> (i32, i32) {
    %c0_i32 = arith.constant 0 : i32
    %c0_i32_0 = arith.constant 0 : i32
    %c0_i32_1 = arith.constant 0 : i32
    return %c0_i32, %c0_i32_0 : i32, i32
  }
  func.func @transform_5(%arg0: i32) -> (i32, i32, i32) {
    %c0_i32 = arith.constant 0 : i32
    %c0_i32_0 = arith.constant 0 : i32
    %c0_i32_1 = arith.constant 0 : i32
    return %arg0, %c0_i32, %c0_i32_0 : i32, i32, i32
  }
}

module attributes {stable_mosaic.version = 11 : i64} {
  func.func @_conv3x3_pl_kernel(%arg0: i32, %arg1: memref<1x48x32xbf16, #tpu.memory_space<vmem>>, %arg2: memref<9x32x32xbf16, #tpu.memory_space<vmem>>, %arg3: memref<1x32xf32, #tpu.memory_space<vmem>>, %arg4: memref<1x32xf32, #tpu.memory_space<vmem>>, %arg5: memref<34x1xf32, #tpu.memory_space<vmem>>, %arg6: memref<1x48x32xbf16, #tpu.memory_space<vmem>>, %arg7: memref<1x48x32xbf16, #tpu.memory_space<vmem>>) attributes {dimension_semantics = [#tpu.dimension_semantics<parallel>], iteration_bounds = array<i64: 2>, scalar_prefetch = 0 : i64, scratch_operands = 0 : i64, tpu.core_type = #tpu.core_type<tc>, window_params = [{transform_indices = @transform_0, window_bounds = array<i64: 1, 48, 32>}, {pipeline_mode = #tpu.pipeline_mode<synchronous>, transform_indices = @transform_1, window_bounds = array<i64: 9, 32, 32>}, {pipeline_mode = #tpu.pipeline_mode<synchronous>, transform_indices = @transform_2, window_bounds = array<i64: 1, 32>}, {pipeline_mode = #tpu.pipeline_mode<synchronous>, transform_indices = @transform_3, window_bounds = array<i64: 1, 32>}, {pipeline_mode = #tpu.pipeline_mode<synchronous>, transform_indices = @transform_4, window_bounds = array<i64: 34, 1>}, {transform_indices = @transform_5, window_bounds = array<i64: 1, 48, 32>}, {transform_indices = @transform_6, window_bounds = array<i64: 1, 48, 32>}]} {
    %cst = arith.constant 0.000000e+00 : f32
    %0 = vector.broadcast %cst : f32 to vector<34x32xf32>
    %c0 = arith.constant 0 : index
    %c0_0 = arith.constant 0 : index
    %c0_1 = arith.constant 0 : index
    %1 = vector.load %arg1[%c0, %c0_0, %c0_1] : memref<1x48x32xbf16, #tpu.memory_space<vmem>>, vector<1x34x32xbf16>
    %2 = vector.shape_cast %1 : vector<1x34x32xbf16> to vector<34x32xbf16>
    %c0_2 = arith.constant 0 : index
    %c0_3 = arith.constant 0 : index
    %c0_4 = arith.constant 0 : index
    %3 = vector.load %arg2[%c0_2, %c0_3, %c0_4] : memref<9x32x32xbf16, #tpu.memory_space<vmem>>, vector<1x32x32xbf16>
    %4 = vector.shape_cast %3 : vector<1x32x32xbf16> to vector<32x32xbf16>
    %cst_5 = arith.constant dense<0.000000e+00> : vector<34x32xf32>
    %5 = tpu.matmul %2, %4, %cst_5 {dimension_numbers = #tpu.dot_dimension_numbers<[1], [0], [0], [1], [0, 0, 1, 1], [], []>} : vector<34x32xbf16>, vector<32x32xbf16>, vector<34x32xf32> -> vector<34x32xf32>
    %6 = arith.addf %0, %5 : vector<34x32xf32>
    %c0_6 = arith.constant 0 : index
    %c1 = arith.constant 1 : index
    %c0_7 = arith.constant 0 : index
    %7 = vector.load %arg1[%c0_6, %c1, %c0_7] : memref<1x48x32xbf16, #tpu.memory_space<vmem>>, vector<1x34x32xbf16>
    %8 = vector.shape_cast %7 : vector<1x34x32xbf16> to vector<34x32xbf16>
    %c1_8 = arith.constant 1 : index
    %c0_9 = arith.constant 0 : index
    %c0_10 = arith.constant 0 : index
    %9 = vector.load %arg2[%c1_8, %c0_9, %c0_10] : memref<9x32x32xbf16, #tpu.memory_space<vmem>>, vector<1x32x32xbf16>
    %10 = vector.shape_cast %9 : vector<1x32x32xbf16> to vector<32x32xbf16>
    %cst_11 = arith.constant dense<0.000000e+00> : vector<34x32xf32>
    %11 = tpu.matmul %8, %10, %cst_11 {dimension_numbers = #tpu.dot_dimension_numbers<[1], [0], [0], [1], [0, 0, 1, 1], [], []>} : vector<34x32xbf16>, vector<32x32xbf16>, vector<34x32xf32> -> vector<34x32xf32>
    %12 = arith.addf %6, %11 : vector<34x32xf32>
    %c0_12 = arith.constant 0 : index
    %c2 = arith.constant 2 : index
    %c0_13 = arith.constant 0 : index
    %13 = vector.load %arg1[%c0_12, %c2, %c0_13] : memref<1x48x32xbf16, #tpu.memory_space<vmem>>, vector<1x34x32xbf16>
    %14 = vector.shape_cast %13 : vector<1x34x32xbf16> to vector<34x32xbf16>
    %c2_14 = arith.constant 2 : index
    %c0_15 = arith.constant 0 : index
    %c0_16 = arith.constant 0 : index
    %15 = vector.load %arg2[%c2_14, %c0_15, %c0_16] : memref<9x32x32xbf16, #tpu.memory_space<vmem>>, vector<1x32x32xbf16>
    %16 = vector.shape_cast %15 : vector<1x32x32xbf16> to vector<32x32xbf16>
    %cst_17 = arith.constant dense<0.000000e+00> : vector<34x32xf32>
    %17 = tpu.matmul %14, %16, %cst_17 {dimension_numbers = #tpu.dot_dimension_numbers<[1], [0], [0], [1], [0, 0, 1, 1], [], []>} : vector<34x32xbf16>, vector<32x32xbf16>, vector<34x32xf32> -> vector<34x32xf32>
    %18 = arith.addf %12, %17 : vector<34x32xf32>
    %c0_18 = arith.constant 0 : index
    %c6 = arith.constant 6 : index
    %c0_19 = arith.constant 0 : index
    %19 = vector.load %arg1[%c0_18, %c6, %c0_19] : memref<1x48x32xbf16, #tpu.memory_space<vmem>>, vector<1x34x32xbf16>
    %20 = vector.shape_cast %19 : vector<1x34x32xbf16> to vector<34x32xbf16>
    %c3 = arith.constant 3 : index
    %c0_20 = arith.constant 0 : index
    %c0_21 = arith.constant 0 : index
    %21 = vector.load %arg2[%c3, %c0_20, %c0_21] : memref<9x32x32xbf16, #tpu.memory_space<vmem>>, vector<1x32x32xbf16>
    %22 = vector.shape_cast %21 : vector<1x32x32xbf16> to vector<32x32xbf16>
    %cst_22 = arith.constant dense<0.000000e+00> : vector<34x32xf32>
    %23 = tpu.matmul %20, %22, %cst_22 {dimension_numbers = #tpu.dot_dimension_numbers<[1], [0], [0], [1], [0, 0, 1, 1], [], []>} : vector<34x32xbf16>, vector<32x32xbf16>, vector<34x32xf32> -> vector<34x32xf32>
    %24 = arith.addf %18, %23 : vector<34x32xf32>
    %c0_23 = arith.constant 0 : index
    %c7 = arith.constant 7 : index
    %c0_24 = arith.constant 0 : index
    %25 = vector.load %arg1[%c0_23, %c7, %c0_24] : memref<1x48x32xbf16, #tpu.memory_space<vmem>>, vector<1x34x32xbf16>
    %26 = vector.shape_cast %25 : vector<1x34x32xbf16> to vector<34x32xbf16>
    %c4 = arith.constant 4 : index
    %c0_25 = arith.constant 0 : index
    %c0_26 = arith.constant 0 : index
    %27 = vector.load %arg2[%c4, %c0_25, %c0_26] : memref<9x32x32xbf16, #tpu.memory_space<vmem>>, vector<1x32x32xbf16>
    %28 = vector.shape_cast %27 : vector<1x32x32xbf16> to vector<32x32xbf16>
    %cst_27 = arith.constant dense<0.000000e+00> : vector<34x32xf32>
    %29 = tpu.matmul %26, %28, %cst_27 {dimension_numbers = #tpu.dot_dimension_numbers<[1], [0], [0], [1], [0, 0, 1, 1], [], []>} : vector<34x32xbf16>, vector<32x32xbf16>, vector<34x32xf32> -> vector<34x32xf32>
    %30 = arith.addf %24, %29 : vector<34x32xf32>
    %c0_28 = arith.constant 0 : index
    %c8 = arith.constant 8 : index
    %c0_29 = arith.constant 0 : index
    %31 = vector.load %arg1[%c0_28, %c8, %c0_29] : memref<1x48x32xbf16, #tpu.memory_space<vmem>>, vector<1x34x32xbf16>
    %32 = vector.shape_cast %31 : vector<1x34x32xbf16> to vector<34x32xbf16>
    %c5 = arith.constant 5 : index
    %c0_30 = arith.constant 0 : index
    %c0_31 = arith.constant 0 : index
    %33 = vector.load %arg2[%c5, %c0_30, %c0_31] : memref<9x32x32xbf16, #tpu.memory_space<vmem>>, vector<1x32x32xbf16>
    %34 = vector.shape_cast %33 : vector<1x32x32xbf16> to vector<32x32xbf16>
    %cst_32 = arith.constant dense<0.000000e+00> : vector<34x32xf32>
    %35 = tpu.matmul %32, %34, %cst_32 {dimension_numbers = #tpu.dot_dimension_numbers<[1], [0], [0], [1], [0, 0, 1, 1], [], []>} : vector<34x32xbf16>, vector<32x32xbf16>, vector<34x32xf32> -> vector<34x32xf32>
    %36 = arith.addf %30, %35 : vector<34x32xf32>
    %c0_33 = arith.constant 0 : index
    %c12 = arith.constant 12 : index
    %c0_34 = arith.constant 0 : index
    %37 = vector.load %arg1[%c0_33, %c12, %c0_34] : memref<1x48x32xbf16, #tpu.memory_space<vmem>>, vector<1x34x32xbf16>
    %38 = vector.shape_cast %37 : vector<1x34x32xbf16> to vector<34x32xbf16>
    %c6_35 = arith.constant 6 : index
    %c0_36 = arith.constant 0 : index
    %c0_37 = arith.constant 0 : index
    %39 = vector.load %arg2[%c6_35, %c0_36, %c0_37] : memref<9x32x32xbf16, #tpu.memory_space<vmem>>, vector<1x32x32xbf16>
    %40 = vector.shape_cast %39 : vector<1x32x32xbf16> to vector<32x32xbf16>
    %cst_38 = arith.constant dense<0.000000e+00> : vector<34x32xf32>
    %41 = tpu.matmul %38, %40, %cst_38 {dimension_numbers = #tpu.dot_dimension_numbers<[1], [0], [0], [1], [0, 0, 1, 1], [], []>} : vector<34x32xbf16>, vector<32x32xbf16>, vector<34x32xf32> -> vector<34x32xf32>
    %42 = arith.addf %36, %41 : vector<34x32xf32>
    %c0_39 = arith.constant 0 : index
    %c13 = arith.constant 13 : index
    %c0_40 = arith.constant 0 : index
    %43 = vector.load %arg1[%c0_39, %c13, %c0_40] : memref<1x48x32xbf16, #tpu.memory_space<vmem>>, vector<1x34x32xbf16>
    %44 = vector.shape_cast %43 : vector<1x34x32xbf16> to vector<34x32xbf16>
    %c7_41 = arith.constant 7 : index
    %c0_42 = arith.constant 0 : index
    %c0_43 = arith.constant 0 : index
    %45 = vector.load %arg2[%c7_41, %c0_42, %c0_43] : memref<9x32x32xbf16, #tpu.memory_space<vmem>>, vector<1x32x32xbf16>
    %46 = vector.shape_cast %45 : vector<1x32x32xbf16> to vector<32x32xbf16>
    %cst_44 = arith.constant dense<0.000000e+00> : vector<34x32xf32>
    %47 = tpu.matmul %44, %46, %cst_44 {dimension_numbers = #tpu.dot_dimension_numbers<[1], [0], [0], [1], [0, 0, 1, 1], [], []>} : vector<34x32xbf16>, vector<32x32xbf16>, vector<34x32xf32> -> vector<34x32xf32>
    %48 = arith.addf %42, %47 : vector<34x32xf32>
    %c0_45 = arith.constant 0 : index
    %c14 = arith.constant 14 : index
    %c0_46 = arith.constant 0 : index
    %49 = vector.load %arg1[%c0_45, %c14, %c0_46] : memref<1x48x32xbf16, #tpu.memory_space<vmem>>, vector<1x34x32xbf16>
    %50 = vector.shape_cast %49 : vector<1x34x32xbf16> to vector<34x32xbf16>
    %c8_47 = arith.constant 8 : index
    %c0_48 = arith.constant 0 : index
    %c0_49 = arith.constant 0 : index
    %51 = vector.load %arg2[%c8_47, %c0_48, %c0_49] : memref<9x32x32xbf16, #tpu.memory_space<vmem>>, vector<1x32x32xbf16>
    %52 = vector.shape_cast %51 : vector<1x32x32xbf16> to vector<32x32xbf16>
    %cst_50 = arith.constant dense<0.000000e+00> : vector<34x32xf32>
    %53 = tpu.matmul %50, %52, %cst_50 {dimension_numbers = #tpu.dot_dimension_numbers<[1], [0], [0], [1], [0, 0, 1, 1], [], []>} : vector<34x32xbf16>, vector<32x32xbf16>, vector<34x32xf32> -> vector<34x32xf32>
    %54 = arith.addf %48, %53 : vector<34x32xf32>
    %c0_51 = arith.constant 0 : index
    %c0_52 = arith.constant 0 : index
    %55 = vector.load %arg3[%c0_51, %c0_52] : memref<1x32xf32, #tpu.memory_space<vmem>>, vector<1x32xf32>
    %56 = vector.broadcast %55 : vector<1x32xf32> to vector<34x32xf32>
    %57 = arith.addf %54, %56 : vector<34x32xf32>
    %cst_53 = arith.constant 0.000000e+00 : f32
    %58 = vector.broadcast %cst_53 : f32 to vector<34x32xf32>
    %59 = arith.cmpf oge, %57, %58 : vector<34x32xf32>
    %c0_54 = arith.constant 0 : index
    %c0_55 = arith.constant 0 : index
    %60 = vector.load %arg4[%c0_54, %c0_55] : memref<1x32xf32, #tpu.memory_space<vmem>>, vector<1x32xf32>
    %61 = vector.broadcast %60 : vector<1x32xf32> to vector<34x32xf32>
    %62 = arith.mulf %57, %61 : vector<34x32xf32>
    %63 = arith.select %59, %57, %62 : vector<34x32xi1>, vector<34x32xf32>
    %c0_56 = arith.constant 0 : index
    %c7_57 = arith.constant 7 : index
    %c0_58 = arith.constant 0 : index
    %64 = vector.load %arg6[%c0_56, %c7_57, %c0_58] : memref<1x48x32xbf16, #tpu.memory_space<vmem>>, vector<1x34x32xbf16>
    %65 = vector.shape_cast %64 : vector<1x34x32xbf16> to vector<34x32xbf16>
    %66 = arith.extf %65 : vector<34x32xbf16> to vector<34x32xf32>
    %67 = arith.addf %63, %66 : vector<34x32xf32>
    %c0_59 = arith.constant 0 : index
    %c0_60 = arith.constant 0 : index
    %68 = vector.load %arg5[%c0_59, %c0_60] : memref<34x1xf32, #tpu.memory_space<vmem>>, vector<34x1xf32>
    %69 = vector.broadcast %68 : vector<34x1xf32> to vector<34x32xf32>
    %70 = arith.mulf %67, %69 : vector<34x32xf32>
    %cst_61 = arith.constant 0.000000e+00 : bf16
    %71 = vector.broadcast %cst_61 : bf16 to vector<1x48x32xbf16>
    %c0_62 = arith.constant 0 : index
    %c0_63 = arith.constant 0 : index
    %c0_64 = arith.constant 0 : index
    %72 = vector.load %arg7[%c0_62, %c0_63, %c0_64] : memref<1x48x32xbf16, #tpu.memory_space<vmem>>, vector<1x48x32xbf16>
    tpu.vector_store %arg7[%c0_62, %c0_63, %c0_64], %71 {strides = array<i32>} : memref<1x48x32xbf16, #tpu.memory_space<vmem>>, vector<1x48x32xbf16>,
    %73 = arith.truncf %70 : vector<34x32xf32> to vector<34x32xbf16>
    %c0_65 = arith.constant 0 : index
    %c7_66 = arith.constant 7 : index
    %c0_67 = arith.constant 0 : index
    %74 = vector.load %arg7[%c0_65, %c7_66, %c0_67] : memref<1x48x32xbf16, #tpu.memory_space<vmem>>, vector<1x34x32xbf16>
    %75 = vector.shape_cast %74 : vector<1x34x32xbf16> to vector<34x32xbf16>
    %76 = vector.shape_cast %73 : vector<34x32xbf16> to vector<1x34x32xbf16>
    tpu.vector_store %arg7[%c0_65, %c7_66, %c0_67], %76 {strides = array<i32>} : memref<1x48x32xbf16, #tpu.memory_space<vmem>>, vector<1x34x32xbf16>,
    return
  }
  func.func @transform_0(%arg0: i32) -> (i32, i32, i32) {
    %c0_i32 = arith.constant 0 : i32
    %c0_i32_0 = arith.constant 0 : i32
    %c0_i32_1 = arith.constant 0 : i32
    return %arg0, %c0_i32, %c0_i32_0 : i32, i32, i32
  }
  func.func @transform_1(%arg0: i32) -> (i32, i32, i32) {
    %c0_i32 = arith.constant 0 : i32
    %c0_i32_0 = arith.constant 0 : i32
    %c0_i32_1 = arith.constant 0 : i32
    %c0_i32_2 = arith.constant 0 : i32
    return %c0_i32, %c0_i32_0, %c0_i32_1 : i32, i32, i32
  }
  func.func @transform_2(%arg0: i32) -> (i32, i32) {
    %c0_i32 = arith.constant 0 : i32
    %c0_i32_0 = arith.constant 0 : i32
    %c0_i32_1 = arith.constant 0 : i32
    return %c0_i32, %c0_i32_0 : i32, i32
  }
  func.func @transform_3(%arg0: i32) -> (i32, i32) {
    %c0_i32 = arith.constant 0 : i32
    %c0_i32_0 = arith.constant 0 : i32
    %c0_i32_1 = arith.constant 0 : i32
    return %c0_i32, %c0_i32_0 : i32, i32
  }
  func.func @transform_4(%arg0: i32) -> (i32, i32) {
    %c0_i32 = arith.constant 0 : i32
    %c0_i32_0 = arith.constant 0 : i32
    %c0_i32_1 = arith.constant 0 : i32
    return %c0_i32, %c0_i32_0 : i32, i32
  }
  func.func @transform_5(%arg0: i32) -> (i32, i32, i32) {
    %c0_i32 = arith.constant 0 : i32
    %c0_i32_0 = arith.constant 0 : i32
    %c0_i32_1 = arith.constant 0 : i32
    return %arg0, %c0_i32, %c0_i32_0 : i32, i32, i32
  }
  func.func @transform_6(%arg0: i32) -> (i32, i32, i32) {
    %c0_i32 = arith.constant 0 : i32
    %c0_i32_0 = arith.constant 0 : i32
    %c0_i32_1 = arith.constant 0 : i32
    return %arg0, %c0_i32, %c0_i32_0 : i32, i32, i32
  }
}

module attributes {stable_mosaic.version = 11 : i64} {
  func.func @_conv3x3_pl_kernel(%arg0: i32, %arg1: memref<1x120x32xbf16, #tpu.memory_space<vmem>>, %arg2: memref<9x32x20xbf16, #tpu.memory_space<vmem>>, %arg3: memref<1x20xf32, #tpu.memory_space<vmem>>, %arg4: memref<1x20xf32, #tpu.memory_space<vmem>>, %arg5: memref<98x1xf32, #tpu.memory_space<vmem>>, %arg6: memref<1x120x20xbf16, #tpu.memory_space<vmem>>) attributes {dimension_semantics = [#tpu.dimension_semantics<parallel>], iteration_bounds = array<i64: 2>, scalar_prefetch = 0 : i64, scratch_operands = 0 : i64, tpu.core_type = #tpu.core_type<tc>, window_params = [{transform_indices = @transform_0, window_bounds = array<i64: 1, 120, 32>}, {pipeline_mode = #tpu.pipeline_mode<synchronous>, transform_indices = @transform_1, window_bounds = array<i64: 9, 32, 20>}, {pipeline_mode = #tpu.pipeline_mode<synchronous>, transform_indices = @transform_2, window_bounds = array<i64: 1, 20>}, {pipeline_mode = #tpu.pipeline_mode<synchronous>, transform_indices = @transform_3, window_bounds = array<i64: 1, 20>}, {pipeline_mode = #tpu.pipeline_mode<synchronous>, transform_indices = @transform_4, window_bounds = array<i64: 98, 1>}, {transform_indices = @transform_5, window_bounds = array<i64: 1, 120, 20>}]} {
    %cst = arith.constant 0.000000e+00 : f32
    %0 = vector.broadcast %cst : f32 to vector<98x20xf32>
    %c0 = arith.constant 0 : index
    %c0_0 = arith.constant 0 : index
    %c0_1 = arith.constant 0 : index
    %1 = vector.load %arg1[%c0, %c0_0, %c0_1] : memref<1x120x32xbf16, #tpu.memory_space<vmem>>, vector<1x98x32xbf16>
    %2 = vector.shape_cast %1 : vector<1x98x32xbf16> to vector<98x32xbf16>
    %c0_2 = arith.constant 0 : index
    %c0_3 = arith.constant 0 : index
    %c0_4 = arith.constant 0 : index
    %3 = vector.load %arg2[%c0_2, %c0_3, %c0_4] : memref<9x32x20xbf16, #tpu.memory_space<vmem>>, vector<1x32x20xbf16>
    %4 = vector.shape_cast %3 : vector<1x32x20xbf16> to vector<32x20xbf16>
    %cst_5 = arith.constant dense<0.000000e+00> : vector<98x20xf32>
    %5 = tpu.matmul %2, %4, %cst_5 {dimension_numbers = #tpu.dot_dimension_numbers<[1], [0], [0], [1], [0, 0, 1, 1], [], []>} : vector<98x32xbf16>, vector<32x20xbf16>, vector<98x20xf32> -> vector<98x20xf32>
    %6 = arith.addf %0, %5 : vector<98x20xf32>
    %c0_6 = arith.constant 0 : index
    %c1 = arith.constant 1 : index
    %c0_7 = arith.constant 0 : index
    %7 = vector.load %arg1[%c0_6, %c1, %c0_7] : memref<1x120x32xbf16, #tpu.memory_space<vmem>>, vector<1x98x32xbf16>
    %8 = vector.shape_cast %7 : vector<1x98x32xbf16> to vector<98x32xbf16>
    %c1_8 = arith.constant 1 : index
    %c0_9 = arith.constant 0 : index
    %c0_10 = arith.constant 0 : index
    %9 = vector.load %arg2[%c1_8, %c0_9, %c0_10] : memref<9x32x20xbf16, #tpu.memory_space<vmem>>, vector<1x32x20xbf16>
    %10 = vector.shape_cast %9 : vector<1x32x20xbf16> to vector<32x20xbf16>
    %cst_11 = arith.constant dense<0.000000e+00> : vector<98x20xf32>
    %11 = tpu.matmul %8, %10, %cst_11 {dimension_numbers = #tpu.dot_dimension_numbers<[1], [0], [0], [1], [0, 0, 1, 1], [], []>} : vector<98x32xbf16>, vector<32x20xbf16>, vector<98x20xf32> -> vector<98x20xf32>
    %12 = arith.addf %6, %11 : vector<98x20xf32>
    %c0_12 = arith.constant 0 : index
    %c2 = arith.constant 2 : index
    %c0_13 = arith.constant 0 : index
    %13 = vector.load %arg1[%c0_12, %c2, %c0_13] : memref<1x120x32xbf16, #tpu.memory_space<vmem>>, vector<1x98x32xbf16>
    %14 = vector.shape_cast %13 : vector<1x98x32xbf16> to vector<98x32xbf16>
    %c2_14 = arith.constant 2 : index
    %c0_15 = arith.constant 0 : index
    %c0_16 = arith.constant 0 : index
    %15 = vector.load %arg2[%c2_14, %c0_15, %c0_16] : memref<9x32x20xbf16, #tpu.memory_space<vmem>>, vector<1x32x20xbf16>
    %16 = vector.shape_cast %15 : vector<1x32x20xbf16> to vector<32x20xbf16>
    %cst_17 = arith.constant dense<0.000000e+00> : vector<98x20xf32>
    %17 = tpu.matmul %14, %16, %cst_17 {dimension_numbers = #tpu.dot_dimension_numbers<[1], [0], [0], [1], [0, 0, 1, 1], [], []>} : vector<98x32xbf16>, vector<32x20xbf16>, vector<98x20xf32> -> vector<98x20xf32>
    %18 = arith.addf %12, %17 : vector<98x20xf32>
    %c0_18 = arith.constant 0 : index
    %c10 = arith.constant 10 : index
    %c0_19 = arith.constant 0 : index
    %19 = vector.load %arg1[%c0_18, %c10, %c0_19] : memref<1x120x32xbf16, #tpu.memory_space<vmem>>, vector<1x98x32xbf16>
    %20 = vector.shape_cast %19 : vector<1x98x32xbf16> to vector<98x32xbf16>
    %c3 = arith.constant 3 : index
    %c0_20 = arith.constant 0 : index
    %c0_21 = arith.constant 0 : index
    %21 = vector.load %arg2[%c3, %c0_20, %c0_21] : memref<9x32x20xbf16, #tpu.memory_space<vmem>>, vector<1x32x20xbf16>
    %22 = vector.shape_cast %21 : vector<1x32x20xbf16> to vector<32x20xbf16>
    %cst_22 = arith.constant dense<0.000000e+00> : vector<98x20xf32>
    %23 = tpu.matmul %20, %22, %cst_22 {dimension_numbers = #tpu.dot_dimension_numbers<[1], [0], [0], [1], [0, 0, 1, 1], [], []>} : vector<98x32xbf16>, vector<32x20xbf16>, vector<98x20xf32> -> vector<98x20xf32>
    %24 = arith.addf %18, %23 : vector<98x20xf32>
    %c0_23 = arith.constant 0 : index
    %c11 = arith.constant 11 : index
    %c0_24 = arith.constant 0 : index
    %25 = vector.load %arg1[%c0_23, %c11, %c0_24] : memref<1x120x32xbf16, #tpu.memory_space<vmem>>, vector<1x98x32xbf16>
    %26 = vector.shape_cast %25 : vector<1x98x32xbf16> to vector<98x32xbf16>
    %c4 = arith.constant 4 : index
    %c0_25 = arith.constant 0 : index
    %c0_26 = arith.constant 0 : index
    %27 = vector.load %arg2[%c4, %c0_25, %c0_26] : memref<9x32x20xbf16, #tpu.memory_space<vmem>>, vector<1x32x20xbf16>
    %28 = vector.shape_cast %27 : vector<1x32x20xbf16> to vector<32x20xbf16>
    %cst_27 = arith.constant dense<0.000000e+00> : vector<98x20xf32>
    %29 = tpu.matmul %26, %28, %cst_27 {dimension_numbers = #tpu.dot_dimension_numbers<[1], [0], [0], [1], [0, 0, 1, 1], [], []>} : vector<98x32xbf16>, vector<32x20xbf16>, vector<98x20xf32> -> vector<98x20xf32>
    %30 = arith.addf %24, %29 : vector<98x20xf32>
    %c0_28 = arith.constant 0 : index
    %c12 = arith.constant 12 : index
    %c0_29 = arith.constant 0 : index
    %31 = vector.load %arg1[%c0_28, %c12, %c0_29] : memref<1x120x32xbf16, #tpu.memory_space<vmem>>, vector<1x98x32xbf16>
    %32 = vector.shape_cast %31 : vector<1x98x32xbf16> to vector<98x32xbf16>
    %c5 = arith.constant 5 : index
    %c0_30 = arith.constant 0 : index
    %c0_31 = arith.constant 0 : index
    %33 = vector.load %arg2[%c5, %c0_30, %c0_31] : memref<9x32x20xbf16, #tpu.memory_space<vmem>>, vector<1x32x20xbf16>
    %34 = vector.shape_cast %33 : vector<1x32x20xbf16> to vector<32x20xbf16>
    %cst_32 = arith.constant dense<0.000000e+00> : vector<98x20xf32>
    %35 = tpu.matmul %32, %34, %cst_32 {dimension_numbers = #tpu.dot_dimension_numbers<[1], [0], [0], [1], [0, 0, 1, 1], [], []>} : vector<98x32xbf16>, vector<32x20xbf16>, vector<98x20xf32> -> vector<98x20xf32>
    %36 = arith.addf %30, %35 : vector<98x20xf32>
    %c0_33 = arith.constant 0 : index
    %c20 = arith.constant 20 : index
    %c0_34 = arith.constant 0 : index
    %37 = vector.load %arg1[%c0_33, %c20, %c0_34] : memref<1x120x32xbf16, #tpu.memory_space<vmem>>, vector<1x98x32xbf16>
    %38 = vector.shape_cast %37 : vector<1x98x32xbf16> to vector<98x32xbf16>
    %c6 = arith.constant 6 : index
    %c0_35 = arith.constant 0 : index
    %c0_36 = arith.constant 0 : index
    %39 = vector.load %arg2[%c6, %c0_35, %c0_36] : memref<9x32x20xbf16, #tpu.memory_space<vmem>>, vector<1x32x20xbf16>
    %40 = vector.shape_cast %39 : vector<1x32x20xbf16> to vector<32x20xbf16>
    %cst_37 = arith.constant dense<0.000000e+00> : vector<98x20xf32>
    %41 = tpu.matmul %38, %40, %cst_37 {dimension_numbers = #tpu.dot_dimension_numbers<[1], [0], [0], [1], [0, 0, 1, 1], [], []>} : vector<98x32xbf16>, vector<32x20xbf16>, vector<98x20xf32> -> vector<98x20xf32>
    %42 = arith.addf %36, %41 : vector<98x20xf32>
    %c0_38 = arith.constant 0 : index
    %c21 = arith.constant 21 : index
    %c0_39 = arith.constant 0 : index
    %43 = vector.load %arg1[%c0_38, %c21, %c0_39] : memref<1x120x32xbf16, #tpu.memory_space<vmem>>, vector<1x98x32xbf16>
    %44 = vector.shape_cast %43 : vector<1x98x32xbf16> to vector<98x32xbf16>
    %c7 = arith.constant 7 : index
    %c0_40 = arith.constant 0 : index
    %c0_41 = arith.constant 0 : index
    %45 = vector.load %arg2[%c7, %c0_40, %c0_41] : memref<9x32x20xbf16, #tpu.memory_space<vmem>>, vector<1x32x20xbf16>
    %46 = vector.shape_cast %45 : vector<1x32x20xbf16> to vector<32x20xbf16>
    %cst_42 = arith.constant dense<0.000000e+00> : vector<98x20xf32>
    %47 = tpu.matmul %44, %46, %cst_42 {dimension_numbers = #tpu.dot_dimension_numbers<[1], [0], [0], [1], [0, 0, 1, 1], [], []>} : vector<98x32xbf16>, vector<32x20xbf16>, vector<98x20xf32> -> vector<98x20xf32>
    %48 = arith.addf %42, %47 : vector<98x20xf32>
    %c0_43 = arith.constant 0 : index
    %c22 = arith.constant 22 : index
    %c0_44 = arith.constant 0 : index
    %49 = vector.load %arg1[%c0_43, %c22, %c0_44] : memref<1x120x32xbf16, #tpu.memory_space<vmem>>, vector<1x98x32xbf16>
    %50 = vector.shape_cast %49 : vector<1x98x32xbf16> to vector<98x32xbf16>
    %c8 = arith.constant 8 : index
    %c0_45 = arith.constant 0 : index
    %c0_46 = arith.constant 0 : index
    %51 = vector.load %arg2[%c8, %c0_45, %c0_46] : memref<9x32x20xbf16, #tpu.memory_space<vmem>>, vector<1x32x20xbf16>
    %52 = vector.shape_cast %51 : vector<1x32x20xbf16> to vector<32x20xbf16>
    %cst_47 = arith.constant dense<0.000000e+00> : vector<98x20xf32>
    %53 = tpu.matmul %50, %52, %cst_47 {dimension_numbers = #tpu.dot_dimension_numbers<[1], [0], [0], [1], [0, 0, 1, 1], [], []>} : vector<98x32xbf16>, vector<32x20xbf16>, vector<98x20xf32> -> vector<98x20xf32>
    %54 = arith.addf %48, %53 : vector<98x20xf32>
    %c0_48 = arith.constant 0 : index
    %c0_49 = arith.constant 0 : index
    %55 = vector.load %arg3[%c0_48, %c0_49] : memref<1x20xf32, #tpu.memory_space<vmem>>, vector<1x20xf32>
    %56 = vector.broadcast %55 : vector<1x20xf32> to vector<98x20xf32>
    %57 = arith.addf %54, %56 : vector<98x20xf32>
    %c0_50 = arith.constant 0 : index
    %c0_51 = arith.constant 0 : index
    %58 = vector.load %arg5[%c0_50, %c0_51] : memref<98x1xf32, #tpu.memory_space<vmem>>, vector<98x1xf32>
    %59 = vector.broadcast %58 : vector<98x1xf32> to vector<98x20xf32>
    %60 = arith.mulf %57, %59 : vector<98x20xf32>
    %cst_52 = arith.constant 0.000000e+00 : bf16
    %61 = vector.broadcast %cst_52 : bf16 to vector<1x120x20xbf16>
    %c0_53 = arith.constant 0 : index
    %c0_54 = arith.constant 0 : index
    %c0_55 = arith.constant 0 : index
    %62 = vector.load %arg6[%c0_53, %c0_54, %c0_55] : memref<1x120x20xbf16, #tpu.memory_space<vmem>>, vector<1x120x20xbf16>
    tpu.vector_store %arg6[%c0_53, %c0_54, %c0_55], %61 {strides = array<i32>} : memref<1x120x20xbf16, #tpu.memory_space<vmem>>, vector<1x120x20xbf16>,
    %63 = arith.truncf %60 : vector<98x20xf32> to vector<98x20xbf16>
    %c0_56 = arith.constant 0 : index
    %c11_57 = arith.constant 11 : index
    %c0_58 = arith.constant 0 : index
    %64 = vector.load %arg6[%c0_56, %c11_57, %c0_58] : memref<1x120x20xbf16, #tpu.memory_space<vmem>>, vector<1x98x20xbf16>
    %65 = vector.shape_cast %64 : vector<1x98x20xbf16> to vector<98x20xbf16>
    %66 = vector.shape_cast %63 : vector<98x20xbf16> to vector<1x98x20xbf16>
    tpu.vector_store %arg6[%c0_56, %c11_57, %c0_58], %66 {strides = array<i32>} : memref<1x120x20xbf16, #tpu.memory_space<vmem>>, vector<1x98x20xbf16>,
    return
  }
  func.func @transform_0(%arg0: i32) -> (i32, i32, i32) {
    %c0_i32 = arith.constant 0 : i32
    %c0_i32_0 = arith.constant 0 : i32
    %c0_i32_1 = arith.constant 0 : i32
    return %arg0, %c0_i32, %c0_i32_0 : i32, i32, i32
  }
  func.func @transform_1(%arg0: i32) -> (i32, i32, i32) {
    %c0_i32 = arith.constant 0 : i32
    %c0_i32_0 = arith.constant 0 : i32
    %c0_i32_1 = arith.constant 0 : i32
    %c0_i32_2 = arith.constant 0 : i32
    return %c0_i32, %c0_i32_0, %c0_i32_1 : i32, i32, i32
  }
  func.func @transform_2(%arg0: i32) -> (i32, i32) {
    %c0_i32 = arith.constant 0 : i32
    %c0_i32_0 = arith.constant 0 : i32
    %c0_i32_1 = arith.constant 0 : i32
    return %c0_i32, %c0_i32_0 : i32, i32
  }
  func.func @transform_3(%arg0: i32) -> (i32, i32) {
    %c0_i32 = arith.constant 0 : i32
    %c0_i32_0 = arith.constant 0 : i32
    %c0_i32_1 = arith.constant 0 : i32
    return %c0_i32, %c0_i32_0 : i32, i32
  }
  func.func @transform_4(%arg0: i32) -> (i32, i32) {
    %c0_i32 = arith.constant 0 : i32
    %c0_i32_0 = arith.constant 0 : i32
    %c0_i32_1 = arith.constant 0 : i32
    return %c0_i32, %c0_i32_0 : i32, i32
  }
  func.func @transform_5(%arg0: i32) -> (i32, i32, i32) {
    %c0_i32 = arith.constant 0 : i32
    %c0_i32_0 = arith.constant 0 : i32
    %c0_i32_1 = arith.constant 0 : i32
    return %arg0, %c0_i32, %c0_i32_0 : i32, i32, i32
  }
}

</mosaic_0001>

<bundles_post_ra>
// kernel: ifblock_forward.12
= control target key start
LH: loop header
LB: loop body
LE: loop exit
PB: predicated region body
PF: predicated region fallthrough
CT: control target
= control target key end

     0   :  { %vm142_vm0 = vcmask 1043456   ;;  %vm117_vm1 = vcmask 588800   ;;  %vm362_vm4 = vcmask 125952   ;;  %s681_s1 = inlined_call_operand.vmem [shape: bf16[72,16], index: 1, kind: input, shape index: {}]   ;;  %s682_s0 = inlined_call_operand.vmem [shape: bf16[128,72], index: 0, kind: input, shape index: {}]   ;;  %s683_s2 = inlined_call_operand.vmem [shape: f32[1,16], index: 2, kind: input, shape index: {}]   ;;  %s684_s3 = inlined_call_operand.vmem [shape: f32[1,16], index: 3, kind: input, shape index: {}]   ;;  %s685_s4 = inlined_call_operand.vmem [shape: bf16[128,16], index: 4, kind: output, shape index: {}]  }
   0x1   :  { %v489_v0 = vld [vmem:[%s681_s1 + $0x20] ss:$0 sps:$4 sm:$0xff]   ;;  %v490_v1 = vld [vmem:[%s681_s1 + $0x18] sm:$0xff]   ;;  %v491_v3 = vld [vmem:[%s681_s1 + $0x10] sm:$0xff]  }
   0x2   :  { %487 = vmatprep.subr.msk.bf16.mxu0 %vm142_vm0, %v489_v0  ;;  %488 = vmatprep.subr.msk.bf16.mxu1 %vm142_vm0, %v489_v0  ;;  %v144_v2 = vsel %vm142_vm0, %v489_v0, 0  ;;  %v494_v4 = vld [vmem:[%s682_s0] sm:$0xff]   ;;  %v492_v6 = vld [vmem:[%s681_s1 + $0x8] sm:$0xff]   ;;  %v498_v10 = vld [vmem:[%s682_s0 + $0x10] sm:$0xff]  }
   0x3   :  { %452 = vmatpush3.bf16.msra.mxu0 %v144_v2  ;;  %482 = vmatpush3.bf16.msra.mxu1 %v144_v2  ;;  %v495_v5 = vld [vmem:[%s682_s0 + $0x20] sm:$0xff]   ;;  %v496_v8 = vld [vmem:[%s682_s0 + $0x8] sm:$0xff]   ;;  %v499_v11 = vld [vmem:[%s682_s0 + $0x30] sm:$0xff]  }
   0x4   :  { %453 = vmatprep.subr.bf16.mxu0 %v490_v1  ;;  %478 = vmatprep.subr.bf16.mxu1 %v490_v1  ;;  %v493_v7 = vld [vmem:[%s681_s1] sm:$0xff]   ;;  %v497_v9 = vld [vmem:[%s682_s0 + $0x28] sm:$0xff]   ;;  %v500_v12 = vld [vmem:[%s682_s0 + $0x18] sm:$0xff]  }
   0x5   :  { %461 = vmatprep.mubr.msk.bf16.mxu0 %vm117_vm1, %v494_v4  ;;  %469 = vmatprep.mubr.msk.bf16.mxu1 %vm117_vm1, %v495_v5  ;;  %v501_v13 = vld [vmem:[%s682_s0 + $0x38] sm:$0xff]   ;;  %v577_v14 = vld [vmem:[%s683_s2] ss:$0 sm:$0xff] }
   0x6   :  { %v582_v16 = vld [vmem:[%s684_s3] ss:$0 sm:$0xff] }
   0x7   :  { %454 = vmatpush3.bf16.msra.mxu0 %v490_v1  ;;  %483 = vmatpush3.bf16.msra.mxu1 %v490_v1 }
   0x8   :  { %455 = vmatprep.subr.bf16.mxu0 %v491_v3  ;;  %479 = vmatprep.subr.bf16.mxu1 %v491_v3 }
   0xb   :  { %456 = vmatpush3.bf16.msra.mxu0 %v491_v3  ;;  %484 = vmatpush3.bf16.msra.mxu1 %v491_v3 }
   0xc   :  { %457 = vmatprep.subr.bf16.mxu0 %v492_v6  ;;  %480 = vmatprep.subr.bf16.mxu1 %v492_v6 }
   0xf   :  { %458 = vmatpush3.bf16.msra.mxu0 %v492_v6  ;;  %485 = vmatpush3.bf16.msra.mxu1 %v492_v6 }
  0x10   :  { %459 = vmatprep.subr.bf16.mxu0 %v493_v7  ;;  %481 = vmatprep.subr.bf16.mxu1 %v493_v7 }
  0x13   :  { %460 = vmatpush3.bf16.msra.mxu0 %v493_v7  ;;  %486 = vmatpush3.bf16.msra.mxu1 %v493_v7 }
  0x16   :  { %462 = vmatmul.mubr.msk.bf16.vlgmr.msra.gmra.mxu0 %vm117_vm1, %v496_v8  ;;  %470 = vmatmul.mubr.msk.bf16.vlgmr.msra.gmra.mxu1 %vm117_vm1, %v497_v9 }
  0x17   :  { %465 = vmatprep.mubr.msk.bf16.mxu0 %vm117_vm1, %v498_v10  ;;  %473 = vmatprep.mubr.msk.bf16.mxu1 %vm117_vm1, %v499_v11 }
  0x1e   :  { %466 = vmatmul.mubr.msk.bf16.gmra.mxu0 %vm117_vm1, %v500_v12  ;;  %474 = vmatmul.mubr.msk.bf16.gmra.mxu1 %vm117_vm1, %v501_v13 }
  0xd6   :  { %v463_v15 = vpop.f32.mrf.mxu0  ;;  %v471_v17 = vpop.f32.mrf.mxu1 }
  0xd7   :  { %v189_v18 = vadd.f32 %v463_v15, %v577_v14  ;;  %v221_v19 = vadd.f32 %v471_v17, %v577_v14 }
  0xd8   :  { %v180_v20 = vpop.f32.mrf.mxu0  ;;  %v212_v21 = vpop.f32.mrf.mxu1 }
  0xd9   :  { %vm245_vm2 = vcmp.ge.f32.partialorder %v189_v18, 0.0  ;;  %v268_v22 = vmul.f32 %v582_v16, %v189_v18  ;;  %vm253_vm3 = vcmp.ge.f32.partialorder %v221_v19, 0.0  ;;  %v276_v23 = vmul.f32 %v582_v16, %v221_v19 }
  0xda   :  { %v181_v24 = vadd.f32 %v577_v14, %v180_v20  ;;  %v213_v25 = vadd.f32 %v577_v14, %v212_v21  ;;  %v464_v26 = vpop.f32.mrf.mxu0  ;;  %v472_v27 = vpop.f32.mrf.mxu1 }
  0xdb   :  { %v284_v28 = vsel %vm245_vm2, %v189_v18, %v268_v22  ;;  %v292_v29 = vsel %vm253_vm3, %v221_v19, %v276_v23  ;;  %v192_v30 = vadd.f32 %v464_v26, %v577_v14  ;;  %v224_v31 = vadd.f32 %v472_v27, %v577_v14 }
  0xdc   :  { %v424_v32 = vpack.c.bf16 %v284_v28, %v284_v28  ;;  %v432_v33 = vpack.c.bf16 %v292_v29, %v292_v29  ;;  %vm243_vm5 = vcmp.ge.f32.partialorder %v181_v24, 0.0  ;;  %v266_v34 = vmul.f32 %v582_v16, %v181_v24  ;;  %v183_v35 = vpop.f32.mrf.mxu0  ;;  %v215_v36 = vpop.f32.mrf.mxu1 }
  0xdd   :  { %vm251_vm6 = vcmp.ge.f32.partialorder %v213_v25, 0.0  ;;  %v274_v37 = vmul.f32 %v582_v16, %v213_v25  ;;  %vm246_vm7 = vcmp.ge.f32.partialorder %v192_v30, 0.0  ;;  %v269_v38 = vmul.f32 %v582_v16, %v192_v30 }
  0xde   :  { %365 = vst.msk [vmem:[%s685_s4 + $0x8] sm:$0xf] %vm362_vm4, %v424_v32  ;;  %373 = vst.msk [vmem:[%s685_s4 + $0x28] sm:$0xf] %vm362_vm4, %v432_v33  ;;  %v282_v39 = vsel %vm243_vm5, %v181_v24, %v266_v34  ;;  %vm254_vm8 = vcmp.ge.f32.partialorder %v224_v31, 0.0  ;;  %v277_v40 = vmul.f32 %v582_v16, %v224_v31  ;;  %v184_v41 = vadd.f32 %v577_v14, %v183_v35  ;;  %v467_v42 = vpop.f32.mrf.mxu0  ;;  %v475_v43 = vpop.f32.mrf.mxu1 }
  0xdf   :  { %v422_v44 = vpack.c.bf16 %v282_v39, %v282_v39  ;;  %v290_v45 = vsel %vm251_vm6, %v213_v25, %v274_v37  ;;  %v285_v46 = vsel %vm246_vm7, %v192_v30, %v269_v38  ;;  %v216_v47 = vadd.f32 %v577_v14, %v215_v36 }
  0xe0   :  { %v430_v48 = vpack.c.bf16 %v290_v45, %v290_v45  ;;  %v425_v49 = vpack.c.bf16 %v285_v46, %v285_v46  ;;  %v293_v50 = vsel %vm254_vm8, %v224_v31, %v277_v40  ;;  %vm244_vm9 = vcmp.ge.f32.partialorder %v184_v41, 0.0  ;;  %v196_v51 = vpop.f32.mrf.mxu0  ;;  %v228_v52 = vpop.f32.mrf.mxu1 }
  0xe1   :  { %363 = vst.msk [vmem:[%s685_s4] sm:$0xf] %vm362_vm4, %v422_v44  ;;  %v433_v53 = vpack.c.bf16 %v293_v50, %v293_v50  ;;  %v267_v54 = vmul.f32 %v582_v16, %v184_v41  ;;  %vm252_vm10 = vcmp.ge.f32.partialorder %v216_v47, 0.0  ;;  %v275_v55 = vmul.f32 %v582_v16, %v216_v47 }
  0xe2   :  { %371 = vst.msk [vmem:[%s685_s4 + $0x20] sm:$0xf] %vm362_vm4, %v430_v48  ;;  %366 = vst.msk [vmem:[%s685_s4 + $0xc] sm:$0xf] %vm362_vm4, %v425_v49  ;;  %v205_v56 = vadd.f32 %v467_v42, %v577_v14  ;;  %v237_v57 = vadd.f32 %v475_v43, %v577_v14  ;;  %v197_v58 = vadd.f32 %v577_v14, %v196_v51  ;;  %v468_v60 = vpop.f32.mrf.mxu0  ;;  %v476_v61 = vpop.f32.mrf.mxu1 }
  0xe3   :  { %v229_v59 = vadd.f32 %v577_v14, %v228_v52  ;;  %374 = vst.msk [vmem:[%s685_s4 + $0x2c] sm:$0xf] %vm362_vm4, %v433_v53  ;;  %v283_v62 = vsel %vm244_vm9, %v184_v41, %v267_v54  ;;  %v291_v63 = vsel %vm252_vm10, %v216_v47, %v275_v55  ;;  %v208_v0 = vadd.f32 %v468_v60, %v577_v14 }
  0xe4   :  { %v240_v1 = vadd.f32 %v476_v61, %v577_v14  ;;  %v423_v2 = vpack.c.bf16 %v283_v62, %v283_v62  ;;  %v431_v3 = vpack.c.bf16 %v291_v63, %v291_v63  ;;  %vm249_vm11 = vcmp.ge.f32.partialorder %v205_v56, 0.0  ;;  %v199_v9 = vpop.f32.mrf.mxu0  ;;  %v231_v15 = vpop.f32.mrf.mxu1 }
  0xe5   :  { %v272_v4 = vmul.f32 %v582_v16, %v205_v56  ;;  %vm257_vm12 = vcmp.ge.f32.partialorder %v237_v57, 0.0  ;;  %v280_v5 = vmul.f32 %v582_v16, %v237_v57  ;;  %vm247_vm13 = vcmp.ge.f32.partialorder %v197_v58, 0.0 }
  0xe6   :  { %v270_v6 = vmul.f32 %v582_v16, %v197_v58  ;;  %364 = vst.msk [vmem:[%s685_s4 + $0x4] sm:$0xf] %vm362_vm4, %v423_v2  ;;  %372 = vst.msk [vmem:[%s685_s4 + $0x24] sm:$0xf] %vm362_vm4, %v431_v3  ;;  %vm255_vm14 = vcmp.ge.f32.partialorder %v229_v59, 0.0  ;;  %v278_v8 = vmul.f32 %v582_v16, %v229_v59  ;;  %vm250_vm15 = vcmp.ge.f32.partialorder %v208_v0, 0.0 }
  0xe7   :  { %v288_v7 = vsel %vm249_vm11, %v205_v56, %v272_v4  ;;  %v296_v11 = vsel %vm257_vm12, %v237_v57, %v280_v5  ;;  %v273_v13 = vmul.f32 %v582_v16, %v208_v0  ;;  %vm258_vm0 = vcmp.ge.f32.partialorder %v240_v1, 0.0 }
  0xe8   :  { %v428_v10 = vpack.c.bf16 %v288_v7, %v288_v7  ;;  %v286_v12 = vsel %vm247_vm13, %v197_v58, %v270_v6  ;;  %v436_v17 = vpack.c.bf16 %v296_v11, %v296_v11  ;;  %v294_v19 = vsel %vm255_vm14, %v229_v59, %v278_v8 }
  0xe9   :  { %v426_v18 = vpack.c.bf16 %v286_v12, %v286_v12  ;;  %v434_v20 = vpack.c.bf16 %v294_v19, %v294_v19  ;;  %v289_v21 = vsel %vm250_vm15, %v208_v0, %v273_v13  ;;  %v281_v22 = vmul.f32 %v582_v16, %v240_v1 }
  0xea   :  { %369 = vst.msk [vmem:[%s685_s4 + $0x18] sm:$0xf] %vm362_vm4, %v428_v10  ;;  %v200_v23 = vadd.f32 %v577_v14, %v199_v9  ;;  %377 = vst.msk [vmem:[%s685_s4 + $0x38] sm:$0xf] %vm362_vm4, %v436_v17  ;;  %v429_v24 = vpack.c.bf16 %v289_v21, %v289_v21  ;;  %v232_v25 = vadd.f32 %v577_v14, %v231_v15 }
  0xeb   :  { %367 = vst.msk [vmem:[%s685_s4 + $0x10] sm:$0xf] %vm362_vm4, %v426_v18  ;;  %375 = vst.msk [vmem:[%s685_s4 + $0x30] sm:$0xf] %vm362_vm4, %v434_v20  ;;  %v297_v26 = vsel %vm258_vm0, %v240_v1, %v281_v22 }
  0xec   :  { %vm248_vm1 = vcmp.ge.f32.partialorder %v200_v23, 0.0  ;;  %v271_v27 = vmul.f32 %v582_v16, %v200_v23  ;;  %370 = vst.msk [vmem:[%s685_s4 + $0x1c] sm:$0xf] %vm362_vm4, %v429_v24  ;;  %v437_v28 = vpack.c.bf16 %v297_v26, %v297_v26  ;;  %vm256_vm2 = vcmp.ge.f32.partialorder %v232_v25, 0.0 }
  0xed   :  { %v279_v29 = vmul.f32 %v582_v16, %v232_v25 }
  0xee   :  { %v287_v30 = vsel %vm248_vm1, %v200_v23, %v271_v27  ;;  %378 = vst.msk [vmem:[%s685_s4 + $0x3c] sm:$0xf] %vm362_vm4, %v437_v28 }
  0xef   :  { %v427_v14 = vpack.c.bf16 %v287_v30, %v287_v30  ;;  %v295_v31 = vsel %vm256_vm2, %v232_v25, %v279_v29 }
  0xf0   :  { %v435_v32 = vpack.c.bf16 %v295_v31, %v295_v31 }
  0xf1   :  { %368 = vst.msk [vmem:[%s685_s4 + $0x14] sm:$0xf] %vm362_vm4, %v427_v14 }
  0xf2   :  { %376 = vst.msk [vmem:[%s685_s4 + $0x34] sm:$0xf] %vm362_vm4, %v435_v32 }

// kernel: ifblock_forward.13
= control target key start
LH: loop header
LB: loop body
LE: loop exit
PB: predicated region body
PF: predicated region fallthrough
CT: control target
= control target key end

     0   :  { %v278_v0 = vmov 0   ;;  %vm119_vm0 = vcmask 130048   ;;  %vm210_vm3 = vcmask 257024   ;;  %s365_s1 = inlined_call_operand.vmem [shape: bf16[144,32], index: 1, kind: input, shape index: {}]   ;;  %s366_s0 = inlined_call_operand.vmem [shape: bf16[32,144], index: 0, kind: input, shape index: {}]   ;;  %s367_s2 = inlined_call_operand.vmem [shape: f32[1,32], index: 2, kind: input, shape index: {}]   ;;  %s368_s3 = inlined_call_operand.vmem [shape: f32[1,32], index: 3, kind: input, shape index: {}]   ;;  %s369_s4 = inlined_call_operand.vmem [shape: bf16[32,32], index: 4, kind: output, shape index: {}]  }
   0x1   :  { %126 = vmatprep.subr.bf16.mxu0 %v278_v0  ;;  %244 = vmatprep.subr.bf16.mxu1 %v278_v0  ;;  %v263_v1 = vld [vmem:[%s365_s1 + $0x38] sm:$0xff]   ;;  %v264_v2 = vld [vmem:[%s365_s1 + $0x30] sm:$0xff]   ;;  %v265_v3 = vld [vmem:[%s365_s1 + $0x28] sm:$0xff]  }
   0x2   :  { %127 = vmatpush1.bf16.msra.mxu0 %v263_v1  ;;  %253 = vmatpush1.bf16.msra.mxu1 %v263_v1  ;;  %v266_v4 = vld [vmem:[%s365_s1 + $0x20] sm:$0xff]   ;;  %v277_v6 = vld [vmem:[%s366_s0 + $0x14] ss:$8 sps:$4 sm:$0xff]   ;;  %v269_v9 = vld [vmem:[%s365_s1 + $0x8] sm:$0xff]  }
   0x3   :  { %128 = vmatprep.subr.bf16.mxu0 %v278_v0  ;;  %245 = vmatprep.subr.bf16.mxu1 %v278_v0  ;;  %v274_v5 = vld [vmem:[%s366_s0 + $0x4] ss:$8 sps:$4 sm:$0xff]   ;;  %v267_v7 = vld [vmem:[%s365_s1 + $0x18] sm:$0xff]   ;;  %v268_v8 = vld [vmem:[%s365_s1 + $0x10] sm:$0xff]  }
   0x4   :  { %233 = vmatprep.mubr.msk.bf16.mxu0 %vm119_vm0, %v274_v5  ;;  %234 = vmatprep.mubr.msk.bf16.mxu1 %vm119_vm0, %v277_v6  ;;  %v270_v10 = vld [vmem:[%s365_s1] sm:$0xff]   ;;  %v275_v13 = vld [vmem:[%s366_s0 + $0x10] ss:$8 sps:$4 sm:$0xff]  }
   0x5   :  { %v271_v11 = vld [vmem:[%s365_s1 + $0x40] sm:$0xff]  }
   0x6   :  { %129 = vmatpush1.bf16.msra.mxu0 %v264_v2  ;;  %254 = vmatpush1.bf16.msra.mxu1 %v264_v2  ;;  %v272_v12 = vld [vmem:[%s366_s0] ss:$8 sps:$4 sm:$0xff]  }
   0x7   :  { %130 = vmatprep.subr.bf16.mxu0 %v278_v0  ;;  %246 = vmatprep.subr.bf16.mxu1 %v278_v0  ;;  %v219_v14 = vld [vmem:[%s367_s2] ss:$0 sm:$0xff] }
   0x8   :  { %v235_v16 = vld [vmem:[%s368_s3] ss:$0 sm:$0xff] }
   0xa   :  { %131 = vmatpush1.bf16.msra.mxu0 %v265_v3  ;;  %255 = vmatpush1.bf16.msra.mxu1 %v265_v3 }
   0xb   :  { %132 = vmatprep.subr.bf16.mxu0 %v278_v0  ;;  %247 = vmatprep.subr.bf16.mxu1 %v278_v0 }
   0xe   :  { %133 = vmatpush1.bf16.msra.mxu0 %v266_v4  ;;  %256 = vmatpush1.bf16.msra.mxu1 %v266_v4 }
   0xf   :  { %134 = vmatprep.subr.bf16.mxu0 %v278_v0  ;;  %248 = vmatprep.subr.bf16.mxu1 %v278_v0 }
  0x12   :  { %135 = vmatpush1.bf16.msra.mxu0 %v267_v7  ;;  %257 = vmatpush1.bf16.msra.mxu1 %v267_v7 }
  0x13   :  { %136 = vmatprep.subr.bf16.mxu0 %v278_v0  ;;  %249 = vmatprep.subr.bf16.mxu1 %v278_v0 }
  0x16   :  { %137 = vmatpush1.bf16.msra.mxu0 %v268_v8  ;;  %258 = vmatpush1.bf16.msra.mxu1 %v268_v8 }
  0x17   :  { %138 = vmatprep.subr.bf16.mxu0 %v278_v0  ;;  %250 = vmatprep.subr.bf16.mxu1 %v278_v0 }
  0x1a   :  { %139 = vmatpush1.bf16.msra.mxu0 %v269_v9  ;;  %259 = vmatpush1.bf16.msra.mxu1 %v269_v9 }
  0x1b   :  { %140 = vmatprep.subr.bf16.mxu0 %v278_v0  ;;  %251 = vmatprep.subr.bf16.mxu1 %v278_v0 }
  0x1e   :  { %141 = vmatpush1.bf16.msra.mxu0 %v270_v10  ;;  %260 = vmatpush1.bf16.msra.mxu1 %v270_v10 }
  0x1f   :  { %156 = vmatprep.subr.bf16.mxu0 %v278_v0  ;;  %252 = vmatprep.subr.bf16.mxu1 %v278_v0 }
  0x22   :  { %157 = vmatpush2.bf16.msra.mxu0 %v271_v11  ;;  %261 = vmatpush2.bf16.msra.mxu1 %v271_v11 }
  0x25   :  { %159 = vmatmul.mubr.bf16.vlgmr.msra.gmra.mxu0 %v272_v12  ;;  %167 = vmatmul.mubr.bf16.vlgmr.msra.gmra.mxu1 %v275_v13 }
  0xe5   :  { %v160_v15 = vpop.f32.mrf.mxu0  ;;  %v168_v17 = vpop.f32.mrf.mxu1 }
  0xe6   :  { %v161_v18 = vadd.f32 %v219_v14, %v160_v15  ;;  %v169_v19 = vadd.f32 %v219_v14, %v168_v17 }
  0xe7   :  { %v162_v20 = vpop.f32.mrf.mxu0  ;;  %v170_v21 = vpop.f32.mrf.mxu1 }
  0xe8   :  { %vm175_vm1 = vcmp.ge.f32.partialorder %v161_v18, 0.0  ;;  %v186_v22 = vmul.f32 %v235_v16, %v161_v18  ;;  %vm177_vm2 = vcmp.ge.f32.partialorder %v169_v19, 0.0  ;;  %v188_v23 = vmul.f32 %v235_v16, %v169_v19 }
  0xe9   :  { %v163_v24 = vpop.f32.mrf.mxu0  ;;  %v171_v25 = vpop.f32.mrf.mxu1 }
  0xea   :  { %v190_v26 = vsel %vm175_vm1, %v161_v18, %v186_v22  ;;  %v192_v27 = vsel %vm177_vm2, %v169_v19, %v188_v23  ;;  %v164_v28 = vadd.f32 %v219_v14, %v163_v24  ;;  %v172_v29 = vadd.f32 %v219_v14, %v171_v25 }
  0xeb   :  { %v240_v30 = vpack.c.bf16 %v190_v26, %v190_v26  ;;  %v242_v31 = vpack.c.bf16 %v192_v27, %v192_v27  ;;  %v165_v32 = vpop.f32.mrf.mxu0  ;;  %v173_v33 = vpop.f32.mrf.mxu1 }
  0xec   :  { %vm176_vm4 = vcmp.ge.f32.partialorder %v164_v28, 0.0  ;;  %v187_v34 = vmul.f32 %v235_v16, %v164_v28  ;;  %vm178_vm5 = vcmp.ge.f32.partialorder %v172_v29, 0.0  ;;  %v189_v35 = vmul.f32 %v235_v16, %v172_v29 }
  0xed   :  { %211 = vst.msk [vmem:[%s369_s4] sm:$0xf] %vm210_vm3, %v240_v30  ;;  %213 = vst.msk [vmem:[%s369_s4 + $0x8] sm:$0xf] %vm210_vm3, %v242_v31 }
  0xee   :  { %v191_v36 = vsel %vm176_vm4, %v164_v28, %v187_v34  ;;  %v193_v37 = vsel %vm178_vm5, %v172_v29, %v189_v35 }
  0xef   :  { %v241_v38 = vpack.c.bf16 %v191_v36, %v191_v36  ;;  %v243_v39 = vpack.c.bf16 %v193_v37, %v193_v37 }
  0xf1   :  { %212 = vst.msk [vmem:[%s369_s4 + $0x4] sm:$0xf] %vm210_vm3, %v241_v38  ;;  %214 = vst.msk [vmem:[%s369_s4 + $0xc] sm:$0xf] %vm210_vm3, %v243_v39 }

// kernel: ifblock_forward.22
= control target key start
LH: loop header
LB: loop body
LE: loop exit
PB: predicated region body
PF: predicated region fallthrough
CT: control target
= control target key end

     0   :  { %s1789_s18 = smov 0   ;;  %s2138_s0 = inlined_call_operand.vmem [shape: bf16[2,48,32], index: 0, kind: input, shape index: {}]   ;;  %s2139_s1 = inlined_call_operand.vmem [shape: bf16[9,32,128], index: 1, kind: input, shape index: {}]   ;;  %s2140_s2 = inlined_call_operand.vmem [shape: f32[1,128], index: 2, kind: input, shape index: {}]   ;;  %s2141_s3 = inlined_call_operand.vmem [shape: f32[1,128], index: 3, kind: input, shape index: {}]   ;;  %s2142_s4 = inlined_call_operand.vmem [shape: f32[34,1], index: 4, kind: input, shape index: {}]   ;;  %s2143_s5 = inlined_call_operand.vmem [shape: bf16[2,48,128], index: 5, kind: output, shape index: {}]  }
   0x1 LB: > { %s1390_s19 = sadd.s32 4294967295, %s1754_s18   ;;  %p1394_p0 = scmp.ge.s32.totalorder %s1754_s18, 1  ;;  %s1754_s18 = sphi %s1789_s18, %s15_s18  }
   0x2   : > { %p187_p1 = scmp.lt.s32.totalorder %s1754_s18, 3 }
   0x4   : > { %p188_p2 = pnand %p1394_p0, %p187_p1 }
   0x5   : > { %p215_p3 = scmp.lt.s32.totalorder (!%p188_p2), %s1390_s19, 1 }
   0x6   : > { %191 = sbr.rel (%p188_p2) target bundleno = 339 (0x153), region = 40 }
   0xb   : > { %v1713_v0 = vld [vmem:[%s2139_s1 + $0x18] sm:$0xff]   ;;  %v1756_v1 = vmov 0.0   ;;  %v1714_v2 = vld [vmem:[%s2139_s1 + $0x10] sm:$0xff]   ;;  %vm1757_vm0 = vmmov 0   ;;  %s2149_s19 = smov (!%p215_p3, %s1390_s19), 1  ;;  %v1758_v3 = vmov 0  }
   0xc   : > { %1695 = vmatprep.subr.bf16.mxu1 %v1756_v1  ;;  %1551 = vmatprep.subr.bf16.mxu0 %v1756_v1  ;;  %s1699_s24 = smul.u32 24, %s2149_s19  ;;  %vm254_vm1 = vsmask.f32 7424  ;;  %vm290_vm2 = vcmask 261120   ;;  %v1717_v18 = vld [vmem:[%s2139_s1 + $0x8] sm:$0xff]   ;;  %v1720_v26 = vld [vmem:[%s2139_s1] sm:$0xff]  }
   0xd   : > { %1697 = vmatpush3.bf16.msra.mxu1 %v1713_v0  ;;  %1552 = vmatpush3.bf16.msra.mxu0 %v1713_v0  ;;  %v1719_v22 = vld [vmem:[%s2139_s1 + $0x28] sm:$0xff]   ;;  %v1721_v27 = vld [vmem:[%s2139_s1 + $0x20] sm:$0xff]   ;;  %vm443_vm3 = vcmask 1046528   ;;  %v1723_v39 = vld [vmem:[%s2139_s1 + $0x38] sm:$0xff]   ;;  %vm658_vm4 = vsmask.f32 4352 }
   0xe   : > { %1696 = vmatprep.subr.bf16.mxu1 %v1756_v1  ;;  %1559 = vmatprep.mubr.msk.bf16.mxu1 %vm1757_vm0, %v1756_v1  ;;  %s1821_s27 = scalar_lea.vmem %s2138_s0, %s1699_s24  ;;  %v1724_v32 = vld [vmem:[%s2139_s1 + $0x48] sm:$0xff]   ;;  %v1726_v34 = vld [vmem:[%s2139_s1 + $0x40] sm:$0xff]   ;;  %v1207_v41 = vld [vmem:[%s2142_s4 + $0x10] sm:$0xff]  ;;  %vm544_vm5 = vcmask 1044480   ;;  %vm870_vm6 = vcmask 1045504   ;;  %s2053_s29 = scalar_lea.vmem %s2143_s5, %s1699_s24  ;;  %vm1319_vm10 = vcmask 1043459  }
   0xf   : > { %1553 = vmatprep.subr.bf16.mxu0 %v1756_v1  ;;  %1555 = vmatprep.mubr.msk.bf16.mxu0 %vm1757_vm0, %v1756_v1  ;;  %v1826_v4 = vld [vmem:[%s1821_s27 + $0x8] sm:$0xff]   ;;  %v1829_v5 = vld [vmem:[%s1821_s27 + $0x10] ss:$0 sps:$4 sm:$0x33]   ;;  %v226_v6 = vld [vmem:[%s1821_s27] sm:$0xf] }
  0x10   : > { %1711 = vset.pattern.permute.xlu0 %v1758_v3  ;;  %1712 = vset.pattern.permute.xlu1 %v1758_v3  ;;  %v1833_v7 = vld [vmem:[%s1821_s27 + $0x4] sm:$0xf]  ;;  %v263_v8 = vshll.u32 %v1826_v4, 16  ;;  %v267_v9 = vshrl.u32 %v1826_v4, 16  ;;  %v271_v10 = vshll.u32 %v1829_v5, 16  ;;  %v275_v24 = vshrl.u32 %v1829_v5, 16 }
  0x11   : > { %1698 = vmatpush3.bf16.msra.mxu1 %v1714_v2  ;;  %1554 = vmatpush3.bf16.msra.mxu0 %v1714_v2  ;;  %v1401_v11 = vcombine.low %v226_v6, %v1833_v7  ;;  %v434_v16 = vld [vmem:[%s1821_s27] sm:$0xe]  ;;  %v445_v29 = vrot.slane %v1826_v4, 1  ;;  %v447_v33 = vrot.slane %v1829_v5, 1  ;;  %v1881_v36 = vld [vmem:[%s1821_s27 + $0x4] sm:$0xf] }
  0x12   : > { %1567 = vmatprep.subr.bf16.mxu1 %v1756_v1  ;;  %1583 = vmatprep.subr.bf16.mxu0 %v1756_v1  ;;  %v265_v12 = vrot.slane %v263_v8, 1  ;;  %v273_v13 = vrot.slane %v271_v10, 1  ;;  %v1419_v23 = vcombine.low %v434_v16, %v1833_v7  ;;  %v632_v35 = vld [vmem:[%s1821_s27] sm:$0x8]  ;;  %v1885_v37 = vld [vmem:[%s1821_s27 + $0x8] sm:$0xf] }
  0x13   : > { %v256_v14 = vshrl.u32 %v1401_v11, 16  ;;  %v258_v15 = vshll.u32 %v1401_v11, 16  ;;  %v1888_v38 = vld [vmem:[%s1821_s27 + $0xc] sm:$0xf]  ;;  %v1205_v40 = vld [vmem:[%s2142_s4] sm:$0xff]  ;;  %v1440_v42 = vcombine.low %v632_v35, %v1881_v36  ;;  %1222 = vperm.xlu1 %1712, %v1207_v41   ;;  %v448_v43 = vsel %vm443_vm3, %v445_v29, %v447_v33  ;;  %v1725_v46 = vld [vmem:[%s2139_s1 + $0x30] sm:$0xff]  }
  0x14   : > { %v269_v17 = vor.u32 %v267_v9, %v265_v12  ;;  %v444_v28 = vrot.slane %v1419_v23, 1  ;;  %v277_v30 = vor.u32 %v275_v24, %v273_v13  ;;  %1212 = vperm.xlu0 %1711, %v1205_v40   ;;  %v1441_v44 = vcombine.low %v1885_v37, %v1888_v38  ;;  %v1206_v45 = vld [vmem:[%s2142_s4 + $0x8] sm:$0xff]  ;;  %v1208_v47 = vld [vmem:[%s2142_s4 + $0x18] sm:$0xff]  ;;  %v636_v52 = vld [vmem:[%s1821_s27 + $0x10] sm:$0xf]  ;;  %1240 = vst [vmem:[%s2053_s29] sm:$0xf] %v1758_v3 }
  0x15   : > { %v260_v19 = vrot.slane %v258_v15, 1  ;;  %v660_v48 = vshrl.u32 %v1440_v42, 16  ;;  %v663_v49 = vshll.u32 %v1440_v42, 16  ;;  %v1922_v53 = vld [vmem:[%s1821_s27 + $0x14] sm:$0x1]  ;;  %v1732_v8 = vld [vmem:[%s2139_s1 + $0x68] sm:$0xff]  }
  0x16   : > { %v274_v20 = vsel %vm254_vm1, %v269_v17, %v273_v13  ;;  %v446_v31 = vsel %vm443_vm3, %v444_v28, %v445_v29  ;;  %v668_v50 = vshrl.u32 %v1441_v44, 16  ;;  %v671_v51 = vshll.u32 %v1441_v44, 16  ;;  %v1209_v54 = vld [vmem:[%s2142_s4 + $0x20] sm:$0x3]  ;;  %v531_v60 = vld [vmem:[%s1821_s27] sm:$0x8] }
  0x17   : > { %v261_v21 = vor.u32 %v260_v19, %v256_v14  ;;  %1560 = vmatmul.mubr.msk.bf16.vlgmr.msra.gmra.mxu1 %vm290_vm2, %v274_v20  ;;  %1227 = vperm.xlu1 %1712, %v1208_v47   ;;  %v662_v55 = vrot.slane %v660_v48, 3  ;;  %v665_v56 = vrot.slane %v663_v49, 4  ;;  %v1442_v59 = vcombine.low %v636_v52, %v1922_v53  ;;  %v1727_v2 = vld [vmem:[%s1821_s27 + $0x10] ss:$0 sps:$4 sm:$0x11]   ;;  %v1737_v13 = vld [vmem:[%s2139_s1 + $0x60] sm:$0xff]  }
  0x18   : > { %1568 = vmatpush3.bf16.msra.mxu1 %v1717_v18  ;;  %1563 = vmatprep.mubr.msk.bf16.mxu1 %vm1757_vm0, %v1756_v1  ;;  %v670_v57 = vrot.slane %v668_v50, 3  ;;  %v673_v58 = vrot.slane %v671_v51, 4  ;;  %v1429_v5 = vcombine.low %v531_v60, %v1833_v7  ;;  %v1735_v15 = vld [vmem:[%s1821_s27 + $0x10] ss:$0 sps:$4 sm:$0xff]   ;;  %v857_v19 = vld [vmem:[%s1821_s27 + $0x4] sm:$0xc]  ;;  %v1454_v42 = vcombine.low %v1922_v53, %v1922_v53 }
  0x19   : > { %v266_v25 = vsel %vm254_vm1, %v261_v21, %v265_v12  ;;  %1569 = vmatprep.subr.bf16.mxu1 %v1756_v1  ;;  %1217 = vperm.xlu0 %1711, %v1206_v45   ;;  %v666_v61 = vor.u32 %v665_v56, %v662_v55  ;;  %v677_v63 = vshrl.u32 %v1442_v59, 16  ;;  %v680_v0 = vshll.u32 %v1442_v59, 16  ;;  %v1736_v18 = vld [vmem:[%s2139_s1 + $0x50] sm:$0xff]   ;;  %v1744_v29 = vld [vmem:[%s2139_s1 + $0x80] sm:$0xff]   ;;  %1241 = vst [vmem:[%s2053_s29 + $0x4] sm:$0xf] %v1758_v3 }
  0x1a   : > { %1556 = vmatmul.mubr.msk.bf16.vlgmr.msra.gmra.mxu0 %vm290_vm2, %v266_v25  ;;  %v674_v62 = vor.u32 %v673_v58, %v670_v57  ;;  %v546_v12 = vrot.slane %v1826_v4, 3  ;;  %v548_v17 = vrot.slane %v1735_v15, 3  ;;  %v1975_v21 = vcombine.low %v1888_v38, %v636_v52  ;;  %v1747_v47 = vld [vmem:[%s1821_s27 + $0x14] ss:$0 sps:$4 sm:$0xff]   ;;  %1242 = vst [vmem:[%s2053_s29 + $0x8] sm:$0xf] %v1758_v3 }
  0x1b   : > { %1584 = vmatpush3.bf16.msra.mxu0 %v1719_v22  ;;  %1587 = vmatprep.mubr.msk.bf16.mxu0 %vm1757_vm0, %v1756_v1  ;;  %v679_v9 = vrot.slane %v677_v63, 3  ;;  %v682_v10 = vrot.slane %v680_v0, 4  ;;  %v1464_v22 = vcombine.low %v857_v19, %v1885_v37  ;;  %v985_v51 = vshrl.u32 %v1747_v47, 16  ;;  %1243 = vst [vmem:[%s2053_s29 + $0xc] sm:$0xf] %v1758_v3 }
  0x1c   : > { %1585 = vmatprep.subr.bf16.mxu0 %v1756_v1  ;;  %1570 = vmatpush3.bf16.msra.mxu1 %v1720_v26  ;;  %v675_v6 = vsel %vm658_vm4, %v666_v61, %v674_v62  ;;  %v549_v20 = vsel %vm544_vm5, %v546_v12, %v548_v17  ;;  %v872_v24 = vrot.slane %v1975_v21, 2  ;;  %v1741_v26 = vld [vmem:[%s2139_s1 + $0x88] sm:$0xff]   ;;  %v979_v40 = vshll.u32 %v1975_v21, 16  ;;  %1244 = vst [vmem:[%s2053_s29 + $0x10] sm:$0xf] %v1758_v3 }
  0x1d   : > { %1599 = vmatprep.subr.bf16.mxu1 %v1756_v1  ;;  %1232 = vperm.xlu0 %1711, %v1209_v54   ;;  %v683_v7 = vor.u32 %v682_v10, %v679_v9  ;;  %v871_v23 = vrot.slane %v1464_v22, 2  ;;  %v972_v38 = vshll.u32 %v1464_v22, 16  ;;  %v988_v52 = vshll.u32 %v1747_v47, 16  ;;  %1245 = vst [vmem:[%s2053_s29 + $0x14] sm:$0xf] %v1758_v3 }
  0x1e   : > { %vm967_vm7 = vsmask.f32 5376  ;;  %v1087_v53 = vrot.slane %v1747_v47, 3  ;;  %v987_v55 = vrot.slane %v985_v51, 2  ;;  %vm1320_vm11 = vsmask.f32 7950 }
  0x1f   : > { %1586 = vmatpush3.bf16.msra.mxu0 %v1721_v27  ;;  %1564 = vmatmul.mubr.msk.bf16.gmra.mxu1 %vm290_vm2, %v277_v30  ;;  %v684_v16 = vsel %vm658_vm4, %v674_v62, %v683_v7  ;;  %v873_v25 = vsel %vm870_vm6, %v871_v23, %v872_v24  ;;  %v1742_v27 = vld [vmem:[%s1821_s27 + $0x14] ss:$0 sps:$4 sm:$0x77]   ;;  %v1452_v30 = vcombine.low %v1881_v36, %v1885_v37  ;;  %v969_v36 = vshrl.u32 %v1464_v22, 16  ;;  %vm2102_vm13 = vmand %vm1319_vm10, %vm1320_vm11 }
  0x20   : > { %1615 = vmatprep.subr.bf16.mxu0 %v1756_v1  ;;  %1571 = vmatprep.mubr.msk.bf16.mxu1 %vm1757_vm0, %v1756_v1  ;;  %v874_v28 = vrot.slane %v1742_v27, 2  ;;  %v974_v44 = vrot.slane %v972_v38, 3  ;;  %v990_v56 = vrot.slane %v988_v52, 3  ;;  %vm1262_vm12 = vsmask.f32 3328 }
  0x21   : > { %vm1263_vm15 = vsmask.f32 7440  ;;  %vm1329_vm3 = vcmask 1040384   ;;  %vm1330_vm4 = vsmask.f32 256 }
  0x22   : > { %1588 = vmatmul.mubr.msk.bf16.vlgmr.msra.gmra.mxu0 %vm290_vm2, %v446_v31  ;;  %v1740_v31 = vld [vmem:[%s2139_s1 + $0x78] sm:$0xff]   ;;  %v991_v58 = vor.u32 %v990_v56, %v987_v55 }
  0x23   : > { %1616 = vmatpush3.bf16.msra.mxu0 %v1724_v32  ;;  %1591 = vmatprep.mubr.msk.bf16.mxu0 %vm1757_vm0, %v1756_v1  ;;  %v875_v32 = vsel %vm870_vm6, %v872_v24, %v874_v28 }
  0x24   : > { %1617 = vmatprep.subr.bf16.mxu0 %v1756_v1 }
  0x27   : > { %1618 = vmatpush3.bf16.msra.mxu0 %v1726_v34  ;;  %1572 = vmatmul.mubr.msk.bf16.vlgmr.msra.gmra.mxu1 %vm290_vm2, %v1401_v11  ;;  %v545_v11 = vrot.slane %v1429_v5, 3  ;;  %v1075_v34 = vld [vmem:[%s1821_s27 + $0x4] sm:$0x8] }
  0x28   : > { %1647 = vmatprep.subr.bf16.mxu0 %v1756_v1  ;;  %1600 = vmatpush3.bf16.msra.mxu1 %v1723_v39  ;;  %v1485_v35 = vcombine.low %v1075_v34, %v1885_v37  ;;  %v976_v39 = vshrl.u32 %v1975_v21, 16  ;;  %v1085_v37 = vrot.slane %v1975_v21, 3 }
  0x29   : > { %1575 = vmatprep.mubr.msk.bf16.mxu1 %vm1757_vm0, %v1756_v1  ;;  %1601 = vmatprep.subr.bf16.mxu1 %v1756_v1  ;;  %v547_v14 = vsel %vm544_vm5, %v545_v11, %v546_v12 }
  0x2a   : > { %1592 = vmatmul.mubr.msk.bf16.gmra.mxu0 %vm290_vm2, %v448_v43  ;;  %v1084_v41 = vrot.slane %v1485_v35, 3  ;;  %v971_v43 = vrot.slane %v969_v36, 2  ;;  %v978_v45 = vrot.slane %v976_v39, 2  ;;  %v1088_v57 = vsel %vm544_vm5, %v1085_v37, %v1087_v53 }
  0x2b   : > { %1595 = vmatprep.mubr.msk.bf16.mxu0 %vm1757_vm0, %v1756_v1 }
  0x2c   : > { %1602 = vmatpush3.bf16.msra.mxu1 %v1725_v46  ;;  %v981_v46 = vrot.slane %v979_v40, 3  ;;  %v1086_v48 = vsel %vm544_vm5, %v1084_v41, %v1085_v37  ;;  %v975_v49 = vor.u32 %v974_v44, %v971_v43  ;;  %vm1331_vm5 = vmand %vm1329_vm3, %vm1330_vm4 }
  0x2d   : > { %1631 = vmatprep.subr.bf16.mxu1 %v1756_v1 }
  0x2e   : > { %v982_v50 = vor.u32 %v981_v46, %v978_v45 }
  0x2f   : > { %1576 = vmatmul.mubr.msk.bf16.gmra.mxu1 %vm290_vm2, %v1826_v4  ;;  %v1731_v4 = vld [vmem:[%s2139_s1 + $0x58] sm:$0xff]  }
  0x30   : > { %1579 = vmatprep.mubr.msk.bf16.mxu1 %vm1757_vm0, %v1756_v1  ;;  %v983_v54 = vsel %vm967_vm7, %v975_v49, %v982_v50  ;;  %v992_v59 = vsel %vm967_vm7, %v982_v50, %v991_v58 }
  0x32   : > { %1596 = vmatmul.mubr.msk.bf16.gmra.mxu0 %vm290_vm2, %v447_v33  ;;  %v1743_v33 = vld [vmem:[%s2139_s1 + $0x70] sm:$0xff]  }
  0x33   : > { %1619 = vmatprep.mubr.msk.bf16.mxu0 %vm1757_vm0, %v1756_v1 }
  0x37   : > { %1580 = vmatmul.mubr.msk.bf16.gmra.mxu1 %vm290_vm2, %v1727_v2 }
  0x38   : > { %1603 = vmatprep.mubr.msk.bf16.mxu1 %vm1757_vm0, %v1756_v1 }
  0x3a   : > { %1620 = vmatmul.mubr.msk.bf16.vlgmr.msra.gmra.mxu0 %vm290_vm2, %v675_v6 }
  0x3b   : > { %1648 = vmatpush3.bf16.msra.mxu0 %v1732_v8  ;;  %1623 = vmatprep.mubr.msk.bf16.mxu0 %vm1757_vm0, %v1756_v1 }
  0x3c   : > { %1649 = vmatprep.subr.bf16.mxu0 %v1756_v1 }
  0x3f   : > { %1650 = vmatpush3.bf16.msra.mxu0 %v1737_v13  ;;  %1604 = vmatmul.mubr.msk.bf16.vlgmr.msra.gmra.mxu1 %vm290_vm2, %v547_v14 }
  0x40   : > { %1679 = vmatprep.subr.bf16.mxu0 %v1756_v1  ;;  %1632 = vmatpush3.bf16.msra.mxu1 %v1731_v4 }
  0x41   : > { %1607 = vmatprep.mubr.msk.bf16.mxu1 %vm1757_vm0, %v1756_v1  ;;  %1633 = vmatprep.subr.bf16.mxu1 %v1756_v1 }
  0x42   : > { %1624 = vmatmul.mubr.msk.bf16.gmra.mxu0 %vm290_vm2, %v684_v16 }
  0x43   : > { %1627 = vmatprep.mubr.msk.bf16.mxu0 %vm1757_vm0, %v1756_v1 }
  0x44   : > { %1634 = vmatpush3.bf16.msra.mxu1 %v1736_v18 }
  0x45   : > { %1663 = vmatprep.subr.bf16.mxu1 %v1756_v1 }
  0x47   : > { %1608 = vmatmul.mubr.msk.bf16.gmra.mxu1 %vm290_vm2, %v549_v20 }
  0x48   : > { %1611 = vmatprep.mubr.msk.bf16.mxu1 %vm1757_vm0, %v1756_v1 }
  0x4a   : > { %1628 = vmatmul.mubr.msk.bf16.gmra.mxu0 %vm290_vm2, %v683_v7 }
  0x4b   : > { %1651 = vmatprep.mubr.msk.bf16.mxu0 %vm1757_vm0, %v1756_v1 }
  0x4f   : > { %1612 = vmatmul.mubr.msk.bf16.gmra.mxu1 %vm290_vm2, %v548_v17 }
  0x50   : > { %1635 = vmatprep.mubr.msk.bf16.mxu1 %vm1757_vm0, %v1756_v1 }
  0x52   : > { %1652 = vmatmul.mubr.msk.bf16.vlgmr.msra.gmra.mxu0 %vm290_vm2, %v873_v25 }
  0x53   : > { %1680 = vmatpush3.bf16.msra.mxu0 %v1741_v26  ;;  %1655 = vmatprep.mubr.msk.bf16.mxu0 %vm1757_vm0, %v1756_v1 }
  0x54   : > { %1681 = vmatprep.subr.bf16.mxu0 %v1756_v1 }
  0x57   : > { %1682 = vmatpush3.bf16.msra.mxu0 %v1744_v29  ;;  %1636 = vmatmul.mubr.msk.bf16.vlgmr.msra.gmra.mxu1 %vm290_vm2, %v1452_v30 }
  0x58   : > { %1664 = vmatpush3.bf16.msra.mxu1 %v1740_v31  ;;  %1639 = vmatprep.mubr.msk.bf16.mxu1 %vm1757_vm0, %v1756_v1 }
  0x59   : > { %1665 = vmatprep.subr.bf16.mxu1 %v1756_v1 }
  0x5a   : > { %1656 = vmatmul.mubr.msk.bf16.gmra.mxu0 %vm290_vm2, %v875_v32 }
  0x5b   : > { %1659 = vmatprep.mubr.msk.bf16.mxu0 %vm1757_vm0, %v1756_v1 }
  0x5c   : > { %1666 = vmatpush3.bf16.msra.mxu1 %v1743_v33 }
  0x5f   : > { %1640 = vmatmul.mubr.msk.bf16.gmra.mxu1 %vm290_vm2, %v1975_v21 }
  0x60   : > { %1643 = vmatprep.mubr.msk.bf16.mxu1 %vm1757_vm0, %v1756_v1 }
  0x62   : > { %1660 = vmatmul.mubr.msk.bf16.gmra.mxu0 %vm290_vm2, %v874_v28 }
  0x63   : > { %1683 = vmatprep.mubr.msk.bf16.mxu0 %vm1757_vm0, %v1756_v1 }
  0x67   : > { %1644 = vmatmul.mubr.msk.bf16.gmra.mxu1 %vm290_vm2, %v1454_v42 }
  0x68   : > { %1667 = vmatprep.mubr.msk.bf16.mxu1 %vm1757_vm0, %v1756_v1 }
  0x6a   : > { %1684 = vmatmul.mubr.msk.bf16.vlgmr.msra.gmra.mxu0 %vm290_vm2, %v1086_v48 }
  0x6b   : > { %1687 = vmatprep.mubr.msk.bf16.mxu0 %vm1757_vm0, %v1756_v1 }
  0x6f   : > { %1668 = vmatmul.mubr.msk.bf16.vlgmr.msra.gmra.mxu1 %vm290_vm2, %v983_v54 }
  0x70   : > { %1671 = vmatprep.mubr.msk.bf16.mxu1 %vm1757_vm0, %v1756_v1 }
  0x72   : > { %1688 = vmatmul.mubr.msk.bf16.gmra.mxu0 %vm290_vm2, %v1088_v57 }
  0x73   : > { %1691 = vmatprep.mubr.msk.bf16.mxu0 %vm1757_vm0, %v1756_v1 }
  0x77   : > { %1672 = vmatmul.mubr.msk.bf16.gmra.mxu1 %vm290_vm2, %v992_v59 }
  0x78   : > { %1675 = vmatprep.mubr.msk.bf16.mxu1 %vm1757_vm0, %v1756_v1  ;;  %vm2114_vm0 = vmor %vm1262_vm12, %vm1263_vm15 }
  0x7a   : > { %1692 = vmatmul.mubr.msk.bf16.gmra.mxu0 %vm290_vm2, %v1087_v53 }
  0x7f   : > { %1676 = vmatmul.mubr.msk.bf16.gmra.mxu1 %vm290_vm2, %v991_v58 }
  0xd7   : > { %v342_v1 = vpop.f32.mrf.mxu1 }
  0xd9   : > { %v1561_v60 = vpop.f32.mrf.mxu1 }
  0xda   : > { %v334_v61 = vpop.f32.mrf.mxu0 }
  0xdb   : > { %v345_v62 = vpop.f32.mrf.mxu1 }
  0xdc   : > { %v1557_v63 = vpop.f32.mrf.mxu0 }
  0xdd   : > { %v1562_v0 = vpop.f32.mrf.mxu1 }
  0xde   : > { %v337_v2 = vpop.f32.mrf.mxu0 }
  0xdf   : > { %v350_v5 = vpop.f32.mrf.mxu1 }
  0xe0   : > { %v1558_v6 = vpop.f32.mrf.mxu0 }
  0xe1   : > { %v1565_v8 = vpop.f32.mrf.mxu1 }
  0xe2   : > { %v504_v9 = vpop.f32.mrf.mxu0 }
  0xe3   : > { %v353_v10 = vpop.f32.mrf.mxu1 }
  0xe4   : > { %v1589_v11 = vpop.f32.mrf.mxu0 }
  0xe5   : > { %v1566_v12 = vpop.f32.mrf.mxu1 }
  0xe6   : > { %v507_v7 = vpop.f32.mrf.mxu0 }
  0xe7   : > { %v412_v13 = vpop.f32.mrf.mxu1 }
  0xe8   : > { %v1590_v14 = vpop.f32.mrf.mxu0  ;;  %v413_v4 = vadd.f32 %v412_v13, %v334_v61 }
  0xe9   : > { %v1573_v15 = vpop.f32.mrf.mxu1 }
  0xea   : > { %v512_v3 = vpop.f32.mrf.mxu0  ;;  %v2067_v16 = vadd.f32 %v504_v9, %v413_v4 }
  0xeb   : > { %v415_v17 = vpop.f32.mrf.mxu1 }
  0xec   : > { %v1593_v18 = vpop.f32.mrf.mxu0  ;;  %v416_v19 = vadd.f32 %v415_v17, %v337_v2 }
  0xed   : > { %v1574_v20 = vpop.f32.mrf.mxu1 }
  0xee   : > { %v515_v21 = vpop.f32.mrf.mxu0  ;;  %v2069_v22 = vadd.f32 %v507_v7, %v416_v19 }
  0xef   : > { %v420_v23 = vpop.f32.mrf.mxu1 }
  0xf0   : > { %v1594_v24 = vpop.f32.mrf.mxu0  ;;  %v421_v25 = vadd.f32 %v420_v23, %v342_v1 }
  0xf1   : > { %v1577_v26 = vpop.f32.mrf.mxu1 }
  0xf2   : > { %v520_v27 = vpop.f32.mrf.mxu0  ;;  %v2071_v28 = vadd.f32 %v512_v3, %v421_v25 }
  0xf3   : > { %v423_v29 = vpop.f32.mrf.mxu1 }
  0xf4   : > { %v1597_v30 = vpop.f32.mrf.mxu0  ;;  %v424_v31 = vadd.f32 %v423_v29, %v345_v62 }
  0xf5   : > { %v1578_v32 = vpop.f32.mrf.mxu1 }
  0xf6   : > { %v523_v33 = vpop.f32.mrf.mxu0  ;;  %v2073_v34 = vadd.f32 %v515_v21, %v424_v31 }
  0xf7   : > { %v428_v35 = vpop.f32.mrf.mxu1 }
  0xf8   : > { %v1598_v36 = vpop.f32.mrf.mxu0  ;;  %v429_v38 = vadd.f32 %v428_v35, %v350_v5 }
  0xf9   : > { %v1581_v39 = vpop.f32.mrf.mxu1 }
  0xfa   : > { %v740_v40 = vpop.f32.mrf.mxu0  ;;  %v2075_v41 = vadd.f32 %v520_v27, %v429_v38 }
  0xfb   : > { %v431_v37 = vpop.f32.mrf.mxu1 }
  0xfc   : > { %v1621_v42 = vpop.f32.mrf.mxu0 }
  0xfd   : > { %v1582_v43 = vpop.f32.mrf.mxu1 }
  0xfe   : > { %v743_v44 = vpop.f32.mrf.mxu0 }
  0xff   : > { %v605_v45 = vpop.f32.mrf.mxu1 }
 0x100   : > { %v1622_v46 = vpop.f32.mrf.mxu0  ;;  %v627_v20 = vadd.f32 %v605_v45, %v2067_v16 }
 0x101   : > { %v1605_v47 = vpop.f32.mrf.mxu1 }
 0x102   : > { %v748_v48 = vpop.f32.mrf.mxu0  ;;  %v762_v27 = vadd.f32 %v740_v40, %v627_v20 }
 0x103   : > { %v608_v49 = vpop.f32.mrf.mxu1 }
 0x104   : > { %v1625_v50 = vpop.f32.mrf.mxu0  ;;  %v628_v26 = vadd.f32 %v608_v49, %v2069_v22  ;;  %v2088_v22 = vld [vmem:[%s2140_s2] ss:$0 sm:$0xff] }
 0x105   : > { %v1606_v51 = vpop.f32.mrf.mxu1 }
 0x106   : > { %v751_v52 = vpop.f32.mrf.mxu0  ;;  %v763_v36 = vadd.f32 %v743_v44, %v628_v26 }
 0x107   : > { %v613_v53 = vpop.f32.mrf.mxu1 }
 0x108   : > { %v1626_v54 = vpop.f32.mrf.mxu0  ;;  %v629_v35 = vadd.f32 %v613_v53, %v2071_v28 }
 0x109   : > { %v1609_v55 = vpop.f32.mrf.mxu1 }
 0x10a   : > { %v2077_v56 = vpop.f32.mrf.mxu0  ;;  %v764_v46 = vadd.f32 %v748_v48, %v629_v35 }
 0x10b   : > { %v616_v57 = vpop.f32.mrf.mxu1 }
 0x10c   : > { %v1629_v58 = vpop.f32.mrf.mxu0  ;;  %v630_v16 = vadd.f32 %v616_v57, %v2073_v34  ;;  %v2093_v34 = vld [vmem:[%s2141_s3] ss:$0 sm:$0xff] }
 0x10d   : > { %v1610_v59 = vpop.f32.mrf.mxu1  ;;  %v1213_v58 = vpop.permute.xlu0 %1212 }
 0x10e   : > { %v759_v1 = vpop.f32.mrf.mxu0  ;;  %v765_v51 = vadd.f32 %v751_v52, %v630_v16 }
 0x10f   : > { %v621_v60 = vpop.f32.mrf.mxu1 }
 0x110   : > { %v1630_v61 = vpop.f32.mrf.mxu0  ;;  %v631_v48 = vadd.f32 %v621_v60, %v2075_v41 }
 0x111   : > { %v1613_v62 = vpop.f32.mrf.mxu1 }
 0x112   : > { %v931_v63 = vpop.f32.mrf.mxu0 }
 0x113   : > { %v624_v0 = vpop.f32.mrf.mxu1 }
 0x114   : > { %v1653_v2 = vpop.f32.mrf.mxu0 }
 0x115   : > { %v1614_v5 = vpop.f32.mrf.mxu1 }
 0x116   : > { %v934_v6 = vpop.f32.mrf.mxu0  ;;  %v766_v5 = vadd.f32 %v2077_v56, %v631_v48 }
 0x117   : > { %v830_v8 = vpop.f32.mrf.mxu1 }
 0x118   : > { %v1654_v9 = vpop.f32.mrf.mxu0  ;;  %v852_v31 = vadd.f32 %v830_v8, %v762_v27  ;;  %v1322_v27 = vld [vmem:[%s2053_s29] sm:$0x8] }
 0x119   : > { %v1637_v10 = vpop.f32.mrf.mxu1 }
 0x11a   : > { %v939_v11 = vpop.f32.mrf.mxu0  ;;  %v953_v42 = vadd.f32 %v931_v63, %v852_v31 }
 0x11b   : > { %v833_v12 = vpop.f32.mrf.mxu1 }
 0x11c   : > { %v1657_v7 = vpop.f32.mrf.mxu0  ;;  %v853_v37 = vadd.f32 %v833_v12, %v763_v36 }
 0x11d   : > { %v1638_v13 = vpop.f32.mrf.mxu1 }
 0x11e   : > { %v942_v14 = vpop.f32.mrf.mxu0  ;;  %v954_v44 = vadd.f32 %v934_v6, %v853_v37 }
 0x11f   : > { %v838_v4 = vpop.f32.mrf.mxu1 }
 0x120   : > { %v1658_v15 = vpop.f32.mrf.mxu0  ;;  %v854_v50 = vadd.f32 %v838_v4, %v764_v46  ;;  %v1218_v4 = vpop.permute.xlu0 %1217 }
 0x121   : > { %v1641_v3 = vpop.f32.mrf.mxu1 }
 0x122   : > { %v2079_v17 = vpop.f32.mrf.mxu0  ;;  %v955_v63 = vadd.f32 %v939_v11, %v854_v50 }
 0x123   : > { %v841_v18 = vpop.f32.mrf.mxu1 }
 0x124   : > { %v1661_v19 = vpop.f32.mrf.mxu0  ;;  %v855_v59 = vadd.f32 %v841_v18, %v765_v51 }
 0x125   : > { %v1642_v21 = vpop.f32.mrf.mxu1 }
 0x126   : > { %v950_v23 = vpop.f32.mrf.mxu0  ;;  %v956_v10 = vadd.f32 %v942_v14, %v855_v59 }
 0x127   : > { %v846_v24 = vpop.f32.mrf.mxu1 }
 0x128   : > { %v1662_v25 = vpop.f32.mrf.mxu0  ;;  %v856_v7 = vadd.f32 %v846_v24, %v766_v5 }
 0x129   : > { %v1645_v29 = vpop.f32.mrf.mxu1 }
 0x12a   : > { %v1144_v30 = vpop.f32.mrf.mxu0 }
 0x12b   : > { %v849_v32 = vpop.f32.mrf.mxu1 }
 0x12c   : > { %v1685_v33 = vpop.f32.mrf.mxu0  ;;  %v957_v32 = vadd.f32 %v2079_v17, %v856_v7 }
 0x12d   : > { %v1646_v38 = vpop.f32.mrf.mxu1 }
 0x12e   : > { %v1147_v39 = vpop.f32.mrf.mxu0 }
 0x12f   : > { %v1048_v43 = vpop.f32.mrf.mxu1 }
 0x130   : > { %v1686_v45 = vpop.f32.mrf.mxu0  ;;  %v1070_v47 = vadd.f32 %v1048_v43, %v953_v42 }
 0x131   : > { %v1669_v40 = vpop.f32.mrf.mxu1 }
 0x132   : > { %v1152_v49 = vpop.f32.mrf.mxu0  ;;  %v1166_v28 = vadd.f32 %v1144_v30, %v1070_v47  ;;  %v1223_v30 = vpop.permute.xlu1 %1222 }
 0x133   : > { %v1051_v53 = vpop.f32.mrf.mxu1 }
 0x134   : > { %v1689_v54 = vpop.f32.mrf.mxu0  ;;  %v1178_v55 = vadd.f32 %v2088_v22, %v1166_v28  ;;  %v1071_v57 = vadd.f32 %v1051_v53, %v954_v44 }
 0x135   : > { %v1670_v1 = vpop.f32.mrf.mxu1 }
 0x136   : > { %v1155_v61 = vpop.f32.mrf.mxu0  ;;  %v1167_v62 = vadd.f32 %v1147_v39, %v1071_v57  ;;  %vm1183_vm8 = vcmp.ge.f32.partialorder %v1178_v55, 0.0  ;;  %v1195_v52 = vmul.f32 %v2093_v34, %v1178_v55  ;;  %v1228_v57 = vpop.permute.xlu1 %1227 }
 0x137   : > { %v1056_v0 = vpop.f32.mrf.mxu1 }
 0x138   : > { %v1690_v2 = vpop.f32.mrf.mxu0  ;;  %v1179_v6 = vadd.f32 %v2088_v22, %v1167_v62  ;;  %v1072_v8 = vadd.f32 %v1056_v0, %v955_v63  ;;  %v1200_v41 = vsel %vm1183_vm8, %v1178_v55, %v1195_v52 }
 0x139   : > { %v1235_v60 = vmul.f32 %v1213_v58, %v1200_v41  ;;  %v1673_v9 = vpop.f32.mrf.mxu1 }
 0x13a   : > { %v1160_v12 = vpop.f32.mrf.mxu0  ;;  %v1168_v13 = vadd.f32 %v1152_v49, %v1072_v8  ;;  %vm1184_vm9 = vcmp.ge.f32.partialorder %v1179_v6, 0.0  ;;  %v1196_v11 = vmul.f32 %v2093_v34, %v1179_v6 }
 0x13b   : > { %v1501_v15 = vpack.c.bf16 %v1235_v60, %v1235_v60  ;;  %v1059_v3 = vpop.f32.mrf.mxu1 }
 0x13c   : > { %v1693_v56 = vpop.f32.mrf.mxu0  ;;  %v1180_v18 = vadd.f32 %v2088_v22, %v1168_v13  ;;  %v1073_v19 = vadd.f32 %v1059_v3, %v956_v10  ;;  %v1201_v20 = vsel %vm1184_vm9, %v1179_v6, %v1196_v11 }
 0x13d   : > { %v1266_v21 = vshll.u32 %v1501_v15, 16  ;;  %v1269_v23 = vshrl.u32 %v1501_v15, 16  ;;  %v1236_v14 = vmul.f32 %v1218_v4, %v1201_v20  ;;  %v1674_v24 = vpop.f32.mrf.mxu1  ;;  %v1332_v15 = vld [vmem:[%s2053_s29 + $0x14] sm:$0x1] }
 0x13e   : > { %v1163_v25 = vpop.f32.mrf.mxu0  ;;  %v1169_v29 = vadd.f32 %v1155_v61, %v1073_v19  ;;  %vm1185_vm14 = vcmp.ge.f32.partialorder %v1180_v18, 0.0  ;;  %v1197_v31 = vmul.f32 %v2093_v34, %v1180_v18 }
 0x13f   : > { %v1268_v33 = vrot.slane %v1266_v21, 5  ;;  %v1271_v35 = vrot.slane %v1269_v23, 4  ;;  %v1502_v36 = vpack.c.bf16 %v1236_v14, %v1236_v14  ;;  %v1064_v38 = vpop.f32.mrf.mxu1 }
 0x140   : > { %v1694_v39 = vpop.f32.mrf.mxu0  ;;  %v1181_v37 = vadd.f32 %v2088_v22, %v1169_v29  ;;  %v1202_v42 = vsel %vm1185_vm14, %v1180_v18, %v1197_v31  ;;  %v1074_v16 = vadd.f32 %v1064_v38, %v957_v32 }
 0x141   : > { %v1272_v43 = vor.u32 %v1271_v35, %v1268_v33  ;;  %v1323_v45 = vsel %vm2102_vm13, %v1268_v33, %v1322_v27  ;;  %v1237_v46 = vmul.f32 %v1223_v30, %v1202_v42  ;;  %v1275_v47 = vshll.u32 %v1502_v36, 16  ;;  %v1677_v40 = vpop.f32.mrf.mxu1 }
 0x142   : > { %1324 = vst [vmem:[%s2053_s29] sm:$0x8] %v1323_v45  ;;  %v1279_v49 = vshrl.u32 %v1502_v36, 16  ;;  %v1170_v50 = vadd.f32 %v1160_v12, %v1074_v16  ;;  %vm1186_vm1 = vcmp.ge.f32.partialorder %v1181_v37, 0.0  ;;  %v1198_v28 = vmul.f32 %v2093_v34, %v1181_v37 }
 0x143   : > { %v1273_v44 = vrot.slane %v1272_v43, 4  ;;  %v1503_v51 = vpack.c.bf16 %v1237_v46, %v1237_v46  ;;  %v1277_v53 = vrot.slane %v1275_v47, 5  ;;  %v1067_v54 = vpop.f32.mrf.mxu1 }
 0x144   : > { %v1281_v48 = vrot.slane %v1279_v49, 4  ;;  %v1182_v55 = vadd.f32 %v2088_v22, %v1170_v50  ;;  %v1203_v58 = vsel %vm1186_vm1, %v1181_v37, %v1198_v28  ;;  %v1233_v22 = vpop.permute.xlu0 %1232 }
 0x145   : > { %v1285_v59 = vshll.u32 %v1503_v51, 16  ;;  %v1289_v1 = vshrl.u32 %v1503_v51, 16  ;;  %v1278_v61 = vsel %vm2114_vm0, %v1273_v44, %v1277_v53  ;;  %v1238_v62 = vmul.f32 %v1228_v57, %v1203_v58  ;;  %v1678_v63 = vpop.f32.mrf.mxu1 }
 0x146   : > { %v1282_v52 = vor.u32 %v1281_v48, %v1277_v53  ;;  %1325 = vst [vmem:[%s2053_s29 + $0x4] sm:$0xf] %v1278_v61  ;;  %vm1187_vm2 = vcmp.ge.f32.partialorder %v1182_v55, 0.0  ;;  %v1199_v0 = vmul.f32 %v2093_v34, %v1182_v55 }
 0x147   : > { %v1287_v2 = vrot.slane %v1285_v59, 5  ;;  %v1291_v5 = vrot.slane %v1289_v1, 4  ;;  %v1504_v6 = vpack.c.bf16 %v1238_v62, %v1238_v62 }
 0x148   : > { %v1283_v8 = vrot.slane %v1282_v52, 4  ;;  %v1204_v41 = vsel %vm1187_vm2, %v1182_v55, %v1199_v0 }
 0x149   : > { %v1292_v60 = vor.u32 %v1291_v5, %v1287_v2  ;;  %v1295_v9 = vshll.u32 %v1504_v6, 16  ;;  %v1299_v10 = vshrl.u32 %v1504_v6, 16  ;;  %v1239_v12 = vmul.f32 %v1233_v22, %v1204_v41 }
 0x14a   : > { %v1288_v7 = vsel %vm2114_vm0, %v1283_v8, %v1287_v2 }
 0x14b   : > { %v1293_v13 = vrot.slane %v1292_v60, 4  ;;  %1326 = vst [vmem:[%s2053_s29 + $0x8] sm:$0xf] %v1288_v7  ;;  %v1297_v34 = vrot.slane %v1295_v9, 5  ;;  %v1301_v4 = vrot.slane %v1299_v10, 4  ;;  %v1505_v11 = vpack.c.bf16 %v1239_v12, %v1239_v12 }
 0x14d   : > { %v1298_v3 = vsel %vm2114_vm0, %v1293_v13, %v1297_v34  ;;  %v1302_v56 = vor.u32 %v1301_v4, %v1297_v34  ;;  %v1305_v18 = vshll.u32 %v1505_v11, 16  ;;  %v1309_v19 = vshrl.u32 %v1505_v11, 16 }
 0x14e   : > { %1327 = vst [vmem:[%s2053_s29 + $0xc] sm:$0xf] %v1298_v3 }
 0x14f   : > { %v1303_v20 = vrot.slane %v1302_v56, 4  ;;  %v1307_v21 = vrot.slane %v1305_v18, 5  ;;  %v1333_v23 = vsel %vm1331_vm5, %v1309_v19, %v1332_v15 }
 0x150   : > { %1334 = vst [vmem:[%s2053_s29 + $0x14] sm:$0x1] %v1333_v23 }
 0x151   : > { %v1308_v14 = vsel %vm2114_vm0, %v1303_v20, %v1307_v21 }
 0x152   : > { %1328 = vst [vmem:[%s2053_s29 + $0x10] sm:$0xf] %v1308_v14 }
 0x153 PF: > { %s15_s18 = sadd.s32 1, %s1754_s18  }
 0x154   : > { %p12_p4 = scmp.ge.s32.totalorder %s15_s18, 4  }
 0x156   :  { %14 = sbr.rel (!%p12_p4) target bundleno = 1 (0x1), region = 78 }

// kernel: ifblock_forward.14
= control target key start
LH: loop header
LB: loop body
LE: loop exit
PB: predicated region body
PF: predicated region fallthrough
CT: control target
= control target key end

     0   :  { %s1790_s18 = smov 0   ;;  %s2149_s0 = inlined_call_operand.vmem [shape: bf16[2,48,32], index: 0, kind: input, shape index: {}]   ;;  %s2150_s1 = inlined_call_operand.vmem [shape: bf16[9,32,32], index: 1, kind: input, shape index: {}]   ;;  %s2151_s2 = inlined_call_operand.vmem [shape: f32[1,32], index: 2, kind: input, shape index: {}]   ;;  %s2152_s3 = inlined_call_operand.vmem [shape: f32[1,32], index: 3, kind: input, shape index: {}]   ;;  %s2153_s4 = inlined_call_operand.vmem [shape: f32[34,1], index: 4, kind: input, shape index: {}]   ;;  %s2154_s5 = inlined_call_operand.vmem [shape: bf16[2,48,32], index: 5, kind: output, shape index: {}]  }
   0x1 LB: > { %s1391_s19 = sadd.s32 4294967295, %s1755_s18   ;;  %p1395_p0 = scmp.ge.s32.totalorder %s1755_s18, 1  ;;  %s1755_s18 = sphi %s1790_s18, %s15_s18  }
   0x2   : > { %p187_p1 = scmp.lt.s32.totalorder %s1755_s18, 3 }
   0x4   : > { %p188_p2 = pnand %p1395_p0, %p187_p1 }
   0x5   : > { %p215_p3 = scmp.lt.s32.totalorder (!%p188_p2), %s1391_s19, 1 }
   0x6   : > { %191 = sbr.rel (%p188_p2) target bundleno = 339 (0x153), region = 40 }
   0xb   : > { %v1714_v0 = vld [vmem:[%s2150_s1 + $0x18] sm:$0xff]   ;;  %v1757_v1 = vmov 0.0   ;;  %v1715_v2 = vld [vmem:[%s2150_s1 + $0x10] sm:$0xff]   ;;  %vm1758_vm0 = vmmov 0   ;;  %s2160_s19 = smov (!%p215_p3, %s1391_s19), 1  ;;  %v1759_v3 = vmov 0  }
   0xc   : > { %1696 = vmatprep.subr.bf16.mxu1 %v1757_v1  ;;  %1552 = vmatprep.subr.bf16.mxu0 %v1757_v1  ;;  %s1700_s24 = smul.u32 24, %s2160_s19  ;;  %vm254_vm1 = vsmask.f32 7424  ;;  %vm290_vm2 = vcmask 261120   ;;  %v1718_v18 = vld [vmem:[%s2150_s1 + $0x8] sm:$0xff]   ;;  %v1721_v26 = vld [vmem:[%s2150_s1] sm:$0xff]  }
   0xd   : > { %1698 = vmatpush3.bf16.msra.mxu1 %v1714_v0  ;;  %1553 = vmatpush3.bf16.msra.mxu0 %v1714_v0  ;;  %v1720_v22 = vld [vmem:[%s2150_s1 + $0x28] sm:$0xff]   ;;  %v1722_v27 = vld [vmem:[%s2150_s1 + $0x20] sm:$0xff]   ;;  %vm443_vm3 = vcmask 1046528   ;;  %v1724_v39 = vld [vmem:[%s2150_s1 + $0x38] sm:$0xff]   ;;  %vm658_vm4 = vsmask.f32 4352 }
   0xe   : > { %1697 = vmatprep.subr.bf16.mxu1 %v1757_v1  ;;  %1560 = vmatprep.mubr.msk.bf16.mxu1 %vm1758_vm0, %v1757_v1  ;;  %s1822_s27 = scalar_lea.vmem %s2149_s0, %s1700_s24  ;;  %v1725_v32 = vld [vmem:[%s2150_s1 + $0x48] sm:$0xff]   ;;  %v1727_v34 = vld [vmem:[%s2150_s1 + $0x40] sm:$0xff]   ;;  %v1207_v41 = vld [vmem:[%s2153_s4 + $0x10] sm:$0xff]  ;;  %vm544_vm5 = vcmask 1044480   ;;  %vm870_vm6 = vcmask 1045504   ;;  %vm1240_vm8 = vcmask 257024   ;;  %s2054_s29 = scalar_lea.vmem %s2154_s5, %s1700_s24 }
   0xf   : > { %1554 = vmatprep.subr.bf16.mxu0 %v1757_v1  ;;  %1556 = vmatprep.mubr.msk.bf16.mxu0 %vm1758_vm0, %v1757_v1  ;;  %v1827_v4 = vld [vmem:[%s1822_s27 + $0x8] sm:$0xff]   ;;  %v1830_v5 = vld [vmem:[%s1822_s27 + $0x10] ss:$0 sps:$4 sm:$0x33]   ;;  %v226_v6 = vld [vmem:[%s1822_s27] sm:$0xf] }
  0x10   : > { %1712 = vset.pattern.permute.xlu0 %v1759_v3  ;;  %1713 = vset.pattern.permute.xlu1 %v1759_v3  ;;  %v1834_v7 = vld [vmem:[%s1822_s27 + $0x4] sm:$0xf]  ;;  %v263_v8 = vshll.u32 %v1827_v4, 16  ;;  %v267_v9 = vshrl.u32 %v1827_v4, 16  ;;  %v271_v10 = vshll.u32 %v1830_v5, 16  ;;  %v275_v24 = vshrl.u32 %v1830_v5, 16 }
  0x11   : > { %1699 = vmatpush3.bf16.msra.mxu1 %v1715_v2  ;;  %1555 = vmatpush3.bf16.msra.mxu0 %v1715_v2  ;;  %v1402_v11 = vcombine.low %v226_v6, %v1834_v7  ;;  %v434_v16 = vld [vmem:[%s1822_s27] sm:$0xe]  ;;  %v445_v29 = vrot.slane %v1827_v4, 1  ;;  %v447_v33 = vrot.slane %v1830_v5, 1  ;;  %v1882_v36 = vld [vmem:[%s1822_s27 + $0x4] sm:$0xf] }
  0x12   : > { %1568 = vmatprep.subr.bf16.mxu1 %v1757_v1  ;;  %1584 = vmatprep.subr.bf16.mxu0 %v1757_v1  ;;  %v265_v12 = vrot.slane %v263_v8, 1  ;;  %v273_v13 = vrot.slane %v271_v10, 1  ;;  %v1420_v23 = vcombine.low %v434_v16, %v1834_v7  ;;  %v632_v35 = vld [vmem:[%s1822_s27] sm:$0x8]  ;;  %v1886_v37 = vld [vmem:[%s1822_s27 + $0x8] sm:$0xf] }
  0x13   : > { %v256_v14 = vshrl.u32 %v1402_v11, 16  ;;  %v258_v15 = vshll.u32 %v1402_v11, 16  ;;  %v1889_v38 = vld [vmem:[%s1822_s27 + $0xc] sm:$0xf]  ;;  %v1205_v40 = vld [vmem:[%s2153_s4] sm:$0xff]  ;;  %v1441_v42 = vcombine.low %v632_v35, %v1882_v36  ;;  %1222 = vperm.xlu1 %1713, %v1207_v41   ;;  %v448_v43 = vsel %vm443_vm3, %v445_v29, %v447_v33  ;;  %v1726_v46 = vld [vmem:[%s2150_s1 + $0x30] sm:$0xff]  }
  0x14   : > { %v269_v17 = vor.u32 %v267_v9, %v265_v12  ;;  %v444_v28 = vrot.slane %v1420_v23, 1  ;;  %v277_v30 = vor.u32 %v275_v24, %v273_v13  ;;  %1212 = vperm.xlu0 %1712, %v1205_v40   ;;  %v1442_v44 = vcombine.low %v1886_v37, %v1889_v38  ;;  %v1206_v45 = vld [vmem:[%s2153_s4 + $0x8] sm:$0xff]  ;;  %v1208_v47 = vld [vmem:[%s2153_s4 + $0x18] sm:$0xff]  ;;  %v636_v52 = vld [vmem:[%s1822_s27 + $0x10] sm:$0xf] }
  0x15   : > { %v260_v19 = vrot.slane %v258_v15, 1  ;;  %v660_v48 = vshrl.u32 %v1441_v42, 16  ;;  %v663_v49 = vshll.u32 %v1441_v42, 16  ;;  %v1923_v53 = vld [vmem:[%s1822_s27 + $0x14] sm:$0x1]  ;;  %v1733_v8 = vld [vmem:[%s2150_s1 + $0x68] sm:$0xff]  }
  0x16   : > { %v274_v20 = vsel %vm254_vm1, %v269_v17, %v273_v13  ;;  %v446_v31 = vsel %vm443_vm3, %v444_v28, %v445_v29  ;;  %v668_v50 = vshrl.u32 %v1442_v44, 16  ;;  %v671_v51 = vshll.u32 %v1442_v44, 16  ;;  %v1209_v54 = vld [vmem:[%s2153_s4 + $0x20] sm:$0x3]  ;;  %v531_v60 = vld [vmem:[%s1822_s27] sm:$0x8] }
  0x17   : > { %v261_v21 = vor.u32 %v260_v19, %v256_v14  ;;  %1561 = vmatmul.mubr.msk.bf16.vlgmr.msra.gmra.mxu1 %vm290_vm2, %v274_v20  ;;  %1227 = vperm.xlu1 %1713, %v1208_v47   ;;  %v662_v55 = vrot.slane %v660_v48, 3  ;;  %v665_v56 = vrot.slane %v663_v49, 4  ;;  %v1443_v59 = vcombine.low %v636_v52, %v1923_v53  ;;  %v1728_v2 = vld [vmem:[%s1822_s27 + $0x10] ss:$0 sps:$4 sm:$0x11]   ;;  %v1738_v13 = vld [vmem:[%s2150_s1 + $0x60] sm:$0xff]  }
  0x18   : > { %1569 = vmatpush3.bf16.msra.mxu1 %v1718_v18  ;;  %1564 = vmatprep.mubr.msk.bf16.mxu1 %vm1758_vm0, %v1757_v1  ;;  %v670_v57 = vrot.slane %v668_v50, 3  ;;  %v673_v58 = vrot.slane %v671_v51, 4  ;;  %v1430_v5 = vcombine.low %v531_v60, %v1834_v7  ;;  %v1736_v15 = vld [vmem:[%s1822_s27 + $0x10] ss:$0 sps:$4 sm:$0xff]   ;;  %v857_v19 = vld [vmem:[%s1822_s27 + $0x4] sm:$0xc]  ;;  %v1455_v42 = vcombine.low %v1923_v53, %v1923_v53 }
  0x19   : > { %v266_v25 = vsel %vm254_vm1, %v261_v21, %v265_v12  ;;  %1570 = vmatprep.subr.bf16.mxu1 %v1757_v1  ;;  %1217 = vperm.xlu0 %1712, %v1206_v45   ;;  %v666_v61 = vor.u32 %v665_v56, %v662_v55  ;;  %v677_v63 = vshrl.u32 %v1443_v59, 16  ;;  %v680_v0 = vshll.u32 %v1443_v59, 16  ;;  %v1737_v18 = vld [vmem:[%s2150_s1 + $0x50] sm:$0xff]   ;;  %v1745_v29 = vld [vmem:[%s2150_s1 + $0x80] sm:$0xff]   ;;  %1241 = vst.msk [vmem:[%s2054_s29] sm:$0xf] %vm1240_vm8, %v1759_v3 }
  0x1a   : > { %1557 = vmatmul.mubr.msk.bf16.vlgmr.msra.gmra.mxu0 %vm290_vm2, %v266_v25  ;;  %v674_v62 = vor.u32 %v673_v58, %v670_v57  ;;  %v546_v12 = vrot.slane %v1827_v4, 3  ;;  %v548_v17 = vrot.slane %v1736_v15, 3  ;;  %v1976_v21 = vcombine.low %v1889_v38, %v636_v52  ;;  %v1748_v47 = vld [vmem:[%s1822_s27 + $0x14] ss:$0 sps:$4 sm:$0xff]   ;;  %1242 = vst.msk [vmem:[%s2054_s29 + $0x4] sm:$0xf] %vm1240_vm8, %v1759_v3 }
  0x1b   : > { %1585 = vmatpush3.bf16.msra.mxu0 %v1720_v22  ;;  %1588 = vmatprep.mubr.msk.bf16.mxu0 %vm1758_vm0, %v1757_v1  ;;  %v679_v9 = vrot.slane %v677_v63, 3  ;;  %v682_v10 = vrot.slane %v680_v0, 4  ;;  %v1465_v22 = vcombine.low %v857_v19, %v1886_v37  ;;  %v985_v51 = vshrl.u32 %v1748_v47, 16  ;;  %1243 = vst.msk [vmem:[%s2054_s29 + $0x8] sm:$0xf] %vm1240_vm8, %v1759_v3 }
  0x1c   : > { %1586 = vmatprep.subr.bf16.mxu0 %v1757_v1  ;;  %1571 = vmatpush3.bf16.msra.mxu1 %v1721_v26  ;;  %v675_v6 = vsel %vm658_vm4, %v666_v61, %v674_v62  ;;  %v549_v20 = vsel %vm544_vm5, %v546_v12, %v548_v17  ;;  %v872_v24 = vrot.slane %v1976_v21, 2  ;;  %v1742_v26 = vld [vmem:[%s2150_s1 + $0x88] sm:$0xff]   ;;  %v979_v40 = vshll.u32 %v1976_v21, 16  ;;  %1244 = vst.msk [vmem:[%s2054_s29 + $0xc] sm:$0xf] %vm1240_vm8, %v1759_v3 }
  0x1d   : > { %1600 = vmatprep.subr.bf16.mxu1 %v1757_v1  ;;  %1232 = vperm.xlu0 %1712, %v1209_v54   ;;  %v683_v7 = vor.u32 %v682_v10, %v679_v9  ;;  %v871_v23 = vrot.slane %v1465_v22, 2  ;;  %v972_v38 = vshll.u32 %v1465_v22, 16  ;;  %v988_v52 = vshll.u32 %v1748_v47, 16  ;;  %1245 = vst.msk [vmem:[%s2054_s29 + $0x10] sm:$0xf] %vm1240_vm8, %v1759_v3 }
  0x1e   : > { %vm967_vm7 = vsmask.f32 5376  ;;  %v1087_v53 = vrot.slane %v1748_v47, 3  ;;  %v987_v55 = vrot.slane %v985_v51, 2  ;;  %1246 = vst.msk [vmem:[%s2054_s29 + $0x14] sm:$0xf] %vm1240_vm8, %v1759_v3 }
  0x1f   : > { %1587 = vmatpush3.bf16.msra.mxu0 %v1722_v27  ;;  %1565 = vmatmul.mubr.msk.bf16.gmra.mxu1 %vm290_vm2, %v277_v30  ;;  %v684_v16 = vsel %vm658_vm4, %v674_v62, %v683_v7  ;;  %v873_v25 = vsel %vm870_vm6, %v871_v23, %v872_v24  ;;  %v1743_v27 = vld [vmem:[%s1822_s27 + $0x14] ss:$0 sps:$4 sm:$0x77]   ;;  %v1453_v30 = vcombine.low %v1882_v36, %v1886_v37  ;;  %v969_v36 = vshrl.u32 %v1465_v22, 16 }
  0x20   : > { %1616 = vmatprep.subr.bf16.mxu0 %v1757_v1  ;;  %1572 = vmatprep.mubr.msk.bf16.mxu1 %vm1758_vm0, %v1757_v1  ;;  %v874_v28 = vrot.slane %v1743_v27, 2  ;;  %v974_v44 = vrot.slane %v972_v38, 3  ;;  %v990_v56 = vrot.slane %v988_v52, 3  ;;  %vm1320_vm11 = vcmask 257027  }
  0x21   : > { %vm1321_vm12 = vsmask.f32 7950  ;;  %vm1263_vm13 = vsmask.f32 3328  ;;  %vm1330_vm4 = vcmask 253952  }
  0x22   : > { %1589 = vmatmul.mubr.msk.bf16.vlgmr.msra.gmra.mxu0 %vm290_vm2, %v446_v31  ;;  %v1741_v31 = vld [vmem:[%s2150_s1 + $0x78] sm:$0xff]   ;;  %v991_v58 = vor.u32 %v990_v56, %v987_v55  ;;  %vm2109_vm14 = vmand %vm1320_vm11, %vm1321_vm12 }
  0x23   : > { %1617 = vmatpush3.bf16.msra.mxu0 %v1725_v32  ;;  %1592 = vmatprep.mubr.msk.bf16.mxu0 %vm1758_vm0, %v1757_v1  ;;  %v875_v32 = vsel %vm870_vm6, %v872_v24, %v874_v28 }
  0x24   : > { %1618 = vmatprep.subr.bf16.mxu0 %v1757_v1 }
  0x27   : > { %1619 = vmatpush3.bf16.msra.mxu0 %v1727_v34  ;;  %1573 = vmatmul.mubr.msk.bf16.vlgmr.msra.gmra.mxu1 %vm290_vm2, %v1402_v11  ;;  %v545_v11 = vrot.slane %v1430_v5, 3  ;;  %v1075_v34 = vld [vmem:[%s1822_s27 + $0x4] sm:$0x8] }
  0x28   : > { %1648 = vmatprep.subr.bf16.mxu0 %v1757_v1  ;;  %1601 = vmatpush3.bf16.msra.mxu1 %v1724_v39  ;;  %v1486_v35 = vcombine.low %v1075_v34, %v1886_v37  ;;  %v976_v39 = vshrl.u32 %v1976_v21, 16  ;;  %v1085_v37 = vrot.slane %v1976_v21, 3 }
  0x29   : > { %1576 = vmatprep.mubr.msk.bf16.mxu1 %vm1758_vm0, %v1757_v1  ;;  %1602 = vmatprep.subr.bf16.mxu1 %v1757_v1  ;;  %v547_v14 = vsel %vm544_vm5, %v545_v11, %v546_v12 }
  0x2a   : > { %1593 = vmatmul.mubr.msk.bf16.gmra.mxu0 %vm290_vm2, %v448_v43  ;;  %v1084_v41 = vrot.slane %v1486_v35, 3  ;;  %v971_v43 = vrot.slane %v969_v36, 2  ;;  %v978_v45 = vrot.slane %v976_v39, 2  ;;  %v1088_v57 = vsel %vm544_vm5, %v1085_v37, %v1087_v53 }
  0x2b   : > { %1596 = vmatprep.mubr.msk.bf16.mxu0 %vm1758_vm0, %v1757_v1 }
  0x2c   : > { %1603 = vmatpush3.bf16.msra.mxu1 %v1726_v46  ;;  %v981_v46 = vrot.slane %v979_v40, 3  ;;  %v1086_v48 = vsel %vm544_vm5, %v1084_v41, %v1085_v37  ;;  %v975_v49 = vor.u32 %v974_v44, %v971_v43  ;;  %vm1331_vm5 = vsmask.f32 256 }
  0x2d   : > { %1632 = vmatprep.subr.bf16.mxu1 %v1757_v1  ;;  %vm1332_vm6 = vmand %vm1330_vm4, %vm1331_vm5 }
  0x2e   : > { %v982_v50 = vor.u32 %v981_v46, %v978_v45 }
  0x2f   : > { %1577 = vmatmul.mubr.msk.bf16.gmra.mxu1 %vm290_vm2, %v1827_v4  ;;  %v1732_v4 = vld [vmem:[%s2150_s1 + $0x58] sm:$0xff]  }
  0x30   : > { %1580 = vmatprep.mubr.msk.bf16.mxu1 %vm1758_vm0, %v1757_v1  ;;  %v983_v54 = vsel %vm967_vm7, %v975_v49, %v982_v50  ;;  %v992_v59 = vsel %vm967_vm7, %v982_v50, %v991_v58 }
  0x32   : > { %1597 = vmatmul.mubr.msk.bf16.gmra.mxu0 %vm290_vm2, %v447_v33  ;;  %v1744_v33 = vld [vmem:[%s2150_s1 + $0x70] sm:$0xff]  }
  0x33   : > { %1620 = vmatprep.mubr.msk.bf16.mxu0 %vm1758_vm0, %v1757_v1 }
  0x37   : > { %1581 = vmatmul.mubr.msk.bf16.gmra.mxu1 %vm290_vm2, %v1728_v2 }
  0x38   : > { %1604 = vmatprep.mubr.msk.bf16.mxu1 %vm1758_vm0, %v1757_v1 }
  0x3a   : > { %1621 = vmatmul.mubr.msk.bf16.vlgmr.msra.gmra.mxu0 %vm290_vm2, %v675_v6 }
  0x3b   : > { %1649 = vmatpush3.bf16.msra.mxu0 %v1733_v8  ;;  %1624 = vmatprep.mubr.msk.bf16.mxu0 %vm1758_vm0, %v1757_v1 }
  0x3c   : > { %1650 = vmatprep.subr.bf16.mxu0 %v1757_v1 }
  0x3f   : > { %1651 = vmatpush3.bf16.msra.mxu0 %v1738_v13  ;;  %1605 = vmatmul.mubr.msk.bf16.vlgmr.msra.gmra.mxu1 %vm290_vm2, %v547_v14 }
  0x40   : > { %1680 = vmatprep.subr.bf16.mxu0 %v1757_v1  ;;  %1633 = vmatpush3.bf16.msra.mxu1 %v1732_v4 }
  0x41   : > { %1608 = vmatprep.mubr.msk.bf16.mxu1 %vm1758_vm0, %v1757_v1  ;;  %1634 = vmatprep.subr.bf16.mxu1 %v1757_v1 }
  0x42   : > { %1625 = vmatmul.mubr.msk.bf16.gmra.mxu0 %vm290_vm2, %v684_v16 }
  0x43   : > { %1628 = vmatprep.mubr.msk.bf16.mxu0 %vm1758_vm0, %v1757_v1 }
  0x44   : > { %1635 = vmatpush3.bf16.msra.mxu1 %v1737_v18 }
  0x45   : > { %1664 = vmatprep.subr.bf16.mxu1 %v1757_v1 }
  0x47   : > { %1609 = vmatmul.mubr.msk.bf16.gmra.mxu1 %vm290_vm2, %v549_v20 }
  0x48   : > { %1612 = vmatprep.mubr.msk.bf16.mxu1 %vm1758_vm0, %v1757_v1 }
  0x4a   : > { %1629 = vmatmul.mubr.msk.bf16.gmra.mxu0 %vm290_vm2, %v683_v7 }
  0x4b   : > { %1652 = vmatprep.mubr.msk.bf16.mxu0 %vm1758_vm0, %v1757_v1 }
  0x4f   : > { %1613 = vmatmul.mubr.msk.bf16.gmra.mxu1 %vm290_vm2, %v548_v17 }
  0x50   : > { %1636 = vmatprep.mubr.msk.bf16.mxu1 %vm1758_vm0, %v1757_v1 }
  0x52   : > { %1653 = vmatmul.mubr.msk.bf16.vlgmr.msra.gmra.mxu0 %vm290_vm2, %v873_v25 }
  0x53   : > { %1681 = vmatpush3.bf16.msra.mxu0 %v1742_v26  ;;  %1656 = vmatprep.mubr.msk.bf16.mxu0 %vm1758_vm0, %v1757_v1 }
  0x54   : > { %1682 = vmatprep.subr.bf16.mxu0 %v1757_v1 }
  0x57   : > { %1683 = vmatpush3.bf16.msra.mxu0 %v1745_v29  ;;  %1637 = vmatmul.mubr.msk.bf16.vlgmr.msra.gmra.mxu1 %vm290_vm2, %v1453_v30 }
  0x58   : > { %1665 = vmatpush3.bf16.msra.mxu1 %v1741_v31  ;;  %1640 = vmatprep.mubr.msk.bf16.mxu1 %vm1758_vm0, %v1757_v1 }
  0x59   : > { %1666 = vmatprep.subr.bf16.mxu1 %v1757_v1 }
  0x5a   : > { %1657 = vmatmul.mubr.msk.bf16.gmra.mxu0 %vm290_vm2, %v875_v32 }
  0x5b   : > { %1660 = vmatprep.mubr.msk.bf16.mxu0 %vm1758_vm0, %v1757_v1 }
  0x5c   : > { %1667 = vmatpush3.bf16.msra.mxu1 %v1744_v33 }
  0x5f   : > { %1641 = vmatmul.mubr.msk.bf16.gmra.mxu1 %vm290_vm2, %v1976_v21 }
  0x60   : > { %1644 = vmatprep.mubr.msk.bf16.mxu1 %vm1758_vm0, %v1757_v1 }
  0x62   : > { %1661 = vmatmul.mubr.msk.bf16.gmra.mxu0 %vm290_vm2, %v874_v28 }
  0x63   : > { %1684 = vmatprep.mubr.msk.bf16.mxu0 %vm1758_vm0, %v1757_v1 }
  0x67   : > { %1645 = vmatmul.mubr.msk.bf16.gmra.mxu1 %vm290_vm2, %v1455_v42 }
  0x68   : > { %1668 = vmatprep.mubr.msk.bf16.mxu1 %vm1758_vm0, %v1757_v1 }
  0x6a   : > { %1685 = vmatmul.mubr.msk.bf16.vlgmr.msra.gmra.mxu0 %vm290_vm2, %v1086_v48 }
  0x6b   : > { %1688 = vmatprep.mubr.msk.bf16.mxu0 %vm1758_vm0, %v1757_v1 }
  0x6f   : > { %1669 = vmatmul.mubr.msk.bf16.vlgmr.msra.gmra.mxu1 %vm290_vm2, %v983_v54 }
  0x70   : > { %1672 = vmatprep.mubr.msk.bf16.mxu1 %vm1758_vm0, %v1757_v1 }
  0x72   : > { %1689 = vmatmul.mubr.msk.bf16.gmra.mxu0 %vm290_vm2, %v1088_v57 }
  0x73   : > { %1692 = vmatprep.mubr.msk.bf16.mxu0 %vm1758_vm0, %v1757_v1 }
  0x77   : > { %1673 = vmatmul.mubr.msk.bf16.gmra.mxu1 %vm290_vm2, %v992_v59 }
  0x78   : > { %1676 = vmatprep.mubr.msk.bf16.mxu1 %vm1758_vm0, %v1757_v1  ;;  %vm1264_vm0 = vsmask.f32 7440 }
  0x79   : > { %vm2121_vm1 = vmor %vm1263_vm13, %vm1264_vm0 }
  0x7a   : > { %1693 = vmatmul.mubr.msk.bf16.gmra.mxu0 %vm290_vm2, %v1087_v53 }
  0x7f   : > { %1677 = vmatmul.mubr.msk.bf16.gmra.mxu1 %vm290_vm2, %v991_v58 }
  0xd7   : > { %v342_v1 = vpop.f32.mrf.mxu1 }
  0xd9   : > { %v1562_v60 = vpop.f32.mrf.mxu1 }
  0xda   : > { %v334_v61 = vpop.f32.mrf.mxu0 }
  0xdb   : > { %v345_v62 = vpop.f32.mrf.mxu1 }
  0xdc   : > { %v1558_v63 = vpop.f32.mrf.mxu0 }
  0xdd   : > { %v1563_v0 = vpop.f32.mrf.mxu1 }
  0xde   : > { %v337_v2 = vpop.f32.mrf.mxu0 }
  0xdf   : > { %v350_v5 = vpop.f32.mrf.mxu1 }
  0xe0   : > { %v1559_v6 = vpop.f32.mrf.mxu0 }
  0xe1   : > { %v1566_v8 = vpop.f32.mrf.mxu1 }
  0xe2   : > { %v504_v9 = vpop.f32.mrf.mxu0 }
  0xe3   : > { %v353_v10 = vpop.f32.mrf.mxu1 }
  0xe4   : > { %v1590_v11 = vpop.f32.mrf.mxu0 }
  0xe5   : > { %v1567_v12 = vpop.f32.mrf.mxu1 }
  0xe6   : > { %v507_v7 = vpop.f32.mrf.mxu0 }
  0xe7   : > { %v412_v13 = vpop.f32.mrf.mxu1 }
  0xe8   : > { %v1591_v14 = vpop.f32.mrf.mxu0  ;;  %v413_v4 = vadd.f32 %v412_v13, %v334_v61 }
  0xe9   : > { %v1574_v15 = vpop.f32.mrf.mxu1 }
  0xea   : > { %v512_v3 = vpop.f32.mrf.mxu0  ;;  %v2074_v16 = vadd.f32 %v504_v9, %v413_v4 }
  0xeb   : > { %v415_v17 = vpop.f32.mrf.mxu1 }
  0xec   : > { %v1594_v18 = vpop.f32.mrf.mxu0  ;;  %v416_v19 = vadd.f32 %v415_v17, %v337_v2 }
  0xed   : > { %v1575_v20 = vpop.f32.mrf.mxu1 }
  0xee   : > { %v515_v21 = vpop.f32.mrf.mxu0  ;;  %v2076_v22 = vadd.f32 %v507_v7, %v416_v19 }
  0xef   : > { %v420_v23 = vpop.f32.mrf.mxu1 }
  0xf0   : > { %v1595_v24 = vpop.f32.mrf.mxu0  ;;  %v421_v25 = vadd.f32 %v420_v23, %v342_v1 }
  0xf1   : > { %v1578_v26 = vpop.f32.mrf.mxu1 }
  0xf2   : > { %v520_v27 = vpop.f32.mrf.mxu0  ;;  %v2078_v28 = vadd.f32 %v512_v3, %v421_v25 }
  0xf3   : > { %v423_v29 = vpop.f32.mrf.mxu1 }
  0xf4   : > { %v1598_v30 = vpop.f32.mrf.mxu0  ;;  %v424_v31 = vadd.f32 %v423_v29, %v345_v62 }
  0xf5   : > { %v1579_v32 = vpop.f32.mrf.mxu1 }
  0xf6   : > { %v523_v33 = vpop.f32.mrf.mxu0  ;;  %v2080_v34 = vadd.f32 %v515_v21, %v424_v31 }
  0xf7   : > { %v428_v35 = vpop.f32.mrf.mxu1 }
  0xf8   : > { %v1599_v36 = vpop.f32.mrf.mxu0  ;;  %v429_v38 = vadd.f32 %v428_v35, %v350_v5 }
  0xf9   : > { %v1582_v39 = vpop.f32.mrf.mxu1 }
  0xfa   : > { %v740_v40 = vpop.f32.mrf.mxu0  ;;  %v2082_v41 = vadd.f32 %v520_v27, %v429_v38 }
  0xfb   : > { %v431_v37 = vpop.f32.mrf.mxu1 }
  0xfc   : > { %v1622_v42 = vpop.f32.mrf.mxu0 }
  0xfd   : > { %v1583_v43 = vpop.f32.mrf.mxu1 }
  0xfe   : > { %v743_v44 = vpop.f32.mrf.mxu0 }
  0xff   : > { %v605_v45 = vpop.f32.mrf.mxu1 }
 0x100   : > { %v1623_v46 = vpop.f32.mrf.mxu0  ;;  %v627_v20 = vadd.f32 %v605_v45, %v2074_v16 }
 0x101   : > { %v1606_v47 = vpop.f32.mrf.mxu1 }
 0x102   : > { %v748_v48 = vpop.f32.mrf.mxu0  ;;  %v762_v27 = vadd.f32 %v740_v40, %v627_v20 }
 0x103   : > { %v608_v49 = vpop.f32.mrf.mxu1 }
 0x104   : > { %v1626_v50 = vpop.f32.mrf.mxu0  ;;  %v628_v26 = vadd.f32 %v608_v49, %v2076_v22  ;;  %v2095_v22 = vld [vmem:[%s2151_s2] ss:$0 sm:$0xff] }
 0x105   : > { %v1607_v51 = vpop.f32.mrf.mxu1 }
 0x106   : > { %v751_v52 = vpop.f32.mrf.mxu0  ;;  %v763_v36 = vadd.f32 %v743_v44, %v628_v26 }
 0x107   : > { %v613_v53 = vpop.f32.mrf.mxu1 }
 0x108   : > { %v1627_v54 = vpop.f32.mrf.mxu0  ;;  %v629_v35 = vadd.f32 %v613_v53, %v2078_v28 }
 0x109   : > { %v1610_v55 = vpop.f32.mrf.mxu1 }
 0x10a   : > { %v2084_v56 = vpop.f32.mrf.mxu0  ;;  %v764_v46 = vadd.f32 %v748_v48, %v629_v35 }
 0x10b   : > { %v616_v57 = vpop.f32.mrf.mxu1 }
 0x10c   : > { %v1630_v58 = vpop.f32.mrf.mxu0  ;;  %v630_v16 = vadd.f32 %v616_v57, %v2080_v34  ;;  %v2100_v34 = vld [vmem:[%s2152_s3] ss:$0 sm:$0xff] }
 0x10d   : > { %v1611_v59 = vpop.f32.mrf.mxu1  ;;  %v1213_v58 = vpop.permute.xlu0 %1212 }
 0x10e   : > { %v759_v1 = vpop.f32.mrf.mxu0  ;;  %v765_v51 = vadd.f32 %v751_v52, %v630_v16 }
 0x10f   : > { %v621_v60 = vpop.f32.mrf.mxu1 }
 0x110   : > { %v1631_v61 = vpop.f32.mrf.mxu0  ;;  %v631_v48 = vadd.f32 %v621_v60, %v2082_v41 }
 0x111   : > { %v1614_v62 = vpop.f32.mrf.mxu1 }
 0x112   : > { %v931_v63 = vpop.f32.mrf.mxu0 }
 0x113   : > { %v624_v0 = vpop.f32.mrf.mxu1 }
 0x114   : > { %v1654_v2 = vpop.f32.mrf.mxu0 }
 0x115   : > { %v1615_v5 = vpop.f32.mrf.mxu1 }
 0x116   : > { %v934_v6 = vpop.f32.mrf.mxu0  ;;  %v766_v5 = vadd.f32 %v2084_v56, %v631_v48 }
 0x117   : > { %v830_v8 = vpop.f32.mrf.mxu1 }
 0x118   : > { %v1655_v9 = vpop.f32.mrf.mxu0  ;;  %v852_v31 = vadd.f32 %v830_v8, %v762_v27  ;;  %v1323_v27 = vld [vmem:[%s2054_s29] sm:$0x8] }
 0x119   : > { %v1638_v10 = vpop.f32.mrf.mxu1 }
 0x11a   : > { %v939_v11 = vpop.f32.mrf.mxu0  ;;  %v953_v42 = vadd.f32 %v931_v63, %v852_v31 }
 0x11b   : > { %v833_v12 = vpop.f32.mrf.mxu1 }
 0x11c   : > { %v1658_v7 = vpop.f32.mrf.mxu0  ;;  %v853_v37 = vadd.f32 %v833_v12, %v763_v36 }
 0x11d   : > { %v1639_v13 = vpop.f32.mrf.mxu1 }
 0x11e   : > { %v942_v14 = vpop.f32.mrf.mxu0  ;;  %v954_v44 = vadd.f32 %v934_v6, %v853_v37 }
 0x11f   : > { %v838_v4 = vpop.f32.mrf.mxu1 }
 0x120   : > { %v1659_v15 = vpop.f32.mrf.mxu0  ;;  %v854_v50 = vadd.f32 %v838_v4, %v764_v46  ;;  %v1218_v4 = vpop.permute.xlu0 %1217 }
 0x121   : > { %v1642_v3 = vpop.f32.mrf.mxu1 }
 0x122   : > { %v2086_v17 = vpop.f32.mrf.mxu0  ;;  %v955_v63 = vadd.f32 %v939_v11, %v854_v50 }
 0x123   : > { %v841_v18 = vpop.f32.mrf.mxu1 }
 0x124   : > { %v1662_v19 = vpop.f32.mrf.mxu0  ;;  %v855_v59 = vadd.f32 %v841_v18, %v765_v51 }
 0x125   : > { %v1643_v21 = vpop.f32.mrf.mxu1 }
 0x126   : > { %v950_v23 = vpop.f32.mrf.mxu0  ;;  %v956_v10 = vadd.f32 %v942_v14, %v855_v59 }
 0x127   : > { %v846_v24 = vpop.f32.mrf.mxu1 }
 0x128   : > { %v1663_v25 = vpop.f32.mrf.mxu0  ;;  %v856_v7 = vadd.f32 %v846_v24, %v766_v5 }
 0x129   : > { %v1646_v29 = vpop.f32.mrf.mxu1 }
 0x12a   : > { %v1144_v30 = vpop.f32.mrf.mxu0 }
 0x12b   : > { %v849_v32 = vpop.f32.mrf.mxu1 }
 0x12c   : > { %v1686_v33 = vpop.f32.mrf.mxu0  ;;  %v957_v32 = vadd.f32 %v2086_v17, %v856_v7 }
 0x12d   : > { %v1647_v38 = vpop.f32.mrf.mxu1 }
 0x12e   : > { %v1147_v39 = vpop.f32.mrf.mxu0 }
 0x12f   : > { %v1048_v43 = vpop.f32.mrf.mxu1 }
 0x130   : > { %v1687_v45 = vpop.f32.mrf.mxu0  ;;  %v1070_v47 = vadd.f32 %v1048_v43, %v953_v42 }
 0x131   : > { %v1670_v40 = vpop.f32.mrf.mxu1 }
 0x132   : > { %v1152_v49 = vpop.f32.mrf.mxu0  ;;  %v1166_v28 = vadd.f32 %v1144_v30, %v1070_v47  ;;  %v1223_v30 = vpop.permute.xlu1 %1222 }
 0x133   : > { %v1051_v53 = vpop.f32.mrf.mxu1 }
 0x134   : > { %v1690_v54 = vpop.f32.mrf.mxu0  ;;  %v1178_v55 = vadd.f32 %v2095_v22, %v1166_v28  ;;  %v1071_v57 = vadd.f32 %v1051_v53, %v954_v44 }
 0x135   : > { %v1671_v1 = vpop.f32.mrf.mxu1 }
 0x136   : > { %v1155_v61 = vpop.f32.mrf.mxu0  ;;  %v1167_v62 = vadd.f32 %v1147_v39, %v1071_v57  ;;  %vm1183_vm9 = vcmp.ge.f32.partialorder %v1178_v55, 0.0  ;;  %v1195_v52 = vmul.f32 %v2100_v34, %v1178_v55  ;;  %v1228_v57 = vpop.permute.xlu1 %1227 }
 0x137   : > { %v1056_v0 = vpop.f32.mrf.mxu1 }
 0x138   : > { %v1691_v2 = vpop.f32.mrf.mxu0  ;;  %v1179_v6 = vadd.f32 %v2095_v22, %v1167_v62  ;;  %v1072_v8 = vadd.f32 %v1056_v0, %v955_v63  ;;  %v1200_v41 = vsel %vm1183_vm9, %v1178_v55, %v1195_v52 }
 0x139   : > { %v1235_v60 = vmul.f32 %v1213_v58, %v1200_v41  ;;  %v1674_v9 = vpop.f32.mrf.mxu1 }
 0x13a   : > { %v1160_v12 = vpop.f32.mrf.mxu0  ;;  %v1168_v13 = vadd.f32 %v1152_v49, %v1072_v8  ;;  %vm1184_vm10 = vcmp.ge.f32.partialorder %v1179_v6, 0.0  ;;  %v1196_v11 = vmul.f32 %v2100_v34, %v1179_v6  ;;  %v1233_v8 = vpop.permute.xlu0 %1232 }
 0x13b   : > { %v1502_v15 = vpack.c.bf16 %v1235_v60, %v1235_v60  ;;  %v1059_v3 = vpop.f32.mrf.mxu1 }
 0x13c   : > { %v1694_v56 = vpop.f32.mrf.mxu0  ;;  %v1180_v18 = vadd.f32 %v2095_v22, %v1168_v13  ;;  %v1073_v19 = vadd.f32 %v1059_v3, %v956_v10  ;;  %v1201_v20 = vsel %vm1184_vm10, %v1179_v6, %v1196_v11 }
 0x13d   : > { %v1267_v21 = vshll.u32 %v1502_v15, 16  ;;  %v1270_v23 = vshrl.u32 %v1502_v15, 16  ;;  %v1236_v14 = vmul.f32 %v1218_v4, %v1201_v20  ;;  %v1675_v24 = vpop.f32.mrf.mxu1  ;;  %v1333_v15 = vld [vmem:[%s2054_s29 + $0x14] sm:$0x1] }
 0x13e   : > { %v1163_v25 = vpop.f32.mrf.mxu0  ;;  %v1169_v29 = vadd.f32 %v1155_v61, %v1073_v19  ;;  %vm1185_vm15 = vcmp.ge.f32.partialorder %v1180_v18, 0.0  ;;  %v1197_v31 = vmul.f32 %v2100_v34, %v1180_v18 }
 0x13f   : > { %v1269_v33 = vrot.slane %v1267_v21, 5  ;;  %v1272_v35 = vrot.slane %v1270_v23, 4  ;;  %v1503_v36 = vpack.c.bf16 %v1236_v14, %v1236_v14  ;;  %v1064_v38 = vpop.f32.mrf.mxu1 }
 0x140   : > { %v1695_v39 = vpop.f32.mrf.mxu0  ;;  %v1181_v37 = vadd.f32 %v2095_v22, %v1169_v29  ;;  %v1202_v42 = vsel %vm1185_vm15, %v1180_v18, %v1197_v31  ;;  %v1074_v16 = vadd.f32 %v1064_v38, %v957_v32 }
 0x141   : > { %v1273_v43 = vor.u32 %v1272_v35, %v1269_v33  ;;  %v1324_v45 = vsel %vm2109_vm14, %v1269_v33, %v1323_v27  ;;  %v1237_v46 = vmul.f32 %v1223_v30, %v1202_v42  ;;  %v1276_v47 = vshll.u32 %v1503_v36, 16  ;;  %v1678_v40 = vpop.f32.mrf.mxu1 }
 0x142   : > { %1325 = vst [vmem:[%s2054_s29] sm:$0x8] %v1324_v45  ;;  %v1280_v49 = vshrl.u32 %v1503_v36, 16  ;;  %v1170_v50 = vadd.f32 %v1160_v12, %v1074_v16  ;;  %vm1186_vm2 = vcmp.ge.f32.partialorder %v1181_v37, 0.0  ;;  %v1198_v28 = vmul.f32 %v2100_v34, %v1181_v37 }
 0x143   : > { %v1274_v44 = vrot.slane %v1273_v43, 4  ;;  %v1504_v51 = vpack.c.bf16 %v1237_v46, %v1237_v46  ;;  %v1278_v53 = vrot.slane %v1276_v47, 5  ;;  %v1067_v54 = vpop.f32.mrf.mxu1 }
 0x144   : > { %v1282_v48 = vrot.slane %v1280_v49, 4  ;;  %v1182_v55 = vadd.f32 %v2095_v22, %v1170_v50  ;;  %v1203_v58 = vsel %vm1186_vm2, %v1181_v37, %v1198_v28 }
 0x145   : > { %v1286_v59 = vshll.u32 %v1504_v51, 16  ;;  %v1290_v1 = vshrl.u32 %v1504_v51, 16  ;;  %v1279_v61 = vsel %vm2121_vm1, %v1274_v44, %v1278_v53  ;;  %v1238_v62 = vmul.f32 %v1228_v57, %v1203_v58  ;;  %v1679_v63 = vpop.f32.mrf.mxu1 }
 0x146   : > { %v1283_v52 = vor.u32 %v1282_v48, %v1278_v53  ;;  %1326 = vst.msk [vmem:[%s2054_s29 + $0x4] sm:$0xf] %vm1240_vm8, %v1279_v61  ;;  %vm1187_vm3 = vcmp.ge.f32.partialorder %v1182_v55, 0.0  ;;  %v1199_v0 = vmul.f32 %v2100_v34, %v1182_v55 }
 0x147   : > { %v1288_v2 = vrot.slane %v1286_v59, 5  ;;  %v1292_v5 = vrot.slane %v1290_v1, 4  ;;  %v1505_v6 = vpack.c.bf16 %v1238_v62, %v1238_v62 }
 0x148   : > { %v1284_v22 = vrot.slane %v1283_v52, 4  ;;  %v1204_v41 = vsel %vm1187_vm3, %v1182_v55, %v1199_v0 }
 0x149   : > { %v1293_v60 = vor.u32 %v1292_v5, %v1288_v2  ;;  %v1296_v9 = vshll.u32 %v1505_v6, 16  ;;  %v1300_v10 = vshrl.u32 %v1505_v6, 16  ;;  %v1239_v12 = vmul.f32 %v1233_v8, %v1204_v41 }
 0x14a   : > { %v1289_v7 = vsel %vm2121_vm1, %v1284_v22, %v1288_v2 }
 0x14b   : > { %v1294_v13 = vrot.slane %v1293_v60, 4  ;;  %1327 = vst.msk [vmem:[%s2054_s29 + $0x8] sm:$0xf] %vm1240_vm8, %v1289_v7  ;;  %v1298_v34 = vrot.slane %v1296_v9, 5  ;;  %v1302_v4 = vrot.slane %v1300_v10, 4  ;;  %v1506_v11 = vpack.c.bf16 %v1239_v12, %v1239_v12 }
 0x14d   : > { %v1299_v3 = vsel %vm2121_vm1, %v1294_v13, %v1298_v34  ;;  %v1303_v56 = vor.u32 %v1302_v4, %v1298_v34  ;;  %v1306_v18 = vshll.u32 %v1506_v11, 16  ;;  %v1310_v19 = vshrl.u32 %v1506_v11, 16 }
 0x14e   : > { %1328 = vst.msk [vmem:[%s2054_s29 + $0xc] sm:$0xf] %vm1240_vm8, %v1299_v3 }
 0x14f   : > { %v1304_v20 = vrot.slane %v1303_v56, 4  ;;  %v1308_v21 = vrot.slane %v1306_v18, 5  ;;  %v1334_v23 = vsel %vm1332_vm6, %v1310_v19, %v1333_v15 }
 0x150   : > { %1335 = vst [vmem:[%s2054_s29 + $0x14] sm:$0x1] %v1334_v23 }
 0x151   : > { %v1309_v14 = vsel %vm2121_vm1, %v1304_v20, %v1308_v21 }
 0x152   : > { %1329 = vst.msk [vmem:[%s2054_s29 + $0x10] sm:$0xf] %vm1240_vm8, %v1309_v14 }
 0x153 PF: > { %s15_s18 = sadd.s32 1, %s1755_s18  }
 0x154   : > { %p12_p4 = scmp.ge.s32.totalorder %s15_s18, 4  }
 0x156   :  { %14 = sbr.rel (!%p12_p4) target bundleno = 1 (0x1), region = 78 }

// kernel: ifblock_forward.15
= control target key start
LH: loop header
LB: loop body
LE: loop exit
PB: predicated region body
PF: predicated region fallthrough
CT: control target
= control target key end

     0   :  { %s1900_s21 = smov 0   ;;  %s2293_s0 = inlined_call_operand.vmem [shape: bf16[2,48,32], index: 0, kind: input, shape index: {}]   ;;  %s2294_s1 = inlined_call_operand.vmem [shape: bf16[9,32,32], index: 1, kind: input, shape index: {}]   ;;  %s2295_s2 = inlined_call_operand.vmem [shape: f32[1,32], index: 2, kind: input, shape index: {}]   ;;  %s2296_s3 = inlined_call_operand.vmem [shape: f32[1,32], index: 3, kind: input, shape index: {}]   ;;  %s2297_s4 = inlined_call_operand.vmem [shape: f32[34,1], index: 4, kind: input, shape index: {}]   ;;  %s2298_s5 = inlined_call_operand.vmem [shape: bf16[2,48,32], index: 5, kind: input, shape index: {}]   ;;  %s2299_s6 = inlined_call_operand.vmem [shape: bf16[2,48,32], index: 6, kind: output, shape index: {}]  }
   0x1 LB: > { %s1490_s22 = sadd.s32 4294967295, %s1860_s21   ;;  %p1494_p0 = scmp.ge.s32.totalorder %s1860_s21, 1  ;;  %s1860_s21 = sphi %s1900_s21, %s16_s21  }
   0x2   : > { %p222_p1 = scmp.lt.s32.totalorder %s1860_s21, 3 }
   0x4   : > { %p223_p2 = pnand %p1494_p0, %p222_p1 }
   0x5   : > { %p257_p3 = scmp.lt.s32.totalorder (!%p223_p2), %s1490_s22, 1 }
   0x6   : > { %226 = sbr.rel (%p223_p2) target bundleno = 341 (0x155), region = 44 }
   0xb   : > { %v1819_v0 = vld [vmem:[%s2294_s1 + $0x18] sm:$0xff]   ;;  %v1862_v1 = vmov 0.0   ;;  %v1820_v2 = vld [vmem:[%s2294_s1 + $0x10] sm:$0xff]   ;;  %vm1863_vm0 = vmmov 0   ;;  %s2305_s22 = smov (!%p257_p3, %s1490_s22), 1  ;;  %v1864_v3 = vmov 0  }
   0xc   : > { %1801 = vmatprep.subr.bf16.mxu1 %v1862_v1  ;;  %1657 = vmatprep.subr.bf16.mxu0 %v1862_v1  ;;  %s1922_s27 = smul.u32 24, %s2305_s22  ;;  %vm301_vm1 = vsmask.f32 7424  ;;  %vm337_vm2 = vcmask 261120   ;;  %v1823_v18 = vld [vmem:[%s2294_s1 + $0x8] sm:$0xff]   ;;  %v1826_v26 = vld [vmem:[%s2294_s1] sm:$0xff]  }
   0xd   : > { %1803 = vmatpush3.bf16.msra.mxu1 %v1819_v0  ;;  %1658 = vmatpush3.bf16.msra.mxu0 %v1819_v0  ;;  %v1825_v22 = vld [vmem:[%s2294_s1 + $0x28] sm:$0xff]   ;;  %v1827_v27 = vld [vmem:[%s2294_s1 + $0x20] sm:$0xff]   ;;  %vm490_vm3 = vcmask 1046528   ;;  %v1829_v39 = vld [vmem:[%s2294_s1 + $0x38] sm:$0xff]   ;;  %vm705_vm4 = vsmask.f32 4352 }
   0xe   : > { %1802 = vmatprep.subr.bf16.mxu1 %v1862_v1  ;;  %1665 = vmatprep.mubr.msk.bf16.mxu1 %vm1863_vm0, %v1862_v1  ;;  %s1930_s30 = scalar_lea.vmem %s2293_s0, %s1922_s27  ;;  %v1830_v32 = vld [vmem:[%s2294_s1 + $0x48] sm:$0xff]   ;;  %v1832_v34 = vld [vmem:[%s2294_s1 + $0x40] sm:$0xff]   ;;  %v1294_v41 = vld [vmem:[%s2297_s4 + $0x10] sm:$0xff]  ;;  %vm591_vm5 = vcmask 1044480   ;;  %vm917_vm6 = vcmask 1045504   ;;  %vm1327_vm8 = vcmask 257024   ;;  %s2161_s8 = scalar_lea.vmem %s2299_s6, %s1922_s27 }
   0xf   : > { %1659 = vmatprep.subr.bf16.mxu0 %v1862_v1  ;;  %1661 = vmatprep.mubr.msk.bf16.mxu0 %vm1863_vm0, %v1862_v1  ;;  %v1935_v4 = vld [vmem:[%s1930_s30 + $0x8] sm:$0xff]   ;;  %v1938_v5 = vld [vmem:[%s1930_s30 + $0x10] ss:$0 sps:$4 sm:$0x33]   ;;  %v273_v6 = vld [vmem:[%s1930_s30] sm:$0xf]  ;;  %s2210_s11 = scalar_lea.vmem %s2298_s5, %s1922_s27 }
  0x10   : > { %1817 = vset.pattern.permute.xlu0 %v1864_v3  ;;  %1818 = vset.pattern.permute.xlu1 %v1864_v3  ;;  %v1942_v7 = vld [vmem:[%s1930_s30 + $0x4] sm:$0xf]  ;;  %v310_v8 = vshll.u32 %v1935_v4, 16  ;;  %v314_v9 = vshrl.u32 %v1935_v4, 16  ;;  %v318_v10 = vshll.u32 %v1938_v5, 16  ;;  %v322_v24 = vshrl.u32 %v1938_v5, 16 }
  0x11   : > { %1804 = vmatpush3.bf16.msra.mxu1 %v1820_v2  ;;  %1660 = vmatpush3.bf16.msra.mxu0 %v1820_v2  ;;  %v1502_v11 = vcombine.low %v273_v6, %v1942_v7  ;;  %v481_v16 = vld [vmem:[%s1930_s30] sm:$0xe]  ;;  %v492_v29 = vrot.slane %v1935_v4, 1  ;;  %v494_v33 = vrot.slane %v1938_v5, 1  ;;  %v1990_v36 = vld [vmem:[%s1930_s30 + $0x4] sm:$0xf] }
  0x12   : > { %1673 = vmatprep.subr.bf16.mxu1 %v1862_v1  ;;  %1689 = vmatprep.subr.bf16.mxu0 %v1862_v1  ;;  %v312_v12 = vrot.slane %v310_v8, 1  ;;  %v320_v13 = vrot.slane %v318_v10, 1  ;;  %v1520_v23 = vcombine.low %v481_v16, %v1942_v7  ;;  %v679_v35 = vld [vmem:[%s1930_s30] sm:$0x8]  ;;  %v1994_v37 = vld [vmem:[%s1930_s30 + $0x8] sm:$0xf] }
  0x13   : > { %v303_v14 = vshrl.u32 %v1502_v11, 16  ;;  %v305_v15 = vshll.u32 %v1502_v11, 16  ;;  %v1997_v38 = vld [vmem:[%s1930_s30 + $0xc] sm:$0xf]  ;;  %v1292_v40 = vld [vmem:[%s2297_s4] sm:$0xff]  ;;  %v1541_v42 = vcombine.low %v679_v35, %v1990_v36  ;;  %1309 = vperm.xlu1 %1818, %v1294_v41   ;;  %v495_v43 = vsel %vm490_vm3, %v492_v29, %v494_v33  ;;  %v1831_v46 = vld [vmem:[%s2294_s1 + $0x30] sm:$0xff]  }
  0x14   : > { %v316_v17 = vor.u32 %v314_v9, %v312_v12  ;;  %v491_v28 = vrot.slane %v1520_v23, 1  ;;  %v324_v30 = vor.u32 %v322_v24, %v320_v13  ;;  %1299 = vperm.xlu0 %1817, %v1292_v40   ;;  %v1542_v44 = vcombine.low %v1994_v37, %v1997_v38  ;;  %v1293_v45 = vld [vmem:[%s2297_s4 + $0x8] sm:$0xff]  ;;  %v1295_v47 = vld [vmem:[%s2297_s4 + $0x18] sm:$0xff]  ;;  %v683_v52 = vld [vmem:[%s1930_s30 + $0x10] sm:$0xf] }
  0x15   : > { %v307_v19 = vrot.slane %v305_v15, 1  ;;  %v707_v48 = vshrl.u32 %v1541_v42, 16  ;;  %v710_v49 = vshll.u32 %v1541_v42, 16  ;;  %v2031_v53 = vld [vmem:[%s1930_s30 + $0x14] sm:$0x1]  ;;  %v1838_v8 = vld [vmem:[%s2294_s1 + $0x68] sm:$0xff]  }
  0x16   : > { %v321_v20 = vsel %vm301_vm1, %v316_v17, %v320_v13  ;;  %v493_v31 = vsel %vm490_vm3, %v491_v28, %v492_v29  ;;  %v715_v50 = vshrl.u32 %v1542_v44, 16  ;;  %v718_v51 = vshll.u32 %v1542_v44, 16  ;;  %v1296_v54 = vld [vmem:[%s2297_s4 + $0x20] sm:$0x3]  ;;  %v578_v60 = vld [vmem:[%s1930_s30] sm:$0x8] }
  0x17   : > { %v308_v21 = vor.u32 %v307_v19, %v303_v14  ;;  %1666 = vmatmul.mubr.msk.bf16.vlgmr.msra.gmra.mxu1 %vm337_vm2, %v321_v20  ;;  %1314 = vperm.xlu1 %1818, %v1295_v47   ;;  %v709_v55 = vrot.slane %v707_v48, 3  ;;  %v712_v56 = vrot.slane %v710_v49, 4  ;;  %v1543_v59 = vcombine.low %v683_v52, %v2031_v53  ;;  %v1833_v2 = vld [vmem:[%s1930_s30 + $0x10] ss:$0 sps:$4 sm:$0x11]   ;;  %v1843_v13 = vld [vmem:[%s2294_s1 + $0x60] sm:$0xff]  }
  0x18   : > { %1674 = vmatpush3.bf16.msra.mxu1 %v1823_v18  ;;  %1669 = vmatprep.mubr.msk.bf16.mxu1 %vm1863_vm0, %v1862_v1  ;;  %v717_v57 = vrot.slane %v715_v50, 3  ;;  %v720_v58 = vrot.slane %v718_v51, 4  ;;  %v1530_v5 = vcombine.low %v578_v60, %v1942_v7  ;;  %v1841_v15 = vld [vmem:[%s1930_s30 + $0x10] ss:$0 sps:$4 sm:$0xff]   ;;  %v904_v19 = vld [vmem:[%s1930_s30 + $0x4] sm:$0xc]  ;;  %v1555_v42 = vcombine.low %v2031_v53, %v2031_v53 }
  0x19   : > { %v313_v25 = vsel %vm301_vm1, %v308_v21, %v312_v12  ;;  %1675 = vmatprep.subr.bf16.mxu1 %v1862_v1  ;;  %1304 = vperm.xlu0 %1817, %v1293_v45   ;;  %v713_v61 = vor.u32 %v712_v56, %v709_v55  ;;  %v724_v63 = vshrl.u32 %v1543_v59, 16  ;;  %v727_v0 = vshll.u32 %v1543_v59, 16  ;;  %v1842_v18 = vld [vmem:[%s2294_s1 + $0x50] sm:$0xff]   ;;  %v1850_v29 = vld [vmem:[%s2294_s1 + $0x80] sm:$0xff]   ;;  %1328 = vst.msk [vmem:[%s2161_s8] sm:$0xf] %vm1327_vm8, %v1864_v3 }
  0x1a   : > { %1662 = vmatmul.mubr.msk.bf16.vlgmr.msra.gmra.mxu0 %vm337_vm2, %v313_v25  ;;  %v721_v62 = vor.u32 %v720_v58, %v717_v57  ;;  %v593_v12 = vrot.slane %v1935_v4, 3  ;;  %v595_v17 = vrot.slane %v1841_v15, 3  ;;  %v2084_v21 = vcombine.low %v1997_v38, %v683_v52  ;;  %v1853_v47 = vld [vmem:[%s1930_s30 + $0x14] ss:$0 sps:$4 sm:$0xff]   ;;  %1329 = vst.msk [vmem:[%s2161_s8 + $0x4] sm:$0xf] %vm1327_vm8, %v1864_v3 }
  0x1b   : > { %1690 = vmatpush3.bf16.msra.mxu0 %v1825_v22  ;;  %1693 = vmatprep.mubr.msk.bf16.mxu0 %vm1863_vm0, %v1862_v1  ;;  %v726_v9 = vrot.slane %v724_v63, 3  ;;  %v729_v10 = vrot.slane %v727_v0, 4  ;;  %v1565_v22 = vcombine.low %v904_v19, %v1994_v37  ;;  %v1032_v51 = vshrl.u32 %v1853_v47, 16  ;;  %1330 = vst.msk [vmem:[%s2161_s8 + $0x8] sm:$0xf] %vm1327_vm8, %v1864_v3 }
  0x1c   : > { %1691 = vmatprep.subr.bf16.mxu0 %v1862_v1  ;;  %1676 = vmatpush3.bf16.msra.mxu1 %v1826_v26  ;;  %v722_v6 = vsel %vm705_vm4, %v713_v61, %v721_v62  ;;  %v596_v20 = vsel %vm591_vm5, %v593_v12, %v595_v17  ;;  %v919_v24 = vrot.slane %v2084_v21, 2  ;;  %v1847_v26 = vld [vmem:[%s2294_s1 + $0x88] sm:$0xff]   ;;  %v1026_v40 = vshll.u32 %v2084_v21, 16  ;;  %1331 = vst.msk [vmem:[%s2161_s8 + $0xc] sm:$0xf] %vm1327_vm8, %v1864_v3 }
  0x1d   : > { %1705 = vmatprep.subr.bf16.mxu1 %v1862_v1  ;;  %1319 = vperm.xlu0 %1817, %v1296_v54   ;;  %v730_v7 = vor.u32 %v729_v10, %v726_v9  ;;  %v918_v23 = vrot.slane %v1565_v22, 2  ;;  %v1019_v38 = vshll.u32 %v1565_v22, 16  ;;  %v1035_v52 = vshll.u32 %v1853_v47, 16  ;;  %1332 = vst.msk [vmem:[%s2161_s8 + $0x10] sm:$0xf] %vm1327_vm8, %v1864_v3 }
  0x1e   : > { %vm1014_vm7 = vsmask.f32 5376  ;;  %v1134_v53 = vrot.slane %v1853_v47, 3  ;;  %v1034_v55 = vrot.slane %v1032_v51, 2  ;;  %1333 = vst.msk [vmem:[%s2161_s8 + $0x14] sm:$0xf] %vm1327_vm8, %v1864_v3 }
  0x1f   : > { %1692 = vmatpush3.bf16.msra.mxu0 %v1827_v27  ;;  %1670 = vmatmul.mubr.msk.bf16.gmra.mxu1 %vm337_vm2, %v324_v30  ;;  %v731_v16 = vsel %vm705_vm4, %v721_v62, %v730_v7  ;;  %v920_v25 = vsel %vm917_vm6, %v918_v23, %v919_v24  ;;  %v1848_v27 = vld [vmem:[%s1930_s30 + $0x14] ss:$0 sps:$4 sm:$0x77]   ;;  %v1553_v30 = vcombine.low %v1990_v36, %v1994_v37  ;;  %v1016_v36 = vshrl.u32 %v1565_v22, 16 }
  0x20   : > { %1721 = vmatprep.subr.bf16.mxu0 %v1862_v1  ;;  %1677 = vmatprep.mubr.msk.bf16.mxu1 %vm1863_vm0, %v1862_v1  ;;  %v921_v28 = vrot.slane %v1848_v27, 2  ;;  %v1021_v44 = vrot.slane %v1019_v38, 3  ;;  %v1037_v56 = vrot.slane %v1035_v52, 3  ;;  %vm1270_vm9 = vcmask 1040384  }
  0x21   : > { %vm1407_vm12 = vcmask 257027   ;;  %vm1408_vm13 = vsmask.f32 7950  ;;  %vm1350_vm14 = vsmask.f32 3328 }
  0x22   : > { %1694 = vmatmul.mubr.msk.bf16.vlgmr.msra.gmra.mxu0 %vm337_vm2, %v493_v31  ;;  %v1846_v31 = vld [vmem:[%s2294_s1 + $0x78] sm:$0xff]   ;;  %v1038_v58 = vor.u32 %v1037_v56, %v1034_v55  ;;  %vm2252_vm1 = vmand %vm1407_vm12, %vm1408_vm13 }
  0x23   : > { %1722 = vmatpush3.bf16.msra.mxu0 %v1830_v32  ;;  %1697 = vmatprep.mubr.msk.bf16.mxu0 %vm1863_vm0, %v1862_v1  ;;  %v922_v32 = vsel %vm917_vm6, %v919_v24, %v921_v28  ;;  %vm1418_vm6 = vsmask.f32 256 }
  0x24   : > { %1723 = vmatprep.subr.bf16.mxu0 %v1862_v1 }
  0x27   : > { %1724 = vmatpush3.bf16.msra.mxu0 %v1832_v34  ;;  %1678 = vmatmul.mubr.msk.bf16.vlgmr.msra.gmra.mxu1 %vm337_vm2, %v1502_v11  ;;  %v592_v11 = vrot.slane %v1530_v5, 3  ;;  %v1122_v34 = vld [vmem:[%s1930_s30 + $0x4] sm:$0x8] }
  0x28   : > { %1753 = vmatprep.subr.bf16.mxu0 %v1862_v1  ;;  %1706 = vmatpush3.bf16.msra.mxu1 %v1829_v39  ;;  %v1586_v35 = vcombine.low %v1122_v34, %v1994_v37  ;;  %v1023_v39 = vshrl.u32 %v2084_v21, 16  ;;  %v1132_v37 = vrot.slane %v2084_v21, 3 }
  0x29   : > { %1681 = vmatprep.mubr.msk.bf16.mxu1 %vm1863_vm0, %v1862_v1  ;;  %1707 = vmatprep.subr.bf16.mxu1 %v1862_v1  ;;  %v594_v14 = vsel %vm591_vm5, %v592_v11, %v593_v12 }
  0x2a   : > { %1698 = vmatmul.mubr.msk.bf16.gmra.mxu0 %vm337_vm2, %v495_v43  ;;  %v1131_v41 = vrot.slane %v1586_v35, 3  ;;  %v1018_v43 = vrot.slane %v1016_v36, 2  ;;  %v1025_v45 = vrot.slane %v1023_v39, 2  ;;  %v1135_v57 = vsel %vm591_vm5, %v1132_v37, %v1134_v53 }
  0x2b   : > { %1701 = vmatprep.mubr.msk.bf16.mxu0 %vm1863_vm0, %v1862_v1 }
  0x2c   : > { %1708 = vmatpush3.bf16.msra.mxu1 %v1831_v46  ;;  %v1028_v46 = vrot.slane %v1026_v40, 3  ;;  %v1133_v48 = vsel %vm591_vm5, %v1131_v41, %v1132_v37  ;;  %v1022_v49 = vor.u32 %v1021_v44, %v1018_v43  ;;  %vm1417_vm5 = vcmask 253952  }
  0x2d   : > { %1737 = vmatprep.subr.bf16.mxu1 %v1862_v1 }
  0x2e   : > { %v1029_v50 = vor.u32 %v1028_v46, %v1025_v45 }
  0x2f   : > { %1682 = vmatmul.mubr.msk.bf16.gmra.mxu1 %vm337_vm2, %v1935_v4  ;;  %v1837_v4 = vld [vmem:[%s2294_s1 + $0x58] sm:$0xff]  }
  0x30   : > { %1685 = vmatprep.mubr.msk.bf16.mxu1 %vm1863_vm0, %v1862_v1  ;;  %v1030_v54 = vsel %vm1014_vm7, %v1022_v49, %v1029_v50  ;;  %v1039_v59 = vsel %vm1014_vm7, %v1029_v50, %v1038_v58  ;;  %vm1419_vm7 = vmand %vm1417_vm5, %vm1418_vm6 }
  0x32   : > { %1702 = vmatmul.mubr.msk.bf16.gmra.mxu0 %vm337_vm2, %v494_v33  ;;  %v1849_v33 = vld [vmem:[%s2294_s1 + $0x70] sm:$0xff]  }
  0x33   : > { %1725 = vmatprep.mubr.msk.bf16.mxu0 %vm1863_vm0, %v1862_v1 }
  0x37   : > { %1686 = vmatmul.mubr.msk.bf16.gmra.mxu1 %vm337_vm2, %v1833_v2 }
  0x38   : > { %1709 = vmatprep.mubr.msk.bf16.mxu1 %vm1863_vm0, %v1862_v1 }
  0x3a   : > { %1726 = vmatmul.mubr.msk.bf16.vlgmr.msra.gmra.mxu0 %vm337_vm2, %v722_v6 }
  0x3b   : > { %1754 = vmatpush3.bf16.msra.mxu0 %v1838_v8  ;;  %1729 = vmatprep.mubr.msk.bf16.mxu0 %vm1863_vm0, %v1862_v1 }
  0x3c   : > { %1755 = vmatprep.subr.bf16.mxu0 %v1862_v1 }
  0x3f   : > { %1756 = vmatpush3.bf16.msra.mxu0 %v1843_v13  ;;  %1710 = vmatmul.mubr.msk.bf16.vlgmr.msra.gmra.mxu1 %vm337_vm2, %v594_v14 }
  0x40   : > { %1785 = vmatprep.subr.bf16.mxu0 %v1862_v1  ;;  %1738 = vmatpush3.bf16.msra.mxu1 %v1837_v4 }
  0x41   : > { %1713 = vmatprep.mubr.msk.bf16.mxu1 %vm1863_vm0, %v1862_v1  ;;  %1739 = vmatprep.subr.bf16.mxu1 %v1862_v1 }
  0x42   : > { %1730 = vmatmul.mubr.msk.bf16.gmra.mxu0 %vm337_vm2, %v731_v16 }
  0x43   : > { %1733 = vmatprep.mubr.msk.bf16.mxu0 %vm1863_vm0, %v1862_v1 }
  0x44   : > { %1740 = vmatpush3.bf16.msra.mxu1 %v1842_v18 }
  0x45   : > { %1769 = vmatprep.subr.bf16.mxu1 %v1862_v1 }
  0x47   : > { %1714 = vmatmul.mubr.msk.bf16.gmra.mxu1 %vm337_vm2, %v596_v20 }
  0x48   : > { %1717 = vmatprep.mubr.msk.bf16.mxu1 %vm1863_vm0, %v1862_v1 }
  0x4a   : > { %1734 = vmatmul.mubr.msk.bf16.gmra.mxu0 %vm337_vm2, %v730_v7 }
  0x4b   : > { %1757 = vmatprep.mubr.msk.bf16.mxu0 %vm1863_vm0, %v1862_v1 }
  0x4f   : > { %1718 = vmatmul.mubr.msk.bf16.gmra.mxu1 %vm337_vm2, %v595_v17 }
  0x50   : > { %1741 = vmatprep.mubr.msk.bf16.mxu1 %vm1863_vm0, %v1862_v1 }
  0x52   : > { %1758 = vmatmul.mubr.msk.bf16.vlgmr.msra.gmra.mxu0 %vm337_vm2, %v920_v25 }
  0x53   : > { %1786 = vmatpush3.bf16.msra.mxu0 %v1847_v26  ;;  %1761 = vmatprep.mubr.msk.bf16.mxu0 %vm1863_vm0, %v1862_v1 }
  0x54   : > { %1787 = vmatprep.subr.bf16.mxu0 %v1862_v1 }
  0x57   : > { %1788 = vmatpush3.bf16.msra.mxu0 %v1850_v29  ;;  %1742 = vmatmul.mubr.msk.bf16.vlgmr.msra.gmra.mxu1 %vm337_vm2, %v1553_v30 }
  0x58   : > { %1770 = vmatpush3.bf16.msra.mxu1 %v1846_v31  ;;  %1745 = vmatprep.mubr.msk.bf16.mxu1 %vm1863_vm0, %v1862_v1 }
  0x59   : > { %1771 = vmatprep.subr.bf16.mxu1 %v1862_v1 }
  0x5a   : > { %1762 = vmatmul.mubr.msk.bf16.gmra.mxu0 %vm337_vm2, %v922_v32 }
  0x5b   : > { %1765 = vmatprep.mubr.msk.bf16.mxu0 %vm1863_vm0, %v1862_v1 }
  0x5c   : > { %1772 = vmatpush3.bf16.msra.mxu1 %v1849_v33 }
  0x5f   : > { %1746 = vmatmul.mubr.msk.bf16.gmra.mxu1 %vm337_vm2, %v2084_v21 }
  0x60   : > { %1749 = vmatprep.mubr.msk.bf16.mxu1 %vm1863_vm0, %v1862_v1 }
  0x62   : > { %1766 = vmatmul.mubr.msk.bf16.gmra.mxu0 %vm337_vm2, %v921_v28 }
  0x63   : > { %1789 = vmatprep.mubr.msk.bf16.mxu0 %vm1863_vm0, %v1862_v1 }
  0x67   : > { %1750 = vmatmul.mubr.msk.bf16.gmra.mxu1 %vm337_vm2, %v1555_v42 }
  0x68   : > { %1773 = vmatprep.mubr.msk.bf16.mxu1 %vm1863_vm0, %v1862_v1 }
  0x6a   : > { %1790 = vmatmul.mubr.msk.bf16.vlgmr.msra.gmra.mxu0 %vm337_vm2, %v1133_v48 }
  0x6b   : > { %1793 = vmatprep.mubr.msk.bf16.mxu0 %vm1863_vm0, %v1862_v1 }
  0x6f   : > { %1774 = vmatmul.mubr.msk.bf16.vlgmr.msra.gmra.mxu1 %vm337_vm2, %v1030_v54 }
  0x70   : > { %1777 = vmatprep.mubr.msk.bf16.mxu1 %vm1863_vm0, %v1862_v1 }
  0x72   : > { %1794 = vmatmul.mubr.msk.bf16.gmra.mxu0 %vm337_vm2, %v1135_v57 }
  0x73   : > { %1797 = vmatprep.mubr.msk.bf16.mxu0 %vm1863_vm0, %v1862_v1 }
  0x77   : > { %1778 = vmatmul.mubr.msk.bf16.gmra.mxu1 %vm337_vm2, %v1039_v59 }
  0x78   : > { %1781 = vmatprep.mubr.msk.bf16.mxu1 %vm1863_vm0, %v1862_v1  ;;  %vm1351_vm0 = vsmask.f32 7440 }
  0x79   : > { %vm2265_vm3 = vmor %vm1350_vm14, %vm1351_vm0 }
  0x7a   : > { %1798 = vmatmul.mubr.msk.bf16.gmra.mxu0 %vm337_vm2, %v1134_v53 }
  0x7f   : > { %1782 = vmatmul.mubr.msk.bf16.gmra.mxu1 %vm337_vm2, %v1038_v58 }
  0xd7   : > { %v389_v1 = vpop.f32.mrf.mxu1 }
  0xd9   : > { %v1667_v60 = vpop.f32.mrf.mxu1 }
  0xda   : > { %v381_v61 = vpop.f32.mrf.mxu0 }
  0xdb   : > { %v392_v62 = vpop.f32.mrf.mxu1 }
  0xdc   : > { %v1663_v63 = vpop.f32.mrf.mxu0 }
  0xdd   : > { %v1668_v0 = vpop.f32.mrf.mxu1 }
  0xde   : > { %v384_v2 = vpop.f32.mrf.mxu0 }
  0xdf   : > { %v397_v5 = vpop.f32.mrf.mxu1 }
  0xe0   : > { %v1664_v6 = vpop.f32.mrf.mxu0 }
  0xe1   : > { %v1671_v8 = vpop.f32.mrf.mxu1 }
  0xe2   : > { %v551_v9 = vpop.f32.mrf.mxu0 }
  0xe3   : > { %v400_v10 = vpop.f32.mrf.mxu1 }
  0xe4   : > { %v1695_v11 = vpop.f32.mrf.mxu0 }
  0xe5   : > { %v1672_v12 = vpop.f32.mrf.mxu1 }
  0xe6   : > { %v554_v7 = vpop.f32.mrf.mxu0 }
  0xe7   : > { %v459_v13 = vpop.f32.mrf.mxu1 }
  0xe8   : > { %v1696_v14 = vpop.f32.mrf.mxu0  ;;  %v460_v4 = vadd.f32 %v459_v13, %v381_v61 }
  0xe9   : > { %v1679_v15 = vpop.f32.mrf.mxu1 }
  0xea   : > { %v559_v3 = vpop.f32.mrf.mxu0  ;;  %v2181_v16 = vadd.f32 %v551_v9, %v460_v4 }
  0xeb   : > { %v462_v17 = vpop.f32.mrf.mxu1 }
  0xec   : > { %v1699_v18 = vpop.f32.mrf.mxu0  ;;  %v463_v19 = vadd.f32 %v462_v17, %v384_v2 }
  0xed   : > { %v1680_v20 = vpop.f32.mrf.mxu1 }
  0xee   : > { %v562_v21 = vpop.f32.mrf.mxu0  ;;  %v2183_v22 = vadd.f32 %v554_v7, %v463_v19 }
  0xef   : > { %v467_v23 = vpop.f32.mrf.mxu1 }
  0xf0   : > { %v1700_v24 = vpop.f32.mrf.mxu0  ;;  %v468_v25 = vadd.f32 %v467_v23, %v389_v1 }
  0xf1   : > { %v1683_v26 = vpop.f32.mrf.mxu1 }
  0xf2   : > { %v567_v27 = vpop.f32.mrf.mxu0  ;;  %v2185_v28 = vadd.f32 %v559_v3, %v468_v25 }
  0xf3   : > { %v470_v29 = vpop.f32.mrf.mxu1 }
  0xf4   : > { %v1703_v30 = vpop.f32.mrf.mxu0  ;;  %v471_v31 = vadd.f32 %v470_v29, %v392_v62 }
  0xf5   : > { %v1684_v32 = vpop.f32.mrf.mxu1 }
  0xf6   : > { %v570_v33 = vpop.f32.mrf.mxu0  ;;  %v2187_v34 = vadd.f32 %v562_v21, %v471_v31  ;;  %v2215_v32 = vld [vmem:[%s2210_s11 + $0x4] ss:$12 sps:$4 sm:$0xff]  }
  0xf7   : > { %v475_v35 = vpop.f32.mrf.mxu1 }
  0xf8   : > { %v1704_v36 = vpop.f32.mrf.mxu0  ;;  %v476_v38 = vadd.f32 %v475_v35, %v397_v5 }
  0xf9   : > { %v1687_v39 = vpop.f32.mrf.mxu1 }
  0xfa   : > { %v787_v40 = vpop.f32.mrf.mxu0  ;;  %v2189_v41 = vadd.f32 %v567_v27, %v476_v38 }
  0xfb   : > { %v478_v37 = vpop.f32.mrf.mxu1 }
  0xfc   : > { %v1727_v42 = vpop.f32.mrf.mxu0 }
  0xfd   : > { %v1688_v43 = vpop.f32.mrf.mxu1 }
  0xfe   : > { %v790_v44 = vpop.f32.mrf.mxu0  ;;  %v1259_v43 = vunpack.c.l.bf16 %v2215_v32 }
  0xff   : > { %v652_v45 = vpop.f32.mrf.mxu1 }
 0x100   : > { %v1728_v46 = vpop.f32.mrf.mxu0  ;;  %v674_v20 = vadd.f32 %v652_v45, %v2181_v16  ;;  %v1252_v16 = vld [vmem:[%s2210_s11] sm:$0x8] }
 0x101   : > { %v1711_v47 = vpop.f32.mrf.mxu1  ;;  %v1258_v42 = vunpack.c.l.bf16 %v1252_v16  ;;  %v1257_v16 = vld [vmem:[%s2210_s11 + $0x14] sm:$0x1] }
 0x102   : > { %v795_v48 = vpop.f32.mrf.mxu0  ;;  %v809_v27 = vadd.f32 %v787_v40, %v674_v20  ;;  %v1611_v40 = vld [vmem:[%s2210_s11 + $0x8] sm:$0xff]  }
 0x103   : > { %v655_v49 = vpop.f32.mrf.mxu1 }
 0x104   : > { %v1731_v50 = vpop.f32.mrf.mxu0  ;;  %v675_v26 = vadd.f32 %v655_v49, %v2183_v22 }
 0x105   : > { %v1712_v51 = vpop.f32.mrf.mxu1 }
 0x106   : > { %v2191_v52 = vpop.f32.mrf.mxu0  ;;  %v810_v38 = vadd.f32 %v790_v44, %v675_v26 }
 0x107   : > { %v660_v53 = vpop.f32.mrf.mxu1 }
 0x108   : > { %v1732_v54 = vpop.f32.mrf.mxu0  ;;  %v676_v36 = vadd.f32 %v660_v53, %v2185_v28  ;;  %v1271_v53 = vrot.slane %v1258_v42, 7 }
 0x109   : > { %v1715_v55 = vpop.f32.mrf.mxu1  ;;  %v2224_v54 = vld [vmem:[%s2295_s2] ss:$0 sm:$0xff] }
 0x10a   : > { %v2193_v56 = vpop.f32.mrf.mxu0  ;;  %v811_v50 = vadd.f32 %v795_v48, %v676_v36  ;;  %v1272_v55 = vrot.slane %v1259_v43, 7  ;;  %v2230_v48 = vld [vmem:[%s2296_s3] ss:$0 sm:$0xff] }
 0x10b   : > { %v663_v57 = vpop.f32.mrf.mxu1 }
 0x10c   : > { %v1735_v58 = vpop.f32.mrf.mxu0  ;;  %v677_v46 = vadd.f32 %v663_v57, %v2187_v34 }
 0x10d   : > { %v1716_v59 = vpop.f32.mrf.mxu1  ;;  %v1609_v58 = vunpack.c.l.bf16 %v1611_v40 }
 0x10e   : > { %v806_v1 = vpop.f32.mrf.mxu0  ;;  %v812_v34 = vadd.f32 %v2191_v52, %v677_v46 }
 0x10f   : > { %v2195_v60 = vpop.f32.mrf.mxu1  ;;  %v1274_v52 = vrot.slane %v1609_v58, 7 }
 0x110   : > { %v1736_v61 = vpop.f32.mrf.mxu0 }
 0x111   : > { %v1719_v62 = vpop.f32.mrf.mxu1 }
 0x112   : > { %v978_v63 = vpop.f32.mrf.mxu0 }
 0x113   : > { %v671_v0 = vpop.f32.mrf.mxu1 }
 0x114   : > { %v1759_v2 = vpop.f32.mrf.mxu0  ;;  %v678_v0 = vadd.f32 %v2195_v60, %v2189_v41  ;;  %v1262_v60 = vunpack.c.h.bf16 %v2215_v32 }
 0x115   : > { %v1720_v5 = vpop.f32.mrf.mxu1 }
 0x116   : > { %v981_v6 = vpop.f32.mrf.mxu0 }
 0x117   : > { %v877_v8 = vpop.f32.mrf.mxu1 }
 0x118   : > { %v1760_v9 = vpop.f32.mrf.mxu0  ;;  %v899_v31 = vadd.f32 %v877_v8, %v809_v27  ;;  %v1275_v27 = vsel %vm1270_vm9, %v1272_v55, %v1274_v52 }
 0x119   : > { %v1743_v10 = vpop.f32.mrf.mxu1 }
 0x11a   : > { %v2197_v11 = vpop.f32.mrf.mxu0  ;;  %v1000_v22 = vadd.f32 %v978_v63, %v899_v31  ;;  %v1610_v63 = vunpack.c.h.bf16 %v1611_v40  ;;  %v1273_v10 = vsel %vm1270_vm9, %v1271_v53, %v1272_v55  ;;  %v1410_v55 = vld [vmem:[%s2161_s8] sm:$0x8] }
 0x11b   : > { %v880_v12 = vpop.f32.mrf.mxu1 }
 0x11c   : > { %v1763_v7 = vpop.f32.mrf.mxu0  ;;  %v900_v45 = vadd.f32 %v880_v12, %v810_v38  ;;  %v1276_v41 = vrot.slane %v1610_v63, 7 }
 0x11d   : > { %v1744_v13 = vpop.f32.mrf.mxu1 }
 0x11e   : > { %v2199_v14 = vpop.f32.mrf.mxu0  ;;  %v1001_v61 = vadd.f32 %v981_v6, %v900_v45  ;;  %v1300_v13 = vpop.permute.xlu0 %1299 }
 0x11f   : > { %v885_v4 = vpop.f32.mrf.mxu1 }
 0x120   : > { %v1764_v15 = vpop.f32.mrf.mxu0  ;;  %v901_v59 = vadd.f32 %v885_v4, %v811_v50 }
 0x121   : > { %v1747_v3 = vpop.f32.mrf.mxu1 }
 0x122   : > { %v2201_v17 = vpop.f32.mrf.mxu0  ;;  %v1002_v7 = vadd.f32 %v2197_v11, %v901_v59  ;;  %v1305_v38 = vpop.permute.xlu0 %1304 }
 0x123   : > { %v888_v18 = vpop.f32.mrf.mxu1  ;;  %v1310_v59 = vpop.permute.xlu1 %1309 }
 0x124   : > { %v1767_v19 = vpop.f32.mrf.mxu0  ;;  %v902_v8 = vadd.f32 %v888_v18, %v812_v34  ;;  %v813_v18 = vadd.f32 %v2193_v56, %v678_v0 }
 0x125   : > { %v1748_v21 = vpop.f32.mrf.mxu1 }
 0x126   : > { %v997_v23 = vpop.f32.mrf.mxu0  ;;  %v1003_v11 = vadd.f32 %v2199_v14, %v902_v8 }
 0x127   : > { %v2204_v24 = vpop.f32.mrf.mxu1 }
 0x128   : > { %v1768_v25 = vpop.f32.mrf.mxu0 }
 0x129   : > { %v1751_v29 = vpop.f32.mrf.mxu1 }
 0x12a   : > { %v1191_v30 = vpop.f32.mrf.mxu0  ;;  %v903_v29 = vadd.f32 %v2204_v24, %v813_v18 }
 0x12b   : > { %v896_v33 = vpop.f32.mrf.mxu1 }
 0x12c   : > { %v1791_v35 = vpop.f32.mrf.mxu0 }
 0x12d   : > { %v1752_v39 = vpop.f32.mrf.mxu1  ;;  %v1277_v35 = vsel %vm1270_vm9, %v1274_v52, %v1276_v41 }
 0x12e   : > { %v1194_v37 = vpop.f32.mrf.mxu0 }
 0x12f   : > { %v1095_v47 = vpop.f32.mrf.mxu1 }
 0x130   : > { %v1792_v49 = vpop.f32.mrf.mxu0  ;;  %v1117_v51 = vadd.f32 %v1095_v47, %v1000_v22  ;;  %v1263_v22 = vunpack.c.l.bf16 %v1257_v16  ;;  %v1004_v47 = vadd.f32 %v2201_v17, %v903_v29 }
 0x131   : > { %v1775_v28 = vpop.f32.mrf.mxu1 }
 0x132   : > { %v1199_v44 = vpop.f32.mrf.mxu0  ;;  %v1213_v1 = vadd.f32 %v1191_v30, %v1117_v51  ;;  %v1280_v8 = vrot.slane %v1263_v22, 7 }
 0x133   : > { %v1098_v57 = vpop.f32.mrf.mxu1 }
 0x134   : > { %v1795_v62 = vpop.f32.mrf.mxu0  ;;  %v1225_v2 = vadd.f32 %v2224_v54, %v1213_v1  ;;  %v1118_v5 = vadd.f32 %v1098_v57, %v1001_v61 }
 0x135   : > { %v1776_v9 = vpop.f32.mrf.mxu1 }
 0x136   : > { %v1202_v6 = vpop.f32.mrf.mxu0  ;;  %v1214_v12 = vadd.f32 %v1194_v37, %v1118_v5  ;;  %vm1230_vm10 = vcmp.ge.f32.partialorder %v1225_v2, 0.0  ;;  %v1242_v4 = vmul.f32 %v2230_v48, %v1225_v2  ;;  %v1278_v37 = vrot.slane %v1262_v60, 7 }
 0x137   : > { %v1103_v15 = vpop.f32.mrf.mxu1 }
 0x138   : > { %v1796_v3 = vpop.f32.mrf.mxu0  ;;  %v1226_v19 = vadd.f32 %v2224_v54, %v1214_v12  ;;  %v1119_v20 = vadd.f32 %v1103_v15, %v1002_v7  ;;  %v1247_v21 = vsel %vm1230_vm10, %v1225_v2, %v1242_v4  ;;  %v1279_v17 = vsel %vm1270_vm9, %v1276_v41, %v1278_v37 }
 0x139   : > { %v1779_v23 = vpop.f32.mrf.mxu1  ;;  %v1287_v25 = vadd.f32 %v1273_v10, %v1247_v21  ;;  %v1315_v21 = vpop.permute.xlu1 %1314 }
 0x13a   : > { %v1207_v26 = vpop.f32.mrf.mxu0  ;;  %v1215_v30 = vadd.f32 %v1199_v44, %v1119_v20  ;;  %vm1231_vm11 = vcmp.ge.f32.partialorder %v1226_v19, 0.0  ;;  %v1243_v31 = vmul.f32 %v2230_v48, %v1226_v19 }
 0x13b   : > { %v1322_v56 = vmul.f32 %v1300_v13, %v1287_v25  ;;  %v1106_v32 = vpop.f32.mrf.mxu1  ;;  %v1281_v25 = vsel %vm1270_vm9, %v1278_v37, %v1280_v8 }
 0x13c   : > { %v1799_v33 = vpop.f32.mrf.mxu0  ;;  %v1227_v36 = vadd.f32 %v2224_v54, %v1215_v30  ;;  %v1120_v14 = vadd.f32 %v1106_v32, %v1003_v11  ;;  %v1248_v39 = vsel %vm1231_vm11, %v1226_v19, %v1243_v31 }
 0x13d   : > { %v1602_v42 = vpack.c.bf16 %v1322_v56, %v1322_v56  ;;  %v1780_v24 = vpop.f32.mrf.mxu1  ;;  %v1288_v43 = vadd.f32 %v1275_v27, %v1248_v39 }
 0x13e   : > { %v1210_v45 = vpop.f32.mrf.mxu0  ;;  %v1216_v40 = vadd.f32 %v1202_v6, %v1120_v14  ;;  %vm1232_vm15 = vcmp.ge.f32.partialorder %v1227_v36, 0.0  ;;  %v1244_v46 = vmul.f32 %v2230_v48, %v1227_v36 }
 0x13f   : > { %v1354_v49 = vshll.u32 %v1602_v42, 16  ;;  %v1357_v50 = vshrl.u32 %v1602_v42, 16  ;;  %v1323_v51 = vmul.f32 %v1305_v38, %v1288_v43  ;;  %v1111_v28 = vpop.f32.mrf.mxu1  ;;  %v1420_v45 = vld [vmem:[%s2161_s8 + $0x14] sm:$0x1] }
 0x140   : > { %v1800_v44 = vpop.f32.mrf.mxu0  ;;  %v1228_v58 = vadd.f32 %v2224_v54, %v1216_v40  ;;  %v1249_v1 = vsel %vm1232_vm15, %v1227_v36, %v1244_v46  ;;  %v1121_v61 = vadd.f32 %v1111_v28, %v1004_v47 }
 0x141   : > { %v1356_v34 = vrot.slane %v1354_v49, 5  ;;  %v1359_v57 = vrot.slane %v1357_v50, 4  ;;  %v1289_v62 = vadd.f32 %v1277_v35, %v1249_v1  ;;  %v1603_v63 = vpack.c.bf16 %v1323_v51, %v1323_v51  ;;  %v1783_v0 = vpop.f32.mrf.mxu1 }
 0x142   : > { %v1217_v2 = vadd.f32 %v1207_v26, %v1121_v61  ;;  %vm1233_vm2 = vcmp.ge.f32.partialorder %v1228_v58, 0.0  ;;  %v1245_v5 = vmul.f32 %v2230_v48, %v1228_v58 }
 0x143   : > { %v1360_v9 = vor.u32 %v1359_v57, %v1356_v34  ;;  %v1411_v6 = vsel %vm2252_vm1, %v1356_v34, %v1410_v55  ;;  %v1324_v10 = vmul.f32 %v1310_v59, %v1289_v62  ;;  %v1363_v52 = vshll.u32 %v1603_v63, 16  ;;  %v1114_v12 = vpop.f32.mrf.mxu1 }
 0x144   : > { %1412 = vst [vmem:[%s2161_s8] sm:$0x8] %v1411_v6  ;;  %v1367_v13 = vshrl.u32 %v1603_v63, 16  ;;  %v1229_v4 = vadd.f32 %v2224_v54, %v1217_v2  ;;  %v1250_v15 = vsel %vm1233_vm2, %v1228_v58, %v1245_v5 }
 0x145   : > { %v1361_v3 = vrot.slane %v1360_v9, 4  ;;  %v1604_v41 = vpack.c.bf16 %v1324_v10, %v1324_v10  ;;  %v1365_v60 = vrot.slane %v1363_v52, 5  ;;  %v1290_v18 = vadd.f32 %v1279_v17, %v1250_v15  ;;  %v1784_v19 = vpop.f32.mrf.mxu1 }
 0x146   : > { %v1369_v20 = vrot.slane %v1367_v13, 4  ;;  %vm1234_vm4 = vcmp.ge.f32.partialorder %v1229_v4, 0.0  ;;  %v1246_v23 = vmul.f32 %v2230_v48, %v1229_v4  ;;  %v1320_v48 = vpop.permute.xlu0 %1319 }
 0x147   : > { %v1373_v11 = vshll.u32 %v1604_v41, 16  ;;  %v1377_v26 = vshrl.u32 %v1604_v41, 16  ;;  %v1366_v27 = vsel %vm2265_vm3, %v1361_v3, %v1365_v60  ;;  %v1325_v54 = vmul.f32 %v1315_v21, %v1290_v18 }
 0x148   : > { %v1370_v29 = vor.u32 %v1369_v20, %v1365_v60  ;;  %1413 = vst.msk [vmem:[%s2161_s8 + $0x4] sm:$0xf] %vm1327_vm8, %v1366_v27  ;;  %v1251_v30 = vsel %vm1234_vm4, %v1229_v4, %v1246_v23 }
 0x149   : > { %v1375_v31 = vrot.slane %v1373_v11, 5  ;;  %v1379_v16 = vrot.slane %v1377_v26, 4  ;;  %v1605_v56 = vpack.c.bf16 %v1325_v54, %v1325_v54  ;;  %v1291_v32 = vadd.f32 %v1281_v25, %v1251_v30 }
 0x14a   : > { %v1371_v33 = vrot.slane %v1370_v29, 4 }
 0x14b   : > { %v1380_v35 = vor.u32 %v1379_v16, %v1375_v31  ;;  %v1383_v36 = vshll.u32 %v1605_v56, 16  ;;  %v1387_v14 = vshrl.u32 %v1605_v56, 16  ;;  %v1326_v38 = vmul.f32 %v1320_v48, %v1291_v32 }
 0x14c   : > { %v1376_v39 = vsel %vm2265_vm3, %v1371_v33, %v1375_v31 }
 0x14d   : > { %v1381_v37 = vrot.slane %v1380_v35, 4  ;;  %1414 = vst.msk [vmem:[%s2161_s8 + $0x8] sm:$0xf] %vm1327_vm8, %v1376_v39  ;;  %v1385_v42 = vrot.slane %v1383_v36, 5  ;;  %v1389_v24 = vrot.slane %v1387_v14, 4  ;;  %v1606_v43 = vpack.c.bf16 %v1326_v38, %v1326_v38 }
 0x14f   : > { %v1386_v22 = vsel %vm2265_vm3, %v1381_v37, %v1385_v42  ;;  %v1390_v40 = vor.u32 %v1389_v24, %v1385_v42  ;;  %v1393_v46 = vshll.u32 %v1606_v43, 16  ;;  %v1397_v47 = vshrl.u32 %v1606_v43, 16 }
 0x150   : > { %1415 = vst.msk [vmem:[%s2161_s8 + $0xc] sm:$0xf] %vm1327_vm8, %v1386_v22 }
 0x151   : > { %v1391_v49 = vrot.slane %v1390_v40, 4  ;;  %v1395_v50 = vrot.slane %v1393_v46, 5  ;;  %v1421_v51 = vsel %vm1419_vm7, %v1397_v47, %v1420_v45 }
 0x152   : > { %1422 = vst [vmem:[%s2161_s8 + $0x14] sm:$0x1] %v1421_v51 }
 0x153   : > { %v1396_v28 = vsel %vm2265_vm3, %v1391_v49, %v1395_v50 }
 0x154   : > { %1416 = vst.msk [vmem:[%s2161_s8 + $0x10] sm:$0xf] %vm1327_vm8, %v1396_v28 }
 0x155 PF: > { %s16_s21 = sadd.s32 1, %s1860_s21  }
 0x156   : > { %p13_p4 = scmp.ge.s32.totalorder %s16_s21, 4  }
 0x158   :  { %15 = sbr.rel (!%p13_p4) target bundleno = 1 (0x1), region = 85 }

// kernel: ifblock_forward.23
= control target key start
LH: loop header
LB: loop body
LE: loop exit
PB: predicated region body
PF: predicated region fallthrough
CT: control target
= control target key end

     0   :  { %s2895_s18 = smov 0   ;;  %s3725_s0 = inlined_call_operand.vmem [shape: bf16[2,120,32], index: 0, kind: input, shape index: {}]   ;;  %s3726_s1 = inlined_call_operand.vmem [shape: bf16[9,32,20], index: 1, kind: input, shape index: {}]   ;;  %s3727_s2 = inlined_call_operand.vmem [shape: f32[1,20], index: 2, kind: input, shape index: {}]   ;;  %s3728_s3 = inlined_call_operand.vmem [shape: f32[1,20], index: 3, kind: input, shape index: {}]   ;;  %s3729_s4 = inlined_call_operand.vmem [shape: f32[98,1], index: 4, kind: input, shape index: {}]   ;;  %s3730_s5 = inlined_call_operand.vmem [shape: bf16[2,120,20], index: 5, kind: output, shape index: {}]  }
   0x1 LB: > { %s2246_s19 = sadd.s32 4294967295, %s2860_s18   ;;  %p2250_p0 = scmp.ge.s32.totalorder %s2860_s18, 1  ;;  %s2860_s18 = sphi %s2895_s18, %s15_s18  }
   0x2   : > { %p187_p1 = scmp.lt.s32.totalorder %s2860_s18, 3 }
   0x4   : > { %p188_p2 = pnand %p2250_p0, %p187_p1 }
   0x5   : > { %p215_p3 = scmp.lt.s32.totalorder (!%p188_p2), %s2246_s19, 1 }
   0x6   : > { %191 = sbr.rel (%p188_p2) target bundleno = 483 (0x1e3), region = 40 }
   0xb   : > { %v2809_v0 = vld [vmem:[%s3726_s1 + $0x18] sm:$0xff]   ;;  %v2862_v1 = vmov 0.0   ;;  %v2810_v2 = vld [vmem:[%s3726_s1 + $0x10] sm:$0xff]   ;;  %vm2863_vm0 = vmmov 0   ;;  %s3736_s19 = smov (!%p215_p3, %s2246_s19), 1  ;;  %vm350_vm2 = vcmask 261120  }
   0xc   : > { %2503 = vmatprep.subr.bf16.mxu0 %v2862_v1  ;;  %2791 = vmatprep.subr.bf16.mxu1 %v2862_v1  ;;  %s2795_s23 = smul.u32 60, %s3736_s19  ;;  %vm282_vm1 = vsmask.f32 7424  ;;  %v2815_v18 = vld [vmem:[%s3726_s1 + $0x28] sm:$0xff]   ;;  %v2820_v34 = vld [vmem:[%s3726_s1 + $0x20] sm:$0xff]   ;;  %v2822_v52 = vld [vmem:[%s3726_s1 + $0x38] sm:$0xff]  }
   0xd   : > { %2504 = vmatpush3.bf16.msra.mxu0 %v2809_v0  ;;  %2793 = vmatpush3.bf16.msra.mxu1 %v2809_v0  ;;  %v2816_v27 = vld [vmem:[%s3726_s1 + $0x8] sm:$0xff]   ;;  %v2821_v37 = vld [vmem:[%s3726_s1] sm:$0xff]   ;;  %vm587_vm3 = vcmask 1046528   ;;  %v2825_v55 = vld [vmem:[%s3726_s1 + $0x30] sm:$0xff]   ;;  %vm942_vm4 = vsmask.f32 6400 }
   0xe   : > { %2505 = vmatprep.subr.bf16.mxu0 %v2862_v1  ;;  %2792 = vmatprep.subr.bf16.mxu1 %v2862_v1  ;;  %s2927_s26 = scalar_lea.vmem %s3725_s0, %s2795_s23  ;;  %v2824_v57 = vld [vmem:[%s3726_s1 + $0x48] sm:$0xff]   ;;  %v2826_v59 = vld [vmem:[%s3726_s1 + $0x40] sm:$0xff]   ;;  %vm1148_vm5 = vcmask 1045504   ;;  %vm1968_vm6 = vcmask 158720   ;;  %s3233_s10 = scalar_lea.vmem %s3730_s5, %s2795_s23  ;;  %vm1503_vm7 = vsmask.f32 5376 }
   0xf   : > { %2507 = vmatprep.mubr.msk.bf16.mxu0 %vm2863_vm0, %v2862_v1  ;;  %2523 = vmatprep.mubr.msk.bf16.mxu1 %vm2863_vm0, %v2862_v1  ;;  %v226_v3 = vld [vmem:[%s2927_s26] sm:$0xf]  ;;  %v2931_v4 = vld [vmem:[%s2927_s26 + $0x4] sm:$0xf]  ;;  %v2937_v6 = vld [vmem:[%s2927_s26 + $0x8] sm:$0xff]   ;;  %vm1709_vm8 = vcmask 1044480  }
  0x10   : > { %v2934_v5 = vcombine.low %v226_v3, %v2931_v4  ;;  %v291_v9 = vshll.u32 %v2937_v6, 16  ;;  %v2943_v10 = vld [vmem:[%s2927_s26 + $0x20] sm:$0xff]   ;;  %v2946_v11 = vld [vmem:[%s2927_s26 + $0x28] sm:$0xff]   ;;  %v2949_v12 = vld [vmem:[%s2927_s26 + $0x10] sm:$0xff]   ;;  %v295_v19 = vshrl.u32 %v2937_v6, 16  ;;  %v589_v54 = vrot.slane %v2937_v6, 1 }
  0x11   : > { %2506 = vmatpush3.bf16.msra.mxu0 %v2810_v2  ;;  %2794 = vmatpush3.bf16.msra.mxu1 %v2810_v2  ;;  %v315_v15 = vshll.u32 %v2943_v10, 16  ;;  %v319_v16 = vshrl.u32 %v2943_v10, 16  ;;  %v323_v17 = vshll.u32 %v2946_v11, 16  ;;  %v2959_v20 = vld [vmem:[%s2927_s26 + $0x30] ss:$0 sps:$4 sm:$0x33]  }
  0x12   : > { %2567 = vmatprep.subr.bf16.mxu0 %v2862_v1  ;;  %2535 = vmatprep.subr.bf16.mxu1 %v2862_v1  ;;  %v284_v7 = vshrl.u32 %v2934_v5, 16  ;;  %v286_v8 = vshll.u32 %v2934_v5, 16  ;;  %v293_v14 = vrot.slane %v291_v9, 1  ;;  %v299_v23 = vshll.u32 %v2949_v12, 16  ;;  %v2970_v30 = vld [vmem:[%s2927_s26 + $0x18] sm:$0xff]  }
  0x13   : > { %v317_v22 = vrot.slane %v315_v15, 1  ;;  %v325_v24 = vrot.slane %v323_v17, 1  ;;  %v327_v28 = vshrl.u32 %v2946_v11, 16  ;;  %v331_v29 = vshll.u32 %v2959_v20, 16  ;;  %v578_v49 = vld [vmem:[%s2927_s26] sm:$0xe] }
  0x14   : > { %v288_v13 = vrot.slane %v286_v8, 1  ;;  %v297_v32 = vor.u32 %v295_v19, %v293_v14  ;;  %v301_v33 = vrot.slane %v299_v23, 1  ;;  %v303_v38 = vshrl.u32 %v2949_v12, 16  ;;  %v2827_v8 = vld [vmem:[%s2927_s26 + $0x30] ss:$0 sps:$4 sm:$0x11]  }
  0x15   : > { %v321_v26 = vor.u32 %v319_v16, %v317_v22  ;;  %v329_v35 = vor.u32 %v327_v28, %v325_v24  ;;  %v333_v36 = vrot.slane %v331_v29, 1  ;;  %v307_v39 = vshll.u32 %v2970_v30, 16  ;;  %v3103_v23 = vld [vmem:[%s2927_s26 + $0x14] sm:$0xff]  }
  0x16   : > { %v289_v21 = vor.u32 %v288_v13, %v284_v7  ;;  %v302_v40 = vsel %vm282_vm1, %v297_v32, %v301_v33  ;;  %v305_v42 = vor.u32 %v303_v38, %v301_v33  ;;  %v335_v44 = vshrl.u32 %v2959_v20, 16  ;;  %v2836_v29 = vld [vmem:[%s3726_s1 + $0x50] sm:$0xff]  }
  0x17   : > { %v326_v31 = vsel %vm282_vm1, %v321_v26, %v325_v24  ;;  %v334_v41 = vsel %vm282_vm1, %v329_v35, %v333_v36  ;;  %v309_v43 = vrot.slane %v307_v39, 1  ;;  %v311_v46 = vshrl.u32 %v2970_v30, 16  ;;  %v3124_v35 = vld [vmem:[%s2927_s26 + $0x1c] sm:$0xff]  }
  0x18   : > { %v294_v25 = vsel %vm282_vm1, %v289_v21, %v293_v14  ;;  %2524 = vmatmul.mubr.msk.bf16.vlgmr.msra.gmra.mxu1 %vm350_vm2, %v326_v31  ;;  %v337_v47 = vor.u32 %v335_v44, %v333_v36  ;;  %v2287_v51 = vcombine.low %v578_v49, %v2931_v4  ;;  %v591_v58 = vrot.slane %v2949_v12, 1  ;;  %v2832_v31 = vld [vmem:[%s3726_s1 + $0x68] sm:$0xff]   ;;  %v2837_v39 = vld [vmem:[%s3726_s1 + $0x60] sm:$0xff]  }
  0x19   : > { %2508 = vmatmul.mubr.msk.bf16.vlgmr.msra.gmra.mxu0 %vm350_vm2, %v294_v25  ;;  %2536 = vmatpush3.bf16.msra.mxu1 %v2816_v27  ;;  %v310_v45 = vsel %vm282_vm1, %v305_v42, %v309_v43  ;;  %v313_v48 = vor.u32 %v311_v46, %v309_v43  ;;  %v593_v61 = vrot.slane %v2970_v30, 1  ;;  %v595_v63 = vrot.slane %v2943_v10, 1 }
  0x1a   : > { %2568 = vmatpush3.bf16.msra.mxu0 %v2815_v18  ;;  %2511 = vmatprep.mubr.msk.bf16.mxu0 %vm2863_vm0, %v2862_v1  ;;  %v588_v53 = vrot.slane %v2287_v51, 1  ;;  %v592_v60 = vsel %vm587_vm3, %v589_v54, %v591_v58  ;;  %v597_v2 = vrot.slane %v2946_v11, 1  ;;  %v599_v4 = vrot.slane %v2959_v20, 1 }
  0x1b   : > { %2569 = vmatprep.subr.bf16.mxu0 %v2862_v1  ;;  %2527 = vmatprep.mubr.msk.bf16.mxu1 %vm2863_vm0, %v2862_v1  ;;  %v318_v50 = vsel %vm282_vm1, %v313_v48, %v317_v22  ;;  %v594_v62 = vsel %vm587_vm3, %v591_v58, %v593_v61  ;;  %v596_v0 = vsel %vm587_vm3, %v593_v61, %v595_v63  ;;  %v2830_v22 = vld [vmem:[%s3726_s1 + $0x58] sm:$0xff]   ;;  %v961_v26 = vshrl.u32 %v3103_v23, 16 }
  0x1c   : > { %2537 = vmatprep.subr.bf16.mxu1 %v2862_v1  ;;  %v590_v56 = vsel %vm587_vm3, %v588_v53, %v589_v54  ;;  %v598_v3 = vsel %vm587_vm3, %v595_v63, %v597_v2  ;;  %v600_v7 = vsel %vm587_vm3, %v597_v2, %v599_v4  ;;  %v964_v27 = vshll.u32 %v3103_v23, 16  ;;  %v3158_v54 = vld [vmem:[%s2927_s26 + $0x2c] sm:$0xff]  }
  0x1d   : > { %2538 = vmatpush3.bf16.msra.mxu1 %v2821_v37  ;;  %v789_v28 = vrot.slane %v3103_v23, 1  ;;  %v963_v32 = vrot.slane %v961_v26, 1  ;;  %v970_v37 = vshrl.u32 %v3124_v35, 16  ;;  %v973_v38 = vshll.u32 %v3124_v35, 16  ;;  %v2848_v26 = vld [vmem:[%s3726_s1 + $0x70] sm:$0xff]  }
  0x1e   : > { %2570 = vmatpush3.bf16.msra.mxu0 %v2820_v34  ;;  %2599 = vmatprep.subr.bf16.mxu1 %v2862_v1  ;;  %v966_v33 = vrot.slane %v964_v27, 2  ;;  %v795_v58 = vrot.slane %v3158_v54, 1  ;;  %v2844_v27 = vld [vmem:[%s3726_s1 + $0x88] sm:$0xff]   ;;  %vm2168_vm9 = vcmask 158721   ;;  %vm2169_vm10 = vsmask.f32 7942 }
  0x1f   : > { %2631 = vmatprep.subr.bf16.mxu0 %v2862_v1  ;;  %v972_v42 = vrot.slane %v970_v37, 1  ;;  %v975_v43 = vrot.slane %v973_v38, 2  ;;  %v3293_v38 = vld [vmem:[%s2927_s26 + $0x20] sm:$0xff]   ;;  %vm3624_vm11 = vmand %vm2168_vm9, %vm2169_vm10  ;;  %vm2024_vm12 = vsmask.f32 1280  ;;  %vm2185_vm15 = vcmask 157696  }
  0x20   : > { %2528 = vmatmul.mubr.msk.bf16.gmra.mxu1 %vm350_vm2, %v334_v41  ;;  %v967_v36 = vor.u32 %v966_v33, %v963_v32  ;;  %v2849_v33 = vld [vmem:[%s3726_s1 + $0x80] sm:$0xff]   ;;  %vm2025_vm13 = vsmask.f32 5392 }
  0x21   : > { %2512 = vmatmul.mubr.msk.bf16.gmra.mxu0 %vm350_vm2, %v302_v40  ;;  %2531 = vmatprep.mubr.msk.bf16.mxu1 %vm2863_vm0, %v2862_v1  ;;  %v791_v40 = vrot.slane %v3124_v35, 1  ;;  %v976_v46 = vor.u32 %v975_v43, %v972_v42  ;;  %v1879_v42 = vld [vmem:[%s3729_s4 + $0x10] sm:$0xff]  ;;  %v1880_v43 = vld [vmem:[%s3729_s4 + $0x18] sm:$0xff]  ;;  %vm3637_vm14 = vmor %vm2024_vm12, %vm2025_vm13 }
  0x22   : > { %2515 = vmatprep.mubr.msk.bf16.mxu0 %vm2863_vm0, %v2862_v1 }
  0x23   : > { %v792_v44 = vsel %vm587_vm3, %v789_v28, %v791_v40 }
  0x28   : > { %2532 = vmatmul.mubr.msk.bf16.gmra.mxu1 %vm350_vm2, %v337_v47 }
  0x29   : > { %2516 = vmatmul.mubr.msk.bf16.gmra.mxu0 %vm350_vm2, %v310_v45  ;;  %2539 = vmatprep.mubr.msk.bf16.mxu1 %vm2863_vm0, %v2862_v1  ;;  %v3144_v45 = vld [vmem:[%s2927_s26 + $0x24] sm:$0xff]  }
  0x2a   : > { %2519 = vmatprep.mubr.msk.bf16.mxu0 %vm2863_vm0, %v2862_v1  ;;  %v979_v47 = vshrl.u32 %v3144_v45, 16  ;;  %v982_v48 = vshll.u32 %v3144_v45, 16  ;;  %v793_v49 = vrot.slane %v3144_v45, 1 }
  0x2c   : > { %v981_v51 = vrot.slane %v979_v47, 1  ;;  %v794_v53 = vsel %vm587_vm3, %v791_v40, %v793_v49  ;;  %v796_v63 = vsel %vm587_vm3, %v793_v49, %v795_v58  ;;  %v1878_v40 = vld [vmem:[%s3729_s4 + $0x8] sm:$0xff] }
  0x30   : > { %2540 = vmatmul.mubr.msk.bf16.vlgmr.msra.gmra.mxu1 %vm350_vm2, %v2934_v5  ;;  %v735_v5 = vld [vmem:[%s2927_s26 + $0x4] sm:$0xe] }
  0x31   : > { %2520 = vmatmul.mubr.msk.bf16.gmra.mxu0 %vm350_vm2, %v318_v50  ;;  %2600 = vmatpush3.bf16.msra.mxu1 %v2822_v52  ;;  %v977_v50 = vsel %vm942_vm4, %v967_v36, %v976_v46  ;;  %v984_v52 = vrot.slane %v982_v48, 2  ;;  %v1881_v48 = vld [vmem:[%s3729_s4 + $0x20] sm:$0xff] }
  0x32   : > { %2571 = vmatprep.mubr.msk.bf16.mxu0 %vm2863_vm0, %v2862_v1  ;;  %2543 = vmatprep.mubr.msk.bf16.mxu1 %vm2863_vm0, %v2862_v1 }
  0x33   : > { %2601 = vmatprep.subr.bf16.mxu1 %v2862_v1 }
  0x35   : > { %2602 = vmatpush3.bf16.msra.mxu1 %v2825_v55  ;;  %v985_v55 = vor.u32 %v984_v52, %v981_v51  ;;  %v1884_v51 = vld [vmem:[%s3729_s4 + $0x38] sm:$0xff]  ;;  %v1883_v52 = vld [vmem:[%s3729_s4 + $0x30] sm:$0xff] }
  0x36   : > { %2663 = vmatprep.subr.bf16.mxu1 %v2862_v1 }
  0x38   : > { %2544 = vmatmul.mubr.msk.bf16.gmra.mxu1 %vm350_vm2, %v2937_v6  ;;  %v3081_v6 = vld [vmem:[%s2927_s26 + $0x8] sm:$0xf] }
  0x39   : > { %2572 = vmatmul.mubr.msk.bf16.vlgmr.msra.gmra.mxu0 %vm350_vm2, %v590_v56  ;;  %2547 = vmatprep.mubr.msk.bf16.mxu1 %vm2863_vm0, %v2862_v1  ;;  %v2301_v9 = vcombine.low %v735_v5, %v3081_v6  ;;  %v988_v56 = vshrl.u32 %v3158_v54, 16 }
  0x3a   : > { %2632 = vmatpush3.bf16.msra.mxu0 %v2824_v57  ;;  %2575 = vmatprep.mubr.msk.bf16.mxu0 %vm2863_vm0, %v2862_v1  ;;  %v991_v57 = vshll.u32 %v3158_v54, 16 }
  0x3b   : > { %2633 = vmatprep.subr.bf16.mxu0 %v2862_v1  ;;  %v786_v15 = vrot.slane %v2301_v9, 1 }
  0x3c   : > { %v993_v61 = vrot.slane %v991_v57, 2  ;;  %v1885_v57 = vld [vmem:[%s3729_s4 + $0x40] sm:$0xff] }
  0x3e   : > { %2634 = vmatpush3.bf16.msra.mxu0 %v2826_v59  ;;  %v986_v59 = vsel %vm942_vm4, %v976_v46, %v985_v55  ;;  %v3315_v46 = vld [vmem:[%s2927_s26 + $0x28] sm:$0xff]  }
  0x3f   : > { %2695 = vmatprep.subr.bf16.mxu0 %v2862_v1  ;;  %v1354_v49 = vrot.slane %v3315_v46, 2 }
  0x40   : > { %2548 = vmatmul.mubr.msk.bf16.gmra.mxu1 %vm350_vm2, %v2949_v12  ;;  %v947_v12 = vshll.u32 %v2301_v9, 16 }
  0x41   : > { %2576 = vmatmul.mubr.msk.bf16.gmra.mxu0 %vm350_vm2, %v592_v60  ;;  %2551 = vmatprep.mubr.msk.bf16.mxu1 %vm2863_vm0, %v2862_v1  ;;  %v990_v60 = vrot.slane %v988_v56, 1 }
  0x42   : > { %2579 = vmatprep.mubr.msk.bf16.mxu0 %vm2863_vm0, %v2862_v1  ;;  %v949_v18 = vrot.slane %v947_v12, 2 }
  0x43   : > { %v994_v2 = vor.u32 %v993_v61, %v990_v60  ;;  %v1889_v60 = vld [vmem:[%s3729_s4 + $0x60] sm:$0x3]  ;;  %v1887_v61 = vld [vmem:[%s3729_s4 + $0x50] sm:$0xff] }
  0x48   : > { %2552 = vmatmul.mubr.msk.bf16.gmra.mxu1 %vm350_vm2, %v2970_v30 }
  0x49   : > { %2580 = vmatmul.mubr.msk.bf16.gmra.mxu0 %vm350_vm2, %v594_v62  ;;  %2555 = vmatprep.mubr.msk.bf16.mxu1 %vm2863_vm0, %v2862_v1  ;;  %v3171_v62 = vld [vmem:[%s2927_s26 + $0x34] ss:$0 sps:$4 sm:$0x77]  }
  0x4a   : > { %2583 = vmatprep.mubr.msk.bf16.mxu0 %vm2863_vm0, %v2862_v1 }
  0x50   : > { %2556 = vmatmul.mubr.msk.bf16.gmra.mxu1 %vm350_vm2, %v2943_v10  ;;  %v3087_v10 = vld [vmem:[%s2927_s26 + $0xc] sm:$0xff]  }
  0x51   : > { %2584 = vmatmul.mubr.msk.bf16.gmra.mxu0 %vm350_vm2, %v596_v0  ;;  %2559 = vmatprep.mubr.msk.bf16.mxu1 %vm2863_vm0, %v2862_v1  ;;  %v952_v13 = vshrl.u32 %v3087_v10, 16  ;;  %v955_v14 = vshll.u32 %v3087_v10, 16  ;;  %v787_v16 = vrot.slane %v3087_v10, 1  ;;  %v2838_v0 = vld [vmem:[%s2927_s26 + $0x34] ss:$0 sps:$4 sm:$0x33]  }
  0x52   : > { %2587 = vmatprep.mubr.msk.bf16.mxu0 %vm2863_vm0, %v2862_v1  ;;  %v797_v5 = vrot.slane %v2838_v0, 1  ;;  %v2851_v0 = vld [vmem:[%s2927_s26 + $0x38] ss:$0 sps:$4 sm:$0x77]  }
  0x53   : > { %v954_v19 = vrot.slane %v952_v13, 1  ;;  %v957_v20 = vrot.slane %v955_v14, 2  ;;  %v788_v21 = vsel %vm587_vm3, %v786_v15, %v787_v16  ;;  %v790_v34 = vsel %vm587_vm3, %v787_v16, %v789_v28  ;;  %v1139_v13 = vld [vmem:[%s2927_s26 + $0x4] sm:$0xc]  ;;  %v1296_v16 = vld [vmem:[%s2927_s26 + $0x8] sm:$0xc] }
  0x54   : > { %v2335_v15 = vcombine.low %v1139_v13, %v3081_v6  ;;  %v3240_v28 = vld [vmem:[%s2927_s26 + $0x18] sm:$0xff]  }
  0x55   : > { %v958_v25 = vor.u32 %v957_v20, %v954_v19  ;;  %v1150_v19 = vrot.slane %v3087_v10, 2  ;;  %v3209_v20 = vld [vmem:[%s2927_s26 + $0x10] sm:$0xff]   ;;  %v1350_v32 = vrot.slane %v3240_v28, 2 }
  0x57   : > { %v968_v41 = vsel %vm942_vm4, %v958_v25, %v967_v36  ;;  %v1877_v36 = vld [vmem:[%s3729_s4] sm:$0xff] }
  0x58   : > { %2560 = vmatmul.mubr.msk.bf16.gmra.mxu1 %vm350_vm2, %v2946_v11  ;;  %v944_v11 = vshrl.u32 %v2301_v9, 16 }
  0x59   : > { %2588 = vmatmul.mubr.msk.bf16.gmra.mxu0 %vm350_vm2, %v598_v3  ;;  %2563 = vmatprep.mubr.msk.bf16.mxu1 %vm2863_vm0, %v2862_v1  ;;  %v997_v3 = vshrl.u32 %v3171_v62, 16 }
  0x5a   : > { %2591 = vmatprep.mubr.msk.bf16.mxu0 %vm2863_vm0, %v2862_v1  ;;  %v946_v17 = vrot.slane %v944_v11, 1  ;;  %v798_v11 = vsel %vm587_vm3, %v795_v58, %v797_v5 }
  0x5c   : > { %v950_v24 = vor.u32 %v949_v18, %v946_v17  ;;  %v3200_v17 = vld [vmem:[%s2927_s26 + $0xc] sm:$0xf]  ;;  %v1149_v18 = vrot.slane %v2335_v15, 2 }
  0x5d   : > { %v3206_v6 = vcombine.low %v1296_v16, %v3200_v17 }
  0x5e   : > { %v959_v30 = vsel %vm942_vm4, %v950_v24, %v958_v25  ;;  %v1348_v24 = vrot.slane %v3209_v20, 2  ;;  %v1152_v25 = vrot.slane %v3103_v23, 2 }
  0x5f   : > { %v1347_v10 = vrot.slane %v3206_v6, 2 }
  0x60   : > { %2564 = vmatmul.mubr.msk.bf16.gmra.mxu1 %vm350_vm2, %v2827_v8  ;;  %v999_v8 = vrot.slane %v997_v3, 1  ;;  %v1351_v37 = vsel %vm1148_vm5, %v1348_v24, %v1350_v32  ;;  %v1505_v3 = vshrl.u32 %v3206_v6, 16 }
  0x61   : > { %2592 = vmatmul.mubr.msk.bf16.gmra.mxu0 %vm350_vm2, %v600_v7  ;;  %2603 = vmatprep.mubr.msk.bf16.mxu1 %vm2863_vm0, %v2862_v1  ;;  %v995_v7 = vsel %vm942_vm4, %v985_v55, %v994_v2  ;;  %v1349_v23 = vsel %vm1148_vm5, %v1347_v10, %v1348_v24  ;;  %v3340_v55 = vld [vmem:[%s2927_s26 + $0x30] sm:$0xff]  }
  0x62   : > { %2595 = vmatprep.mubr.msk.bf16.mxu0 %vm2863_vm0, %v2862_v1  ;;  %v1356_v58 = vrot.slane %v3340_v55, 2 }
  0x68   : > { %2604 = vmatmul.mubr.msk.bf16.vlgmr.msra.gmra.mxu1 %vm350_vm2, %v788_v21  ;;  %v1151_v21 = vsel %vm1148_vm5, %v1149_v18, %v1150_v19  ;;  %v1522_v18 = vshrl.u32 %v3240_v28, 16 }
  0x69   : > { %2596 = vmatmul.mubr.msk.bf16.gmra.mxu0 %vm350_vm2, %v599_v4  ;;  %2664 = vmatpush3.bf16.msra.mxu1 %v2830_v22  ;;  %v1000_v4 = vshll.u32 %v3171_v62, 16  ;;  %v2841_v22 = vld [vmem:[%s3726_s1 + $0x78] sm:$0xff]  }
  0x6a   : > { %2635 = vmatprep.mubr.msk.bf16.mxu0 %vm2863_vm0, %v2862_v1  ;;  %2607 = vmatprep.mubr.msk.bf16.mxu1 %vm2863_vm0, %v2862_v1 }
  0x6b   : > { %2665 = vmatprep.subr.bf16.mxu1 %v2862_v1  ;;  %v1002_v9 = vrot.slane %v1000_v4, 2  ;;  %v1508_v4 = vshll.u32 %v3206_v6, 16 }
  0x6d   : > { %2666 = vmatpush3.bf16.msra.mxu1 %v2836_v29  ;;  %v1003_v12 = vor.u32 %v1002_v9, %v999_v8  ;;  %v2864_v29 = vmov 0   ;;  %v1507_v9 = vrot.slane %v1505_v3, 2 }
  0x6e   : > { %2727 = vmatprep.subr.bf16.mxu1 %v2862_v1  ;;  %2807 = vset.pattern.permute.xlu0 %v2864_v29  ;;  %1969 = vst.msk [vmem:[%s3233_s10] sm:$0xf] %vm1968_vm6, %v2864_v29  ;;  %1983 = vst.msk [vmem:[%s3233_s10 + $0x38] sm:$0xf] %vm1968_vm6, %v2864_v29 }
  0x6f   : > { %v1004_v14 = vsel %vm942_vm4, %v994_v2, %v1003_v12  ;;  %1970 = vst.msk [vmem:[%s3233_s10 + $0x4] sm:$0xf] %vm1968_vm6, %v2864_v29  ;;  %1971 = vst.msk [vmem:[%s3233_s10 + $0x8] sm:$0xf] %vm1968_vm6, %v2864_v29  ;;  %2808 = vset.pattern.permute.xlu1 %v2864_v29 }
  0x70   : > { %2608 = vmatmul.mubr.msk.bf16.gmra.mxu1 %vm350_vm2, %v790_v34  ;;  %1972 = vst.msk [vmem:[%s3233_s10 + $0xc] sm:$0xf] %vm1968_vm6, %v2864_v29  ;;  %1973 = vst.msk [vmem:[%s3233_s10 + $0x10] sm:$0xf] %vm1968_vm6, %v2864_v29  ;;  %v1154_v34 = vrot.slane %v3124_v35, 2  ;;  %1897 = vperm.xlu1 %2808, %v1878_v40   ;;  %v1352_v35 = vrot.slane %v3293_v38, 2 }
  0x71   : > { %2636 = vmatmul.mubr.msk.bf16.vlgmr.msra.gmra.mxu0 %vm350_vm2, %v959_v30  ;;  %2611 = vmatprep.mubr.msk.bf16.mxu1 %vm2863_vm0, %v2862_v1  ;;  %1974 = vst.msk [vmem:[%s3233_s10 + $0x14] sm:$0xf] %vm1968_vm6, %v2864_v29  ;;  %1975 = vst.msk [vmem:[%s3233_s10 + $0x18] sm:$0xf] %vm1968_vm6, %v2864_v29  ;;  %v1888_v30 = vld [vmem:[%s3729_s4 + $0x58] sm:$0xff] }
  0x72   : > { %2696 = vmatpush3.bf16.msra.mxu0 %v2832_v31  ;;  %2639 = vmatprep.mubr.msk.bf16.mxu0 %vm2863_vm0, %v2862_v1  ;;  %1976 = vst.msk [vmem:[%s3233_s10 + $0x1c] sm:$0xf] %vm1968_vm6, %v2864_v29  ;;  %1977 = vst.msk [vmem:[%s3233_s10 + $0x20] sm:$0xf] %vm1968_vm6, %v2864_v29  ;;  %v1153_v31 = vsel %vm1148_vm5, %v1150_v19, %v1152_v25  ;;  %v1525_v19 = vshll.u32 %v3240_v28, 16 }
  0x73   : > { %2697 = vmatprep.subr.bf16.mxu0 %v2862_v1  ;;  %1978 = vst.msk [vmem:[%s3233_s10 + $0x24] sm:$0xf] %vm1968_vm6, %v2864_v29  ;;  %1979 = vst.msk [vmem:[%s3233_s10 + $0x28] sm:$0xf] %vm1968_vm6, %v2864_v29  ;;  %1947 = vperm.xlu0 %2807, %v1888_v30   ;;  %v1534_v30 = vshll.u32 %v3293_v38, 16 }
  0x74   : > { %1980 = vst.msk [vmem:[%s3233_s10 + $0x2c] sm:$0xf] %vm1968_vm6, %v2864_v29  ;;  %1981 = vst.msk [vmem:[%s3233_s10 + $0x30] sm:$0xf] %vm1968_vm6, %v2864_v29  ;;  %1902 = vperm.xlu1 %2808, %v1879_v42   ;;  %v1527_v10 = vrot.slane %v1525_v19, 3 }
  0x75   : > { %1982 = vst.msk [vmem:[%s3233_s10 + $0x34] sm:$0xf] %vm1968_vm6, %v2864_v29  ;;  %v1531_v29 = vshrl.u32 %v3293_v38, 16 }
  0x76   : > { %2698 = vmatpush3.bf16.msra.mxu0 %v2837_v39  ;;  %v1155_v39 = vsel %vm1148_vm5, %v1152_v25, %v1154_v34 }
  0x77   : > { %2759 = vmatprep.subr.bf16.mxu0 %v2862_v1  ;;  %1892 = vperm.xlu0 %2807, %v1877_v36  }
  0x78   : > { %2612 = vmatmul.mubr.msk.bf16.gmra.mxu1 %vm350_vm2, %v792_v44  ;;  %v1353_v44 = vsel %vm1148_vm5, %v1350_v32, %v1352_v35  ;;  %1912 = vperm.xlu1 %2808, %v1881_v48  }
  0x79   : > { %2640 = vmatmul.mubr.msk.bf16.gmra.mxu0 %vm350_vm2, %v968_v41  ;;  %2615 = vmatprep.mubr.msk.bf16.mxu1 %vm2863_vm0, %v2862_v1  ;;  %v1156_v41 = vrot.slane %v3144_v45, 2  ;;  %v1882_v45 = vld [vmem:[%s3729_s4 + $0x28] sm:$0xff] }
  0x7a   : > { %2643 = vmatprep.mubr.msk.bf16.mxu0 %vm2863_vm0, %v2862_v1 }
  0x7b   : > { %1907 = vperm.xlu0 %2807, %v1880_v43   ;;  %v1157_v47 = vsel %vm1148_vm5, %v1154_v34, %v1156_v41 }
  0x7c   : > { %1922 = vperm.xlu1 %2808, %v1883_v52  }
  0x7f   : > { %1917 = vperm.xlu0 %2807, %v1882_v45   ;;  %v1543_v45 = vshll.u32 %v3315_v46, 16 }
  0x80   : > { %2616 = vmatmul.mubr.msk.bf16.gmra.mxu1 %vm350_vm2, %v794_v53  ;;  %v1355_v53 = vsel %vm1148_vm5, %v1352_v35, %v1354_v49  ;;  %1932 = vperm.xlu1 %2808, %v1885_v57  }
  0x81   : > { %2644 = vmatmul.mubr.msk.bf16.gmra.mxu0 %vm350_vm2, %v977_v50  ;;  %2619 = vmatprep.mubr.msk.bf16.mxu1 %vm2863_vm0, %v2862_v1  ;;  %v1158_v50 = vrot.slane %v3158_v54, 2  ;;  %v1886_v54 = vld [vmem:[%s3729_s4 + $0x48] sm:$0xff] }
  0x82   : > { %2647 = vmatprep.mubr.msk.bf16.mxu0 %vm2863_vm0, %v2862_v1 }
  0x83   : > { %1927 = vperm.xlu0 %2807, %v1884_v51   ;;  %v1159_v56 = vsel %vm1148_vm5, %v1156_v41, %v1158_v50  ;;  %v1713_v41 = vrot.slane %v3240_v28, 3 }
  0x84   : > { %1942 = vperm.xlu1 %2808, %v1887_v61  }
  0x87   : > { %1937 = vperm.xlu0 %2807, %v1886_v54  }
  0x88   : > { %2620 = vmatmul.mubr.msk.bf16.gmra.mxu1 %vm350_vm2, %v796_v63  ;;  %v1357_v63 = vsel %vm1148_vm5, %v1354_v49, %v1356_v58 }
  0x89   : > { %2648 = vmatmul.mubr.msk.bf16.gmra.mxu0 %vm350_vm2, %v986_v59  ;;  %2623 = vmatprep.mubr.msk.bf16.mxu1 %vm2863_vm0, %v2862_v1  ;;  %v1160_v59 = vrot.slane %v3171_v62, 2  ;;  %v1358_v62 = vrot.slane %v2851_v0, 2  ;;  %v1552_v0 = vshll.u32 %v3340_v55, 16 }
  0x8a   : > { %2651 = vmatprep.mubr.msk.bf16.mxu0 %vm2863_vm0, %v2862_v1 }
  0x8b   : > { %1952 = vperm.xlu0 %2807, %v1889_v60   ;;  %v1161_v2 = vsel %vm1148_vm5, %v1158_v50, %v1160_v59  ;;  %v1359_v8 = vsel %vm1148_vm5, %v1356_v58, %v1358_v62  ;;  %v1715_v58 = vrot.slane %v3293_v38, 3 }
  0x8d   : > { %v1716_v3 = vsel %vm1709_vm8, %v1713_v41, %v1715_v58 }
  0x90   : > { %2624 = vmatmul.mubr.msk.bf16.gmra.mxu1 %vm350_vm2, %v798_v11  ;;  %v1510_v11 = vrot.slane %v1508_v4, 3 }
  0x91   : > { %2652 = vmatmul.mubr.msk.bf16.gmra.mxu0 %vm350_vm2, %v995_v7  ;;  %2627 = vmatprep.mubr.msk.bf16.mxu1 %vm2863_vm0, %v2862_v1  ;;  %v1516_v7 = vshll.u32 %v3209_v20, 16 }
  0x92   : > { %2655 = vmatprep.mubr.msk.bf16.mxu0 %vm2863_vm0, %v2862_v1  ;;  %v1511_v15 = vor.u32 %v1510_v11, %v1507_v9  ;;  %v3444_v9 = vld [vmem:[%s2927_s26 + $0x38] ss:$0 sps:$4 sm:$0xff]  }
  0x93   : > { %v1518_v13 = vrot.slane %v1516_v7, 3  ;;  %v1558_v19 = vshrl.u32 %v3444_v9, 16 }
  0x98   : > { %2628 = vmatmul.mubr.msk.bf16.gmra.mxu1 %vm350_vm2, %v797_v5  ;;  %v1513_v5 = vshrl.u32 %v3209_v20, 16 }
  0x99   : > { %2656 = vmatmul.mubr.msk.bf16.gmra.mxu0 %vm350_vm2, %v1004_v14  ;;  %2667 = vmatprep.mubr.msk.bf16.mxu1 %vm2863_vm0, %v2862_v1  ;;  %v1700_v14 = vld [vmem:[%s2927_s26 + $0x8] sm:$0x8] }
  0x9a   : > { %2659 = vmatprep.mubr.msk.bf16.mxu0 %vm2863_vm0, %v2862_v1  ;;  %v2383_v6 = vcombine.low %v1700_v14, %v3200_v17 }
  0x9c   : > { %v1710_v25 = vrot.slane %v2383_v6, 3  ;;  %v1561_v6 = vshll.u32 %v3444_v9, 16 }
  0xa0   : > { %2668 = vmatmul.mubr.msk.bf16.vlgmr.msra.gmra.mxu1 %vm350_vm2, %v1151_v21 }
  0xa1   : > { %2660 = vmatmul.mubr.msk.bf16.gmra.mxu0 %vm350_vm2, %v1003_v12  ;;  %2728 = vmatpush3.bf16.msra.mxu1 %v2841_v22  ;;  %v1515_v12 = vrot.slane %v1513_v5, 2  ;;  %v1524_v22 = vrot.slane %v1522_v18, 2 }
  0xa2   : > { %2699 = vmatprep.mubr.msk.bf16.mxu0 %vm2863_vm0, %v2862_v1  ;;  %2671 = vmatprep.mubr.msk.bf16.mxu1 %vm2863_vm0, %v2862_v1 }
  0xa3   : > { %2729 = vmatprep.subr.bf16.mxu1 %v2862_v1  ;;  %v1519_v16 = vor.u32 %v1518_v13, %v1515_v12  ;;  %v1528_v17 = vor.u32 %v1527_v10, %v1524_v22  ;;  %v1717_v13 = vrot.slane %v3315_v46, 3 }
  0xa5   : > { %2730 = vmatpush3.bf16.msra.mxu1 %v2848_v26  ;;  %v1520_v21 = vsel %vm1503_vm7, %v1511_v15, %v1519_v16  ;;  %v1711_v26 = vrot.slane %v3209_v20, 3  ;;  %v1529_v36 = vsel %vm1503_vm7, %v1519_v16, %v1528_v17  ;;  %v1718_v10 = vsel %vm1709_vm8, %v1715_v58, %v1717_v13 }
  0xa7   : > { %v1714_v50 = vsel %vm1709_vm8, %v1711_v26, %v1713_v41 }
  0xa8   : > { %2672 = vmatmul.mubr.msk.bf16.gmra.mxu1 %vm350_vm2, %v1153_v31 }
  0xa9   : > { %2700 = vmatmul.mubr.msk.bf16.vlgmr.msra.gmra.mxu0 %vm350_vm2, %v1349_v23  ;;  %2675 = vmatprep.mubr.msk.bf16.mxu1 %vm2863_vm0, %v2862_v1 }
  0xaa   : > { %2760 = vmatpush3.bf16.msra.mxu0 %v2844_v27  ;;  %2703 = vmatprep.mubr.msk.bf16.mxu0 %vm2863_vm0, %v2862_v1 }
  0xab   : > { %2761 = vmatprep.subr.bf16.mxu0 %v2862_v1 }
  0xae   : > { %2762 = vmatpush3.bf16.msra.mxu0 %v2849_v33  ;;  %v1712_v33 = vsel %vm1709_vm8, %v1710_v25, %v1711_v26 }
  0xb0   : > { %2676 = vmatmul.mubr.msk.bf16.gmra.mxu1 %vm350_vm2, %v1155_v39  ;;  %v1536_v39 = vrot.slane %v1534_v30, 3 }
  0xb1   : > { %2704 = vmatmul.mubr.msk.bf16.gmra.mxu0 %vm350_vm2, %v1351_v37  ;;  %2679 = vmatprep.mubr.msk.bf16.mxu1 %vm2863_vm0, %v2862_v1  ;;  %v1533_v37 = vrot.slane %v1531_v29, 2 }
  0xb2   : > { %2707 = vmatprep.mubr.msk.bf16.mxu0 %vm2863_vm0, %v2862_v1 }
  0xb8   : > { %2680 = vmatmul.mubr.msk.bf16.gmra.mxu1 %vm350_vm2, %v1157_v47  ;;  %v1540_v47 = vshrl.u32 %v3315_v46, 16 }
  0xb9   : > { %2708 = vmatmul.mubr.msk.bf16.gmra.mxu0 %vm350_vm2, %v1353_v44  ;;  %2683 = vmatprep.mubr.msk.bf16.mxu1 %vm2863_vm0, %v2862_v1  ;;  %v1537_v44 = vor.u32 %v1536_v39, %v1533_v37 }
  0xba   : > { %2711 = vmatprep.mubr.msk.bf16.mxu0 %vm2863_vm0, %v2862_v1 }
  0xbb   : > { %v1538_v52 = vsel %vm1503_vm7, %v1528_v17, %v1537_v44  ;;  %v1560_v17 = vrot.slane %v1558_v19, 2 }
  0xc0   : > { %2684 = vmatmul.mubr.msk.bf16.gmra.mxu1 %vm350_vm2, %v1159_v56  ;;  %v1545_v56 = vrot.slane %v1543_v45, 3 }
  0xc1   : > { %2712 = vmatmul.mubr.msk.bf16.gmra.mxu0 %vm350_vm2, %v1355_v53  ;;  %2687 = vmatprep.mubr.msk.bf16.mxu1 %vm2863_vm0, %v2862_v1  ;;  %v1542_v53 = vrot.slane %v1540_v47, 2 }
  0xc2   : > { %2715 = vmatprep.mubr.msk.bf16.mxu0 %vm2863_vm0, %v2862_v1 }
  0xc3   : > { %v1546_v61 = vor.u32 %v1545_v56, %v1542_v53 }
  0xc5   : > { %v1547_v5 = vsel %vm1503_vm7, %v1537_v44, %v1546_v61 }
  0xc8   : > { %2688 = vmatmul.mubr.msk.bf16.gmra.mxu1 %vm350_vm2, %v1161_v2 }
  0xc9   : > { %2716 = vmatmul.mubr.msk.bf16.gmra.mxu0 %vm350_vm2, %v1357_v63  ;;  %2691 = vmatprep.mubr.msk.bf16.mxu1 %vm2863_vm0, %v2862_v1  ;;  %v1549_v63 = vshrl.u32 %v3340_v55, 16 }
  0xca   : > { %2719 = vmatprep.mubr.msk.bf16.mxu0 %vm2863_vm0, %v2862_v1 }
  0xcb   : > { %v1551_v7 = vrot.slane %v1549_v63, 2 }
  0xd0   : > { %2692 = vmatmul.mubr.msk.bf16.gmra.mxu1 %vm350_vm2, %v1160_v59 }
  0xd1   : > { %2720 = vmatmul.mubr.msk.bf16.gmra.mxu0 %vm350_vm2, %v1359_v8  ;;  %2731 = vmatprep.mubr.msk.bf16.mxu1 %vm2863_vm0, %v2862_v1  ;;  %v1554_v8 = vrot.slane %v1552_v0, 3 }
  0xd2   : > { %2723 = vmatprep.mubr.msk.bf16.mxu0 %vm2863_vm0, %v2862_v1 }
  0xd3   : > { %v1555_v18 = vor.u32 %v1554_v8, %v1551_v7 }
  0xd8   : > { %v3394_v23 = vpop.f32.mrf.mxu1  ;;  %2732 = vmatmul.mubr.msk.bf16.vlgmr.msra.gmra.mxu1 %vm350_vm2, %v1520_v21 }
  0xd9   : > { %v3388_v24 = vpop.f32.mrf.mxu0  ;;  %2724 = vmatmul.mubr.msk.bf16.gmra.mxu0 %vm350_vm2, %v1358_v62  ;;  %2735 = vmatprep.mubr.msk.bf16.mxu1 %vm2863_vm0, %v2862_v1 }
  0xda   : > { %2763 = vmatprep.mubr.msk.bf16.mxu0 %vm2863_vm0, %v2862_v1  ;;  %v2525_v31 = vpop.f32.mrf.mxu1 }
  0xdb   : > { %v2509_v27 = vpop.f32.mrf.mxu0 }
  0xdc   : > { %v3404_v20 = vpop.f32.mrf.mxu1  ;;  %v1556_v27 = vsel %vm1503_vm7, %v1546_v61, %v1555_v18 }
  0xdd   : > { %v3401_v32 = vpop.f32.mrf.mxu0 }
  0xde   : > { %v2526_v40 = vpop.f32.mrf.mxu1 }
  0xdf   : > { %v2510_v34 = vpop.f32.mrf.mxu0 }
  0xe0   : > { %v3413_v42 = vpop.f32.mrf.mxu1  ;;  %2736 = vmatmul.mubr.msk.bf16.gmra.mxu1 %vm350_vm2, %v1529_v36 }
  0xe1   : > { %v3407_v35 = vpop.f32.mrf.mxu0  ;;  %2764 = vmatmul.mubr.msk.bf16.vlgmr.msra.gmra.mxu0 %vm350_vm2, %v1712_v33  ;;  %2739 = vmatprep.mubr.msk.bf16.mxu1 %vm2863_vm0, %v2862_v1  ;;  %v1719_v33 = vrot.slane %v3340_v55, 3 }
  0xe2   : > { %2767 = vmatprep.mubr.msk.bf16.mxu0 %vm2863_vm0, %v2862_v1  ;;  %v2529_v48 = vpop.f32.mrf.mxu1 }
  0xe3   : > { %v2513_v43 = vpop.f32.mrf.mxu0 }
  0xe4   : > { %v3423_v51 = vpop.f32.mrf.mxu1  ;;  %v1720_v43 = vsel %vm1709_vm8, %v1717_v13, %v1719_v33 }
  0xe5   : > { %v3420_v49 = vpop.f32.mrf.mxu0 }
  0xe6   : > { %v2530_v54 = vpop.f32.mrf.mxu1 }
  0xe7   : > { %v2514_v28 = vpop.f32.mrf.mxu0 }
  0xe8   : > { %v3432_v59 = vpop.f32.mrf.mxu1  ;;  %2740 = vmatmul.mubr.msk.bf16.gmra.mxu1 %vm350_vm2, %v1538_v52  ;;  %v1721_v28 = vrot.slane %v3444_v9, 3 }
  0xe9   : > { %v3426_v57 = vpop.f32.mrf.mxu0  ;;  %2768 = vmatmul.mubr.msk.bf16.gmra.mxu0 %vm350_vm2, %v1714_v50  ;;  %2743 = vmatprep.mubr.msk.bf16.mxu1 %vm2863_vm0, %v2862_v1 }
  0xea   : > { %2771 = vmatprep.mubr.msk.bf16.mxu0 %vm2863_vm0, %v2862_v1  ;;  %v2533_v2 = vpop.f32.mrf.mxu1 }
  0xeb   : > { %v2517_v60 = vpop.f32.mrf.mxu0 }
  0xec   : > { %v457_v38 = vpop.f32.mrf.mxu1  ;;  %v1722_v60 = vsel %vm1709_vm8, %v1719_v33, %v1721_v28 }
  0xed   : > { %v3439_v62 = vpop.f32.mrf.mxu0 }
  0xee   : > { %v2534_v11 = vpop.f32.mrf.mxu1 }
  0xef   : > { %v2518_v4 = vpop.f32.mrf.mxu0 }
  0xf0   : > { %v524_v14 = vpop.f32.mrf.mxu1  ;;  %2744 = vmatmul.mubr.msk.bf16.gmra.mxu1 %vm350_vm2, %v1547_v5 }
  0xf1   : > { %v3446_v12 = vpop.f32.mrf.mxu0  ;;  %2772 = vmatmul.mubr.msk.bf16.gmra.mxu0 %vm350_vm2, %v1716_v3  ;;  %v525_v16 = vadd.f32 %v524_v14, %v3388_v24  ;;  %2747 = vmatprep.mubr.msk.bf16.mxu1 %vm2863_vm0, %v2862_v1  ;;  %v1563_v24 = vrot.slane %v1561_v6, 3 }
  0xf2   : > { %2775 = vmatprep.mubr.msk.bf16.mxu0 %vm2863_vm0, %v2862_v1  ;;  %v2541_v21 = vpop.f32.mrf.mxu1 }
  0xf3   : > { %v2521_v15 = vpop.f32.mrf.mxu0  ;;  %v1564_v37 = vor.u32 %v1563_v24, %v1560_v17 }
  0xf4   : > { %v527_v25 = vpop.f32.mrf.mxu1 }
  0xf5   : > { %v433_v22 = vpop.f32.mrf.mxu0  ;;  %v528_v26 = vadd.f32 %v527_v25, %v3401_v32  ;;  %v1565_v45 = vsel %vm1503_vm7, %v1555_v18, %v1564_v37 }
  0xf6   : > { %v2542_v29 = vpop.f32.mrf.mxu1 }
  0xf7   : > { %v2522_v46 = vpop.f32.mrf.mxu0 }
  0xf8   : > { %v532_v34 = vpop.f32.mrf.mxu1  ;;  %2748 = vmatmul.mubr.msk.bf16.gmra.mxu1 %vm350_vm2, %v1556_v27 }
  0xf9   : > { %v668_v30 = vpop.f32.mrf.mxu0  ;;  %2776 = vmatmul.mubr.msk.bf16.gmra.mxu0 %vm350_vm2, %v1718_v10  ;;  %v533_v32 = vadd.f32 %v532_v34, %v3407_v35  ;;  %2751 = vmatprep.mubr.msk.bf16.mxu1 %vm2863_vm0, %v2862_v1 }
  0xfa   : > { %v3462_v31 = vadd.f32 %v668_v30, %v525_v16  ;;  %2779 = vmatprep.mubr.msk.bf16.mxu0 %vm2863_vm0, %v2862_v1  ;;  %v2545_v39 = vpop.f32.mrf.mxu1 }
  0xfb   : > { %v2573_v36 = vpop.f32.mrf.mxu0 }
  0xfc   : > { %v535_v44 = vpop.f32.mrf.mxu1 }
  0xfd   : > { %v671_v40 = vpop.f32.mrf.mxu0  ;;  %v536_v55 = vadd.f32 %v535_v44, %v3420_v49 }
  0xfe   : > { %v3471_v41 = vadd.f32 %v671_v40, %v528_v26  ;;  %v2546_v48 = vpop.f32.mrf.mxu1 }
  0xff   : > { %v2574_v47 = vpop.f32.mrf.mxu0 }
 0x100   : > { %v540_v52 = vpop.f32.mrf.mxu1  ;;  %2752 = vmatmul.mubr.msk.bf16.gmra.mxu1 %vm350_vm2, %v1565_v45 }
 0x101   : > { %v676_v50 = vpop.f32.mrf.mxu0  ;;  %2780 = vmatmul.mubr.msk.bf16.gmra.mxu0 %vm350_vm2, %v1720_v43  ;;  %v541_v56 = vadd.f32 %v540_v52, %v3426_v57  ;;  %2755 = vmatprep.mubr.msk.bf16.mxu1 %vm2863_vm0, %v2862_v1 }
 0x102   : > { %v3477_v35 = vadd.f32 %v676_v50, %v533_v32  ;;  %2783 = vmatprep.mubr.msk.bf16.mxu0 %vm2863_vm0, %v2862_v1  ;;  %v2549_v49 = vpop.f32.mrf.mxu1 }
 0x103   : > { %v2577_v53 = vpop.f32.mrf.mxu0 }
 0x104   : > { %v543_v61 = vpop.f32.mrf.mxu1 }
 0x105   : > { %v679_v54 = vpop.f32.mrf.mxu0  ;;  %v544_v0 = vadd.f32 %v543_v61, %v3439_v62 }
 0x106   : > { %v3486_v58 = vadd.f32 %v679_v54, %v536_v55  ;;  %v2550_v2 = vpop.f32.mrf.mxu1 }
 0x107   : > { %v2578_v63 = vpop.f32.mrf.mxu0 }
 0x108   : > { %v548_v57 = vpop.f32.mrf.mxu1  ;;  %2756 = vmatmul.mubr.msk.bf16.gmra.mxu1 %vm350_vm2, %v1564_v37 }
 0x109   : > { %v684_v3 = vpop.f32.mrf.mxu0  ;;  %2784 = vmatmul.mubr.msk.bf16.gmra.mxu0 %vm350_vm2, %v1722_v60  ;;  %v549_v5 = vadd.f32 %v548_v57, %v3446_v12 }
 0x10a   : > { %v3491_v38 = vadd.f32 %v684_v3, %v541_v56  ;;  %2787 = vmatprep.mubr.msk.bf16.mxu0 %vm2863_vm0, %v2862_v1  ;;  %v2553_v7 = vpop.f32.mrf.mxu1  ;;  %vm2186_vm0 = vsmask.f32 2304 }
 0x10b   : > { %v2581_v4 = vpop.f32.mrf.mxu0  ;;  %vm2187_vm1 = vmand %vm2185_vm15, %vm2186_vm0 }
 0x10c   : > { %v551_v62 = vpop.f32.mrf.mxu1 }
 0x10d   : > { %v687_v8 = vpop.f32.mrf.mxu0  ;;  %v552_v13 = vadd.f32 %v551_v62, %v433_v22 }
 0x10e   : > { %v3497_v9 = vadd.f32 %v687_v8, %v544_v0  ;;  %v2554_v14 = vpop.f32.mrf.mxu1 }
 0x10f   : > { %v2582_v11 = vpop.f32.mrf.mxu0 }
 0x110   : > { %v556_v1 = vpop.f32.mrf.mxu1 }
 0x111   : > { %v692_v15 = vpop.f32.mrf.mxu0  ;;  %2788 = vmatmul.mubr.msk.bf16.gmra.mxu0 %vm350_vm2, %v1721_v28  ;;  %v557_v19 = vadd.f32 %v556_v1, %v3394_v23 }
 0x112   : > { %v3500_v16 = vadd.f32 %v692_v15, %v549_v5  ;;  %v2557_v6 = vpop.f32.mrf.mxu1 }
 0x113   : > { %v2585_v18 = vpop.f32.mrf.mxu0 }
 0x114   : > { %v559_v10 = vpop.f32.mrf.mxu1 }
 0x115   : > { %v695_v21 = vpop.f32.mrf.mxu0  ;;  %v560_v46 = vadd.f32 %v559_v10, %v3404_v20 }
 0x116   : > { %v3503_v12 = vadd.f32 %v695_v21, %v552_v13  ;;  %v2558_v26 = vpop.f32.mrf.mxu1 }
 0x117   : > { %v2586_v25 = vpop.f32.mrf.mxu0 }
 0x118   : > { %v564_v17 = vpop.f32.mrf.mxu1 }
 0x119   : > { %v700_v22 = vpop.f32.mrf.mxu0  ;;  %v565_v29 = vadd.f32 %v564_v17, %v3413_v42 }
 0x11a   : > { %v3506_v27 = vadd.f32 %v700_v22, %v557_v19  ;;  %v2561_v30 = vpop.f32.mrf.mxu1 }
 0x11b   : > { %v2589_v24 = vpop.f32.mrf.mxu0 }
 0x11c   : > { %v567_v23 = vpop.f32.mrf.mxu1 }
 0x11d   : > { %v703_v33 = vpop.f32.mrf.mxu0  ;;  %v568_v32 = vadd.f32 %v567_v23, %v3423_v51 }
 0x11e   : > { %v3509_v34 = vadd.f32 %v703_v33, %v560_v46  ;;  %v2562_v37 = vpop.f32.mrf.mxu1 }
 0x11f   : > { %v2590_v36 = vpop.f32.mrf.mxu0 }
 0x120   : > { %v572_v20 = vpop.f32.mrf.mxu1 }
 0x121   : > { %v708_v39 = vpop.f32.mrf.mxu0  ;;  %v573_v44 = vadd.f32 %v572_v20, %v3432_v59 }
 0x122   : > { %v3512_v40 = vadd.f32 %v708_v39, %v565_v29  ;;  %v2565_v47 = vpop.f32.mrf.mxu1 }
 0x123   : > { %v2593_v43 = vpop.f32.mrf.mxu0 }
 0x124   : > { %v575_v42 = vpop.f32.mrf.mxu1 }
 0x125   : > { %v711_v55 = vpop.f32.mrf.mxu0 }
 0x126   : > { %v3515_v45 = vadd.f32 %v711_v55, %v568_v32  ;;  %v2566_v50 = vpop.f32.mrf.mxu1 }
 0x127   : > { %v2594_v48 = vpop.f32.mrf.mxu0 }
 0x128   : > { %v866_v53 = vpop.f32.mrf.mxu1 }
 0x129   : > { %v716_v28 = vpop.f32.mrf.mxu0  ;;  %v920_v56 = vadd.f32 %v866_v53, %v3462_v31 }
 0x12a   : > { %v3517_v52 = vadd.f32 %v716_v28, %v573_v44  ;;  %v2605_v49 = vpop.f32.mrf.mxu1 }
 0x12b   : > { %v2597_v51 = vpop.f32.mrf.mxu0 }
 0x12c   : > { %v869_v60 = vpop.f32.mrf.mxu1 }
 0x12d   : > { %v719_v54 = vpop.f32.mrf.mxu0  ;;  %v921_v59 = vadd.f32 %v869_v60, %v3471_v41 }
 0x12e   : > { %v2606_v63 = vpop.f32.mrf.mxu1 }
 0x12f   : > { %v2598_v61 = vpop.f32.mrf.mxu0 }
 0x130   : > { %v874_v3 = vpop.f32.mrf.mxu1 }
 0x131   : > { %v1072_v0 = vpop.f32.mrf.mxu0  ;;  %v922_v4 = vadd.f32 %v874_v3, %v3477_v35 }
 0x132   : > { %v3521_v2 = vadd.f32 %v1072_v0, %v920_v56  ;;  %v2609_v5 = vpop.f32.mrf.mxu1 }
 0x133   : > { %v2637_v57 = vpop.f32.mrf.mxu0 }
 0x134   : > { %v877_v62 = vpop.f32.mrf.mxu1 }
 0x135   : > { %v1075_v7 = vpop.f32.mrf.mxu0  ;;  %v923_v11 = vadd.f32 %v877_v62, %v3486_v58 }
 0x136   : > { %v3524_v8 = vadd.f32 %v1075_v7, %v921_v59  ;;  %v2610_v13 = vpop.f32.mrf.mxu1 }
 0x137   : > { %v2638_v31 = vpop.f32.mrf.mxu0 }
 0x138   : > { %v882_v41 = vpop.f32.mrf.mxu1 }
 0x139   : > { %v1080_v14 = vpop.f32.mrf.mxu0  ;;  %v924_v18 = vadd.f32 %v882_v41, %v3491_v38 }
 0x13a   : > { %v3527_v15 = vadd.f32 %v1080_v14, %v922_v4  ;;  %v2613_v19 = vpop.f32.mrf.mxu1 }
 0x13b   : > { %v2641_v1 = vpop.f32.mrf.mxu0 }
 0x13c   : > { %v885_v35 = vpop.f32.mrf.mxu1 }
 0x13d   : > { %v1083_v6 = vpop.f32.mrf.mxu0  ;;  %v925_v25 = vadd.f32 %v885_v35, %v3497_v9 }
 0x13e   : > { %v3530_v21 = vadd.f32 %v1083_v6, %v923_v11  ;;  %v2614_v46 = vpop.f32.mrf.mxu1 }
 0x13f   : > { %v2642_v10 = vpop.f32.mrf.mxu0 }
 0x140   : > { %v890_v58 = vpop.f32.mrf.mxu1 }
 0x141   : > { %v1088_v26 = vpop.f32.mrf.mxu0  ;;  %v926_v24 = vadd.f32 %v890_v58, %v3500_v16 }
 0x142   : > { %v3533_v22 = vadd.f32 %v1088_v26, %v924_v18  ;;  %v2617_v29 = vpop.f32.mrf.mxu1 }
 0x143   : > { %v2645_v17 = vpop.f32.mrf.mxu0 }
 0x144   : > { %v893_v38 = vpop.f32.mrf.mxu1 }
 0x145   : > { %v1091_v30 = vpop.f32.mrf.mxu0  ;;  %v927_v36 = vadd.f32 %v893_v38, %v3503_v12 }
 0x146   : > { %v3536_v33 = vadd.f32 %v1091_v30, %v925_v25  ;;  %v2618_v32 = vpop.f32.mrf.mxu1 }
 0x147   : > { %v2646_v23 = vpop.f32.mrf.mxu0 }
 0x148   : > { %v898_v9 = vpop.f32.mrf.mxu1 }
 0x149   : > { %v1096_v37 = vpop.f32.mrf.mxu0  ;;  %v928_v43 = vadd.f32 %v898_v9, %v3506_v27 }
 0x14a   : > { %v3539_v39 = vadd.f32 %v1096_v37, %v926_v24  ;;  %v2621_v44 = vpop.f32.mrf.mxu1 }
 0x14b   : > { %v2649_v20 = vpop.f32.mrf.mxu0 }
 0x14c   : > { %v901_v16 = vpop.f32.mrf.mxu1 }
 0x14d   : > { %v1099_v47 = vpop.f32.mrf.mxu0  ;;  %v929_v48 = vadd.f32 %v901_v16, %v3509_v34 }
 0x14e   : > { %v3542_v55 = vadd.f32 %v1099_v47, %v927_v36  ;;  %v2622_v50 = vpop.f32.mrf.mxu1 }
 0x14f   : > { %v2650_v42 = vpop.f32.mrf.mxu0 }
 0x150   : > { %v906_v12 = vpop.f32.mrf.mxu1 }
 0x151   : > { %v1104_v28 = vpop.f32.mrf.mxu0  ;;  %v930_v56 = vadd.f32 %v906_v12, %v3512_v40 }
 0x152   : > { %v3545_v53 = vadd.f32 %v1104_v28, %v928_v43  ;;  %v2625_v49 = vpop.f32.mrf.mxu1 }
 0x153   : > { %v2653_v51 = vpop.f32.mrf.mxu0 }
 0x154   : > { %v909_v27 = vpop.f32.mrf.mxu1 }
 0x155   : > { %v1107_v54 = vpop.f32.mrf.mxu0  ;;  %v931_v59 = vadd.f32 %v909_v27, %v3515_v45 }
 0x156   : > { %v3548_v60 = vadd.f32 %v1107_v54, %v929_v48  ;;  %v2626_v63 = vpop.f32.mrf.mxu1 }
 0x157   : > { %v2654_v61 = vpop.f32.mrf.mxu0 }
 0x158   : > { %v914_v34 = vpop.f32.mrf.mxu1 }
 0x159   : > { %v1112_v0 = vpop.f32.mrf.mxu0  ;;  %v932_v4 = vadd.f32 %v914_v34, %v3517_v52 }
 0x15a   : > { %v3551_v3 = vadd.f32 %v1112_v0, %v930_v56  ;;  %v2629_v5 = vpop.f32.mrf.mxu1 }
 0x15b   : > { %v2657_v57 = vpop.f32.mrf.mxu0 }
 0x15c   : > { %v917_v40 = vpop.f32.mrf.mxu1 }
 0x15d   : > { %v1115_v7 = vpop.f32.mrf.mxu0 }
 0x15e   : > { %v3554_v62 = vadd.f32 %v1115_v7, %v931_v59  ;;  %v2630_v11 = vpop.f32.mrf.mxu1 }
 0x15f   : > { %v2658_v31 = vpop.f32.mrf.mxu0 }
 0x160   : > { %v1229_v41 = vpop.f32.mrf.mxu1 }
 0x161   : > { %v1120_v13 = vpop.f32.mrf.mxu0 }
 0x162   : > { %v3556_v14 = vadd.f32 %v1120_v13, %v932_v4  ;;  %v2669_v1 = vpop.f32.mrf.mxu1 }
 0x163   : > { %v2661_v45 = vpop.f32.mrf.mxu0 }
 0x164   : > { %v1232_v19 = vpop.f32.mrf.mxu1 }
 0x165   : > { %v1123_v18 = vpop.f32.mrf.mxu0 }
 0x166   : > { %v2670_v35 = vpop.f32.mrf.mxu1 }
 0x167   : > { %v2662_v6 = vpop.f32.mrf.mxu0 }
 0x168   : > { %v3558_v25 = vpop.f32.mrf.mxu1 }
 0x169   : > { %v1427_v10 = vpop.f32.mrf.mxu0 }
 0x16a   : > { %v2673_v46 = vpop.f32.mrf.mxu1 }
 0x16b   : > { %v2701_v52 = vpop.f32.mrf.mxu0 }
 0x16c   : > { %v3560_v58 = vpop.f32.mrf.mxu1 }
 0x16d   : > { %v1430_v26 = vpop.f32.mrf.mxu0 }
 0x16e   : > { %v2674_v24 = vpop.f32.mrf.mxu1 }
 0x16f   : > { %v2702_v17 = vpop.f32.mrf.mxu0  ;;  %v3603_v24 = vpop.permute.xlu0 %1947 }
 0x170   : > { %v3564_v30 = vpop.f32.mrf.mxu1  ;;  %v1283_v17 = vadd.f32 %v1229_v41, %v3521_v2 }
 0x171   : > { %v3562_v29 = vpop.f32.mrf.mxu0 }
 0x172   : > { %v2677_v23 = vpop.f32.mrf.mxu1 }
 0x173   : > { %v2705_v38 = vpop.f32.mrf.mxu0  ;;  %v1893_v2 = vpop.permute.xlu0 %1892 }
 0x174   : > { %v3568_v32 = vpop.f32.mrf.mxu1 }
 0x175   : > { %v3566_v36 = vpop.f32.mrf.mxu0 }
 0x176   : > { %v2678_v9 = vpop.f32.mrf.mxu1 }
 0x177   : > { %v2706_v37 = vpop.f32.mrf.mxu0 }
 0x178   : > { %v3572_v43 = vpop.f32.mrf.mxu1  ;;  %v1481_v37 = vadd.f32 %v1427_v10, %v1283_v17  ;;  %v1285_v10 = vadd.f32 %v3558_v25, %v3527_v15 }
 0x179   : > { %v3570_v20 = vpop.f32.mrf.mxu0 }
 0x17a   : > { %v2681_v47 = vpop.f32.mrf.mxu1 }
 0x17b   : > { %v2709_v44 = vpop.f32.mrf.mxu0  ;;  %v1284_v47 = vadd.f32 %v1232_v19, %v3524_v8 }
 0x17c   : > { %v3576_v42 = vpop.f32.mrf.mxu1 }
 0x17d   : > { %v3574_v16 = vpop.f32.mrf.mxu0 }
 0x17e   : > { %v2682_v50 = vpop.f32.mrf.mxu1 }
 0x17f   : > { %v2710_v48 = vpop.f32.mrf.mxu0 }
 0x180   : > { %v3580_v12 = vpop.f32.mrf.mxu1 }
 0x181   : > { %v3578_v28 = vpop.f32.mrf.mxu0 }
 0x182   : > { %v2685_v56 = vpop.f32.mrf.mxu1 }
 0x183   : > { %v2713_v51 = vpop.f32.mrf.mxu0  ;;  %v3609_v56 = vld [vmem:[%s3727_s2] ss:$0 sm:$0xff] }
 0x184   : > { %v3584_v54 = vpop.f32.mrf.mxu1 }
 0x185   : > { %v3582_v49 = vpop.f32.mrf.mxu0 }
 0x186   : > { %v2686_v61 = vpop.f32.mrf.mxu1 }
 0x187   : > { %v2714_v27 = vpop.f32.mrf.mxu0 }
 0x188   : > { %v3588_v63 = vpop.f32.mrf.mxu1  ;;  %v1482_v27 = vadd.f32 %v1430_v26, %v1284_v47  ;;  %v1286_v26 = vadd.f32 %v3560_v58, %v3530_v21  ;;  %v1287_v21 = vadd.f32 %v3564_v30, %v3533_v22 }
 0x189   : > { %v3586_v59 = vpop.f32.mrf.mxu0 }
 0x18a   : > { %v2689_v34 = vpop.f32.mrf.mxu1  ;;  %v1484_v15 = vadd.f32 %v3566_v36, %v1286_v26  ;;  %v1485_v36 = vadd.f32 %v3570_v20, %v1287_v21  ;;  %v1288_v20 = vadd.f32 %v3568_v32, %v3536_v33 }
 0x18b   : > { %v2717_v0 = vpop.f32.mrf.mxu0 }
 0x18c   : > { %v3592_v4 = vpop.f32.mrf.mxu1 }
 0x18d   : > { %v3590_v57 = vpop.f32.mrf.mxu0 }
 0x18e   : > { %v2690_v7 = vpop.f32.mrf.mxu1 }
 0x18f   : > { %v2718_v5 = vpop.f32.mrf.mxu0  ;;  %v1483_v7 = vadd.f32 %v3562_v29, %v1285_v10 }
 0x190   : > { %v3596_v31 = vpop.f32.mrf.mxu1 }
 0x191   : > { %v3594_v40 = vpop.f32.mrf.mxu0 }
 0x192   : > { %v2693_v13 = vpop.f32.mrf.mxu1 }
 0x193   : > { %v2721_v11 = vpop.f32.mrf.mxu0 }
 0x194   : > { %v1280_v1 = vpop.f32.mrf.mxu1 }
 0x195   : > { %v3598_v45 = vpop.f32.mrf.mxu0  ;;  %v1898_v1 = vpop.permute.xlu1 %1897 }
 0x196   : > { %v2694_v6 = vpop.f32.mrf.mxu1 }
 0x197   : > { %v2722_v18 = vpop.f32.mrf.mxu0 }
 0x198   : > { %v1633_v52 = vpop.f32.mrf.mxu1 }
 0x199   : > { %v3600_v35 = vpop.f32.mrf.mxu0  ;;  %v1687_v48 = vadd.f32 %v1633_v52, %v1481_v37 }
 0x19a   : > { %v2733_v38 = vpop.f32.mrf.mxu1 }
 0x19b   : > { %v2725_v46 = vpop.f32.mrf.mxu0 }
 0x19c   : > { %v1636_v9 = vpop.f32.mrf.mxu1 }
 0x19d   : > { %v1478_v23 = vpop.f32.mrf.mxu0  ;;  %v1688_v34 = vadd.f32 %v1636_v9, %v1482_v27  ;;  %v1903_v27 = vpop.permute.xlu1 %1902 }
 0x19e   : > { %v2734_v50 = vpop.f32.mrf.mxu1 }
 0x19f   : > { %v2726_v44 = vpop.f32.mrf.mxu0 }
 0x1a0   : > { %v1641_v41 = vpop.f32.mrf.mxu1 }
 0x1a1   : > { %v1790_v51 = vpop.f32.mrf.mxu0  ;;  %v1689_v52 = vadd.f32 %v1641_v41, %v1483_v7 }
 0x1a2   : > { %v1844_v61 = vadd.f32 %v1790_v51, %v1687_v48  ;;  %v2737_v8 = vpop.f32.mrf.mxu1 }
 0x1a3   : > { %v2765_v0 = vpop.f32.mrf.mxu0 }
 0x1a4   : > { %v1864_v5 = vadd.f32 %v3609_v56, %v1844_v61  ;;  %v1644_v18 = vpop.f32.mrf.mxu1 }
 0x1a5   : > { %v1793_v19 = vpop.f32.mrf.mxu0  ;;  %v1690_v50 = vadd.f32 %v1644_v18, %v1484_v15 }
 0x1a6   : > { %v1955_v11 = vmul.f32 %v1893_v2, %v1864_v5  ;;  %v1845_v13 = vadd.f32 %v1793_v19, %v1688_v34  ;;  %v2738_v25 = vpop.f32.mrf.mxu1  ;;  %v2171_v2 = vld [vmem:[%s3233_s10 + $0x4] sm:$0xe] }
 0x1a7   : > { %v2766_v6 = vpop.f32.mrf.mxu0  ;;  %v1908_v25 = vpop.permute.xlu0 %1907 }
 0x1a8   : > { %v2409_v46 = vpack.c.bf16 %v1955_v11, %v1955_v11  ;;  %v1865_v17 = vadd.f32 %v3609_v56, %v1845_v13  ;;  %v1649_v58 = vpop.f32.mrf.mxu1 }
 0x1a9   : > { %v1798_v38 = vpop.f32.mrf.mxu0  ;;  %v1691_v26 = vadd.f32 %v1649_v58, %v1485_v36 }
 0x1aa   : > { %v2028_v29 = vshrl.u32 %v2409_v46, 16  ;;  %v2031_v23 = vshll.u32 %v2409_v46, 16  ;;  %v1956_v37 = vmul.f32 %v1898_v1, %v1865_v17  ;;  %v1846_v9 = vadd.f32 %v1798_v38, %v1689_v52  ;;  %v2741_v22 = vpop.f32.mrf.mxu1 }
 0x1ab   : > { %v2769_v44 = vpop.f32.mrf.mxu0  ;;  %v1486_v46 = vadd.f32 %v3574_v16, %v1288_v20  ;;  %v1918_v20 = vpop.permute.xlu0 %1917 }
 0x1ac   : > { %v2030_v47 = vrot.slane %v2028_v29, 6  ;;  %v2033_v48 = vrot.slane %v2031_v23, 7  ;;  %v2410_v51 = vpack.c.bf16 %v1956_v37, %v1956_v37  ;;  %v1866_v30 = vadd.f32 %v3609_v56, %v1846_v9  ;;  %v1652_v19 = vpop.f32.mrf.mxu1  ;;  %v1913_v29 = vpop.permute.xlu1 %1912 }
 0x1ad   : > { %v1801_v41 = vpop.f32.mrf.mxu0  ;;  %v1289_v44 = vadd.f32 %v3572_v43, %v3539_v39 }
 0x1ae   : > { %v2034_v0 = vor.u32 %v2033_v48, %v2030_v47  ;;  %v2037_v10 = vshrl.u32 %v2410_v51, 16  ;;  %v2040_v34 = vshll.u32 %v2410_v51, 16  ;;  %v1847_v5 = vadd.f32 %v1801_v41, %v1690_v50  ;;  %v2742_v33 = vpop.f32.mrf.mxu1 }
 0x1af   : > { %v1957_v8 = vmul.f32 %v1903_v27, %v1866_v30  ;;  %v2770_v7 = vpop.f32.mrf.mxu0  ;;  %v1692_v48 = vadd.f32 %v1652_v19, %v1486_v46  ;;  %v1487_v22 = vadd.f32 %v3578_v28, %v1289_v44 }
 0x1b0   : > { %v2172_v11 = vsel %vm3624_vm11, %v2034_v0, %v2171_v2  ;;  %v2039_v13 = vrot.slane %v2037_v10, 6  ;;  %v2042_v1 = vrot.slane %v2040_v34, 7  ;;  %v1867_v52 = vadd.f32 %v3609_v56, %v1847_v5  ;;  %v1657_v21 = vpop.f32.mrf.mxu1 }
 0x1b1   : > { %2173 = vst [vmem:[%s3233_s10 + $0x4] sm:$0xe] %v2172_v11  ;;  %v2411_v6 = vpack.c.bf16 %v1957_v8, %v1957_v8  ;;  %v1806_v32 = vpop.f32.mrf.mxu0  ;;  %v2035_v17 = vrot.slane %v2034_v0, 4  ;;  %v1290_v2 = vadd.f32 %v3576_v42, %v3542_v55  ;;  %v1693_v8 = vadd.f32 %v1657_v21, %v1487_v22 }
 0x1b2   : > { %v2043_v15 = vor.u32 %v2042_v1, %v2039_v13  ;;  %v1848_v38 = vadd.f32 %v1806_v32, %v1691_v26  ;;  %v1958_v9 = vmul.f32 %v1908_v25, %v1867_v52  ;;  %v2745_v36 = vpop.f32.mrf.mxu1  ;;  %v1291_v32 = vadd.f32 %v3580_v12, %v3545_v53 }
 0x1b3   : > { %v2047_v23 = vshrl.u32 %v2411_v6, 16  ;;  %v2050_v37 = vshll.u32 %v2411_v6, 16  ;;  %v2773_v58 = vpop.f32.mrf.mxu0  ;;  %v1488_v11 = vadd.f32 %v3582_v49, %v1290_v2 }
 0x1b4   : > { %v2044_v47 = vsel %vm3637_vm14, %v2035_v17, %v2043_v15  ;;  %v1868_v50 = vadd.f32 %v3609_v56, %v1848_v38  ;;  %v2412_v27 = vpack.c.bf16 %v1958_v9, %v1958_v9  ;;  %v2045_v43 = vrot.slane %v2043_v15, 4  ;;  %v1660_v34 = vpop.f32.mrf.mxu1 }
 0x1b5   : > { %2174 = vst.msk [vmem:[%s3233_s10 + $0x8] sm:$0xf] %vm1968_vm6, %v2044_v47  ;;  %v2049_v16 = vrot.slane %v2047_v23, 6  ;;  %v2052_v51 = vrot.slane %v2050_v37, 7  ;;  %v1809_v61 = vpop.f32.mrf.mxu0  ;;  %v1489_v37 = vadd.f32 %v3586_v59, %v1291_v32  ;;  %v1294_v32 = vadd.f32 %v3592_v4, %v3554_v62 }
 0x1b6   : > { %v1959_v30 = vmul.f32 %v1913_v29, %v1868_v50  ;;  %v1849_v39 = vadd.f32 %v1809_v61, %v1692_v48  ;;  %v2057_v0 = vshrl.u32 %v2412_v27, 16  ;;  %v2060_v10 = vshll.u32 %v2412_v27, 16  ;;  %v2746_v13 = vpop.f32.mrf.mxu1  ;;  %v1923_v50 = vpop.permute.xlu1 %1922 }
 0x1b7   : > { %v2053_v41 = vor.u32 %v2052_v51, %v2049_v16  ;;  %v2774_v5 = vpop.f32.mrf.mxu0  ;;  %v1694_v29 = vadd.f32 %v1660_v34, %v1488_v11  ;;  %v1292_v51 = vadd.f32 %v3584_v54, %v3548_v60  ;;  %v1928_v54 = vpop.permute.xlu0 %1927 }
 0x1b8   : > { %v2413_v19 = vpack.c.bf16 %v1959_v30, %v1959_v30  ;;  %v1869_v7 = vadd.f32 %v3609_v56, %v1849_v39  ;;  %v2059_v42 = vrot.slane %v2057_v0, 6  ;;  %v2062_v28 = vrot.slane %v2060_v10, 7  ;;  %v1665_v49 = vpop.f32.mrf.mxu1 }
 0x1b9   : > { %v2054_v55 = vsel %vm3637_vm14, %v2045_v43, %v2053_v41  ;;  %v1814_v1 = vpop.f32.mrf.mxu0  ;;  %v2055_v46 = vrot.slane %v2053_v41, 4  ;;  %v1695_v30 = vadd.f32 %v1665_v49, %v1489_v37  ;;  %v1490_v10 = vadd.f32 %v3590_v57, %v1292_v51 }
 0x1ba   : > { %2175 = vst.msk [vmem:[%s3233_s10 + $0xc] sm:$0xf] %vm1968_vm6, %v2054_v55  ;;  %v2067_v26 = vshrl.u32 %v2413_v19, 16  ;;  %v2070_v6 = vshll.u32 %v2413_v19, 16  ;;  %v1960_v52 = vmul.f32 %v1918_v20, %v1869_v7  ;;  %v1850_v33 = vadd.f32 %v1814_v1, %v1693_v8  ;;  %v2749_v44 = vpop.f32.mrf.mxu1 }
 0x1bb   : > { %v2063_v17 = vor.u32 %v2062_v28, %v2059_v42  ;;  %v2777_v15 = vpop.f32.mrf.mxu0  ;;  %v1293_v55 = vadd.f32 %v3588_v63, %v3551_v3  ;;  %v1933_v28 = vpop.permute.xlu1 %1932 }
 0x1bc   : > { %v2069_v25 = vrot.slane %v2067_v26, 6  ;;  %v2072_v38 = vrot.slane %v2070_v6, 7  ;;  %v2414_v23 = vpack.c.bf16 %v1960_v52, %v1960_v52  ;;  %v1870_v58 = vadd.f32 %v3609_v56, %v1850_v33  ;;  %v1668_v27 = vpop.f32.mrf.mxu1 }
 0x1bd   : > { %v2064_v9 = vsel %vm3637_vm14, %v2055_v46, %v2063_v17  ;;  %v2065_v21 = vrot.slane %v2063_v17, 4  ;;  %v1817_v47 = vpop.f32.mrf.mxu0  ;;  %v1696_v13 = vadd.f32 %v1668_v27, %v1490_v10  ;;  %v1491_v46 = vadd.f32 %v3594_v40, %v1293_v55 }
 0x1be   : > { %2176 = vst.msk [vmem:[%s3233_s10 + $0x10] sm:$0xf] %vm1968_vm6, %v2064_v9  ;;  %v2073_v53 = vor.u32 %v2072_v38, %v2069_v25  ;;  %v2077_v12 = vshrl.u32 %v2414_v23, 16  ;;  %v2080_v48 = vshll.u32 %v2414_v23, 16  ;;  %v1851_v16 = vadd.f32 %v1817_v47, %v1694_v29  ;;  %v2750_v41 = vpop.f32.mrf.mxu1  ;;  %v1938_v23 = vpop.permute.xlu0 %1937 }
 0x1bf   : > { %v1961_v59 = vmul.f32 %v1923_v50, %v1870_v58  ;;  %v2778_v36 = vpop.f32.mrf.mxu0  ;;  %v1492_v58 = vadd.f32 %v3598_v45, %v1294_v32 }
 0x1c0   : > { %v2074_v61 = vsel %vm3637_vm14, %v2065_v21, %v2073_v53  ;;  %v2079_v2 = vrot.slane %v2077_v12, 6  ;;  %v2082_v22 = vrot.slane %v2080_v48, 7  ;;  %v1871_v43 = vadd.f32 %v3609_v56, %v1851_v16  ;;  %v1673_v7 = vpop.f32.mrf.mxu1 }
 0x1c1   : > { %2177 = vst.msk [vmem:[%s3233_s10 + $0x14] sm:$0xf] %vm1968_vm6, %v2074_v61  ;;  %v2415_v39 = vpack.c.bf16 %v1961_v59, %v1961_v59  ;;  %v1822_v0 = vpop.f32.mrf.mxu0  ;;  %v2075_v60 = vrot.slane %v2073_v53, 4  ;;  %v1697_v37 = vadd.f32 %v1673_v7, %v1491_v46  ;;  %v1295_v16 = vadd.f32 %v3596_v31, %v3556_v14  ;;  %v1943_v14 = vpop.permute.xlu1 %1942 }
 0x1c2   : > { %v2083_v34 = vor.u32 %v2082_v22, %v2079_v2  ;;  %v1852_v5 = vadd.f32 %v1822_v0, %v1695_v30  ;;  %v1962_v19 = vmul.f32 %v1928_v54, %v1871_v43  ;;  %v2753_v52 = vpop.f32.mrf.mxu1 }
 0x1c3   : > { %v2087_v20 = vshrl.u32 %v2415_v39, 16  ;;  %v2090_v8 = vshll.u32 %v2415_v39, 16  ;;  %v2781_v11 = vpop.f32.mrf.mxu0  ;;  %v1493_v30 = vadd.f32 %v3600_v35, %v1295_v16 }
 0x1c4   : > { %v2084_v42 = vsel %vm3637_vm14, %v2075_v60, %v2083_v34  ;;  %v1872_v1 = vadd.f32 %v3609_v56, %v1852_v5  ;;  %v2416_v6 = vpack.c.bf16 %v1962_v19, %v1962_v19  ;;  %v2085_v17 = vrot.slane %v2083_v34, 4  ;;  %v1676_v38 = vpop.f32.mrf.mxu1 }
 0x1c5   : > { %2178 = vst.msk [vmem:[%s3233_s10 + $0x18] sm:$0xf] %vm1968_vm6, %v2084_v42  ;;  %v2089_v57 = vrot.slane %v2087_v20, 6  ;;  %v2092_v26 = vrot.slane %v2090_v8, 7  ;;  %v1825_v33 = vpop.f32.mrf.mxu0  ;;  %v1698_v2 = vadd.f32 %v1676_v38, %v1492_v58 }
 0x1c6   : > { %v1963_v3 = vmul.f32 %v1933_v28, %v1872_v1  ;;  %v1853_v63 = vadd.f32 %v1825_v33, %v1696_v13  ;;  %v2097_v15 = vshrl.u32 %v2416_v6, 16  ;;  %v2100_v25 = vshll.u32 %v2416_v6, 16  ;;  %v2754_v44 = vpop.f32.mrf.mxu1 }
 0x1c7   : > { %v2093_v49 = vor.u32 %v2092_v26, %v2089_v57  ;;  %v2782_v29 = vpop.f32.mrf.mxu0 }
 0x1c8   : > { %v2417_v9 = vpack.c.bf16 %v1963_v3, %v1963_v3  ;;  %v1873_v21 = vadd.f32 %v3609_v56, %v1853_v63  ;;  %v2099_v4 = vrot.slane %v2097_v15, 6  ;;  %v2102_v40 = vrot.slane %v2100_v25, 7  ;;  %v1681_v45 = vpop.f32.mrf.mxu1  ;;  %v1953_v63 = vpop.permute.xlu0 %1952 }
 0x1c9   : > { %v2094_v62 = vsel %vm3637_vm14, %v2085_v17, %v2093_v49  ;;  %v1830_v47 = vpop.f32.mrf.mxu0  ;;  %v2095_v51 = vrot.slane %v2093_v49, 4  ;;  %v1699_v11 = vadd.f32 %v1681_v45, %v1493_v30 }
 0x1ca   : > { %2179 = vst.msk [vmem:[%s3233_s10 + $0x1c] sm:$0xf] %vm1968_vm6, %v2094_v62  ;;  %v2107_v53 = vshrl.u32 %v2417_v9, 16  ;;  %v2110_v12 = vshll.u32 %v2417_v9, 16  ;;  %v1964_v48 = vmul.f32 %v1938_v23, %v1873_v21  ;;  %v1854_v50 = vadd.f32 %v1830_v47, %v1697_v37  ;;  %v2757_v0 = vpop.f32.mrf.mxu1 }
 0x1cb   : > { %v2103_v59 = vor.u32 %v2102_v40, %v2099_v4  ;;  %v2785_v27 = vpop.f32.mrf.mxu0 }
 0x1cc   : > { %v2109_v36 = vrot.slane %v2107_v53, 6  ;;  %v2112_v61 = vrot.slane %v2110_v12, 7  ;;  %v2418_v22 = vpack.c.bf16 %v1964_v48, %v1964_v48  ;;  %v1874_v41 = vadd.f32 %v3609_v56, %v1854_v50  ;;  %v1684_v20 = vpop.f32.mrf.mxu1 }
 0x1cd   : > { %v2104_v39 = vsel %vm3637_vm14, %v2095_v51, %v2103_v59  ;;  %v2105_v43 = vrot.slane %v2103_v59, 4  ;;  %v1833_v10 = vpop.f32.mrf.mxu0  ;;  %v2188_v51 = vld [vmem:[%s3233_s10 + $0x34] sm:$0x7] }
 0x1ce   : > { %2180 = vst.msk [vmem:[%s3233_s10 + $0x20] sm:$0xf] %vm1968_vm6, %v2104_v39  ;;  %v2113_v31 = vor.u32 %v2112_v61, %v2109_v36  ;;  %v2117_v60 = vshrl.u32 %v2418_v22, 16  ;;  %v2120_v54 = vshll.u32 %v2418_v22, 16  ;;  %v1855_v34 = vadd.f32 %v1833_v10, %v1698_v2  ;;  %v2758_v28 = vpop.f32.mrf.mxu1 }
 0x1cf   : > { %v1965_v5 = vmul.f32 %v1943_v14, %v1874_v41  ;;  %v2786_v8 = vpop.f32.mrf.mxu0 }
 0x1d0   : > { %v2114_v35 = vsel %vm3637_vm14, %v2105_v43, %v2113_v31  ;;  %v2119_v19 = vrot.slane %v2117_v60, 6  ;;  %v2122_v7 = vrot.slane %v2120_v54, 7  ;;  %v1875_v42 = vadd.f32 %v3609_v56, %v1855_v34 }
 0x1d1   : > { %2181 = vst.msk [vmem:[%s3233_s10 + $0x24] sm:$0xf] %vm1968_vm6, %v2114_v35  ;;  %v2419_v55 = vpack.c.bf16 %v1965_v5, %v1965_v5  ;;  %v1838_v13 = vpop.f32.mrf.mxu0  ;;  %v2115_v1 = vrot.slane %v2113_v31, 4 }
 0x1d2   : > { %v2123_v57 = vor.u32 %v2122_v7, %v2119_v19  ;;  %v1856_v26 = vadd.f32 %v1838_v13, %v1699_v11  ;;  %v1966_v33 = vmul.f32 %v3603_v24, %v1875_v42 }
 0x1d3   : > { %v2127_v6 = vshrl.u32 %v2419_v55, 16  ;;  %v2130_v52 = vshll.u32 %v2419_v55, 16  ;;  %v2789_v32 = vpop.f32.mrf.mxu0 }
 0x1d4   : > { %v2124_v46 = vsel %vm3637_vm14, %v2115_v1, %v2123_v57  ;;  %v1876_v3 = vadd.f32 %v3609_v56, %v1856_v26  ;;  %v2420_v15 = vpack.c.bf16 %v1966_v33, %v1966_v33  ;;  %v2125_v29 = vrot.slane %v2123_v57, 4 }
 0x1d5   : > { %2182 = vst.msk [vmem:[%s3233_s10 + $0x28] sm:$0xf] %vm1968_vm6, %v2124_v46  ;;  %v2129_v17 = vrot.slane %v2127_v6, 6  ;;  %v2132_v49 = vrot.slane %v2130_v52, 7  ;;  %v1841_v25 = vpop.f32.mrf.mxu0 }
 0x1d6   : > { %v1967_v38 = vmul.f32 %v1953_v63, %v1876_v3  ;;  %v2137_v37 = vshrl.u32 %v2420_v15, 16  ;;  %v2140_v9 = vshll.u32 %v2420_v15, 16 }
 0x1d7   : > { %v2133_v23 = vor.u32 %v2132_v49, %v2129_v17  ;;  %v2790_v24 = vpop.f32.mrf.mxu0 }
 0x1d8   : > { %v2421_v21 = vpack.c.bf16 %v1967_v38, %v1967_v38  ;;  %v2139_v56 = vrot.slane %v2137_v37, 6  ;;  %v2142_v62 = vrot.slane %v2140_v9, 7 }
 0x1d9   : > { %v2134_v58 = vsel %vm3637_vm14, %v2125_v29, %v2133_v23  ;;  %v2135_v44 = vrot.slane %v2133_v23, 4 }
 0x1da   : > { %2183 = vst.msk [vmem:[%s3233_s10 + $0x2c] sm:$0xf] %vm1968_vm6, %v2134_v58  ;;  %v2147_v4 = vshrl.u32 %v2421_v21, 16  ;;  %v2150_v40 = vshll.u32 %v2421_v21, 16  ;;  %v2143_v47 = vor.u32 %v2142_v62, %v2139_v56 }
 0x1dc   : > { %v2149_v53 = vrot.slane %v2147_v4, 6  ;;  %v2152_v12 = vrot.slane %v2150_v40, 7  ;;  %v2144_v48 = vsel %vm3637_vm14, %v2135_v44, %v2143_v47  ;;  %v2145_v50 = vrot.slane %v2143_v47, 4 }
 0x1dd   : > { %2184 = vst.msk [vmem:[%s3233_s10 + $0x30] sm:$0xf] %vm1968_vm6, %v2144_v48 }
 0x1de   : > { %v2153_v16 = vor.u32 %v2152_v12, %v2149_v53 }
 0x1e0   : > { %v2154_v59 = vsel %vm3637_vm14, %v2145_v50, %v2153_v16 }
 0x1e1   : > { %v2189_v45 = vsel %vm2187_vm1, %v2154_v59, %v2188_v51 }
 0x1e2   : > { %2190 = vst [vmem:[%s3233_s10 + $0x34] sm:$0x7] %v2189_v45 }
 0x1e3 PF: > { %s15_s18 = sadd.s32 1, %s2860_s18  }
 0x1e4   : > { %p12_p4 = scmp.ge.s32.totalorder %s15_s18, 4  }
 0x1e6   :  { %14 = sbr.rel (!%p12_p4) target bundleno = 1 (0x1), region = 78 }

</bundles_post_ra>
